<compile_context>
chip_gen: v7x
topology: tpu7x:2x2x1
jax: 0.10.0
libtpu: 0.0.40
codegen_flags: <defaults>
</compile_context>

<pallas_src>
import jax
import jax.numpy as jnp
from jax.experimental import pallas as pl
from jax.experimental.pallas import tpu as pltpu


# rows of the packed bias / LayerNorm vector table
_ROW_BP, _ROW_BQKV, _ROW_BO = 0, 1, 2
_ROW_LN1G, _ROW_LN1B = 3, 4
_ROW_B1, _ROW_B2 = 5, 6
_ROW_LN2G, _ROW_LN2B = 7, 8
_ROW_BC, _ROW_BB1, _ROW_BB2 = 9, 10, 11
_N_VEC_ROWS = 12


def _mm(a, w):
    """(..., K) f32 @ (K, N) bf16 -> (..., N) f32 (bf16 MXU, f32 accumulate)."""
    return jax.lax.dot_general(
        a.astype(jnp.bfloat16),
        w.astype(jnp.bfloat16),
        dimension_numbers=(((a.ndim - 1,), (0,)), ((), ())),
        preferred_element_type=jnp.float32,
    )


def _head_kernel(x_ref,
                 wp_ref, wqkv_ref, wo_ref,
                 w1_ref, w2_ref,
                 wc_ref, wb1_ref, wb2_ref,
                 vec_ref,
                 out_ref):
    # Whole head fused in a single grid step; everything resident in VMEM.
    B, S, _ = x_ref.shape
    D = wp_ref.shape[1]
    F = w1_ref.shape[1]
    NC = wc_ref.shape[1]
    OPAD = out_ref.shape[-1]

    x = x_ref[...].astype(jnp.float32)                      # (B, S, C)
    vec = vec_ref[...]                                      # (12, VPAD) f32

    bp = vec[_ROW_BP, :D]
    bqkv = vec[_ROW_BQKV, :3 * D]
    bo = vec[_ROW_BO, :D]
    ln1g = vec[_ROW_LN1G, :D]
    ln1b = vec[_ROW_LN1B, :D]
    b1 = vec[_ROW_B1, :F]
    b2 = vec[_ROW_B2, :D]
    ln2g = vec[_ROW_LN2G, :D]
    ln2b = vec[_ROW_LN2B, :D]
    bc = vec[_ROW_BC, :NC]
    bb1 = vec[_ROW_BB1, :D]
    bb2 = vec[_ROW_BB2, :4]

    # input projection (1x1 conv over NCHW == per-token linear in token layout)
    h = _mm(x, wp_ref[...]) + bp                            # (B, S, D)

    # fused Q/K/V projection, single-head self-attention
    qkv = _mm(h, wqkv_ref[...]) + bqkv                      # (B, S, 3D)
    q = qkv[..., :D]
    k = qkv[..., D:2 * D]
    v = qkv[..., 2 * D:3 * D]

    # scores: contract last dims (no transpose of K), bf16 MXU, f32 accum
    scores = jax.lax.dot_general(
        q.astype(jnp.bfloat16), k.astype(jnp.bfloat16),
        dimension_numbers=(((2,), (2,)), ((0,), (0,))),
        preferred_element_type=jnp.float32)                 # (B, S, S)
    scores = scores * (1.0 / (float(D) ** 0.5))
    scores = scores - jnp.max(scores, axis=-1, keepdims=True)
    p = jnp.exp(scores)
    p = p * pl.reciprocal(jnp.sum(p, axis=-1, keepdims=True), approx=True)

    attn = jax.lax.dot_general(
        p.astype(jnp.bfloat16), v.astype(jnp.bfloat16),
        dimension_numbers=(((2,), (1,)), ((0,), (0,))),
        preferred_element_type=jnp.float32)                 # (B, S, D)

    o = _mm(attn, wo_ref[...]) + bo
    h = h + o

    # LayerNorm 1
    mu = jnp.mean(h, axis=-1, keepdims=True)
    var = jnp.mean((h - mu) ** 2, axis=-1, keepdims=True)
    h = (h - mu) * jax.lax.rsqrt(var + 1e-5) * ln1g + ln1b

    # FFN
    f = _mm(h, w1_ref[...]) + b1
    f = jnp.maximum(f, 0.0)
    f = _mm(f, w2_ref[...]) + b2
    h = h + f

    # LayerNorm 2 -> encoder output
    mu = jnp.mean(h, axis=-1, keepdims=True)
    var = jnp.mean((h - mu) ** 2, axis=-1, keepdims=True)
    enc = (h - mu) * jax.lax.rsqrt(var + 1e-5) * ln2g + ln2b  # (B, S, D)

    # classification branch
    cls = _mm(enc, wc_ref[...]) + bc                          # (B, S, NC)

    # bbox regression MLP + sigmoid (cxcywh in [0,1], pre-rescale)
    bb = _mm(enc, wb1_ref[...]) + bb1
    bb = jnp.maximum(bb, 0.0)
    bb = _mm(bb, wb2_ref[...]) + bb2
    box = jax.nn.sigmoid(bb)                                  # (B, S, 4)

    # single lane-dense packed store: [enc | cls | box | pad] -> (B, S, OPAD)
    pad_w = OPAD - (D + NC + 4)
    pad = jnp.zeros((B, S, pad_w), jnp.float32)
    out_ref[...] = jnp.concatenate([enc, cls, box, pad], axis=-1).astype(out_ref.dtype)


def _round_up(n, m):
    return ((n + m - 1) // m) * m


def head_simple_test(x_nchw, params):
    """Returns (cls_logits, bbox_preds, encoder_output)."""
    B, C, H, W = x_nchw.shape
    S = H * W
    # PyTorch NCHW -> token layout (B, S=H*W, C) so feature dims sit on lanes.
    tokens = jnp.transpose(x_nchw, (0, 2, 3, 1)).reshape(B, S, C)

    D = params["wp"].shape[1]
    F = params["w1"].shape[1]
    NC = params["wc"].shape[1]

    # fuse Q/K/V projection weights & biases
    wqkv = jnp.concatenate([params["wq"], params["wk"], params["wv"]], axis=1)  # (D, 3D)
    bqkv = jnp.concatenate([params["bq"], params["bk"], params["bv"]], axis=1)  # (1, 3D)

    # pack all bias / LayerNorm vectors into one lane-aligned table
    VPAD = _round_up(max(3 * D, F, D, NC, 4, 128), 128)

    def row(v):
        v = jnp.asarray(v, jnp.float32).reshape(-1)
        return jnp.pad(v, (0, VPAD - v.shape[0]))

    vec = jnp.stack([
        row(params["bp"]), row(bqkv), row(params["bo"]),
        row(params["ln1g"]), row(params["ln1b"]),
        row(params["b1"]), row(params["b2"]),
        row(params["ln2g"]), row(params["ln2b"]),
        row(params["bc"]), row(params["bb1"]), row(params["bb2"]),
    ], axis=0)                                               # (12, VPAD) f32

    # pre-cast matmul weights to bf16 once (halves weight DMA, MXU-native)
    wts = [params["wp"], wqkv, params["wo"],
           params["w1"], params["w2"],
           params["wc"], params["wb1"], params["wb2"]]
    wts = [w.astype(jnp.bfloat16) for w in wts]

    OPAD = _round_up(D + NC + 4, 128)

    def full_spec(a):
        n = a.ndim
        return pl.BlockSpec(a.shape, lambda i, _n=n: (0,) * _n)

    in_specs = [full_spec(tokens)] + [full_spec(w) for w in wts] + [full_spec(vec)]

    packed = pl.pallas_call(
        _head_kernel,
        grid=(1,),
        in_specs=in_specs,
        out_specs=pl.BlockSpec((B, S, OPAD), lambda i: (0, 0, 0)),
        out_shape=jax.ShapeDtypeStruct((B, S, OPAD), jnp.float32),
        compiler_params=pltpu.CompilerParams(
            dimension_semantics=("arbitrary",),
            vmem_limit_bytes=64 * 1024 * 1024),
    )(tokens, *wts, vec)

    enc = packed[..., :D]
    cls = packed[..., D:D + NC]
    box = packed[..., D + NC:D + NC + 4]
    return cls, box, enc


def init_params(key, C, D, F, NC):
    ks = jax.random.split(key, 12)
    scale = 0.05

    def w(k, shape):
        return jax.random.normal(k, shape, jnp.float32) * scale

    zeros = lambda shape: jnp.zeros(shape, jnp.float32)
    ones = lambda shape: jnp.ones(shape, jnp.float32)
    return {
        "wp": w(ks[0], (C, D)), "bp": zeros((1, D)),
        "wq": w(ks[1], (D, D)), "bq": zeros((1, D)),
        "wk": w(ks[2], (D, D)), "bk": zeros((1, D)),
        "wv": w(ks[3], (D, D)), "bv": zeros((1, D)),
        "wo": w(ks[4], (D, D)), "bo": zeros((1, D)),
        "ln1g": ones((1, D)), "ln1b": zeros((1, D)),
        "w1": w(ks[5], (D, F)), "b1": zeros((1, F)),
        "w2": w(ks[6], (F, D)), "b2": zeros((1, D)),
        "ln2g": ones((1, D)), "ln2b": zeros((1, D)),
        "wc": w(ks[7], (D, NC)), "bc": zeros((1, NC)),
        "wb1": w(ks[8], (D, D)), "bb1": zeros((1, D)),
        "wb2": w(ks[9], (D, 4)), "bb2": zeros((1, 4)),
    }


if __name__ == "__main__":
    B, C, H, W = 2, 16, 8, 8       # small NCHW feature map from the backbone
    D, F, NC = 32, 64, 16          # hidden, FFN, num_classes

    key = jax.random.PRNGKey(0)
    kx, kp = jax.random.split(key)
    x = jax.random.normal(kx, (B, C, H, W), jnp.float32)
    params = init_params(kp, C, D, F, NC)

    cls_logits, bbox_preds, encoder_out = head_simple_test(x, params)
    jax.block_until_ready((cls_logits, bbox_preds, encoder_out))

    assert cls_logits.shape == (B, H * W, NC)
    assert bbox_preds.shape == (B, H * W, 4)
    assert encoder_out.shape == (B, H * W, D)
    assert bool(jnp.all(jnp.isfinite(cls_logits)))
    assert bool(jnp.all((bbox_preds >= 0.0) & (bbox_preds <= 1.0)))
    print("KERNEL_OK")
</pallas_src>

<mosaic_0001>
module attributes {stable_mosaic.version = 11 : i64} {
  func.func @_head_kernel(%arg0: i32, %arg1: memref<2x64x16xf32, #tpu.memory_space<vmem>>, %arg2: memref<16x32xbf16, #tpu.memory_space<vmem>>, %arg3: memref<32x96xbf16, #tpu.memory_space<vmem>>, %arg4: memref<32x32xbf16, #tpu.memory_space<vmem>>, %arg5: memref<32x64xbf16, #tpu.memory_space<vmem>>, %arg6: memref<64x32xbf16, #tpu.memory_space<vmem>>, %arg7: memref<32x16xbf16, #tpu.memory_space<vmem>>, %arg8: memref<32x32xbf16, #tpu.memory_space<vmem>>, %arg9: memref<32x4xbf16, #tpu.memory_space<vmem>>, %arg10: memref<12x128xf32, #tpu.memory_space<vmem>>, %arg11: memref<2x64x128xf32, #tpu.memory_space<vmem>>) attributes {dimension_semantics = [#tpu.dimension_semantics<arbitrary>], iteration_bounds = array<i64: 1>, scalar_prefetch = 0 : i64, scratch_operands = 0 : i64, tpu.core_type = #tpu.core_type<tc>, window_params = [{pipeline_mode = #tpu.pipeline_mode<synchronous>, transform_indices = @transform_0, window_bounds = array<i64: 2, 64, 16>}, {pipeline_mode = #tpu.pipeline_mode<synchronous>, transform_indices = @transform_1, window_bounds = array<i64: 16, 32>}, {pipeline_mode = #tpu.pipeline_mode<synchronous>, transform_indices = @transform_2, window_bounds = array<i64: 32, 96>}, {pipeline_mode = #tpu.pipeline_mode<synchronous>, transform_indices = @transform_3, window_bounds = array<i64: 32, 32>}, {pipeline_mode = #tpu.pipeline_mode<synchronous>, transform_indices = @transform_4, window_bounds = array<i64: 32, 64>}, {pipeline_mode = #tpu.pipeline_mode<synchronous>, transform_indices = @transform_5, window_bounds = array<i64: 64, 32>}, {pipeline_mode = #tpu.pipeline_mode<synchronous>, transform_indices = @transform_6, window_bounds = array<i64: 32, 16>}, {pipeline_mode = #tpu.pipeline_mode<synchronous>, transform_indices = @transform_7, window_bounds = array<i64: 32, 32>}, {pipeline_mode = #tpu.pipeline_mode<synchronous>, transform_indices = @transform_8, window_bounds = array<i64: 32, 4>}, {pipeline_mode = #tpu.pipeline_mode<synchronous>, transform_indices = @transform_9, window_bounds = array<i64: 12, 128>}, {pipeline_mode = #tpu.pipeline_mode<synchronous>, transform_indices = @transform_10, window_bounds = array<i64: 2, 64, 128>}]} {
    %c0 = arith.constant 0 : index
    %c0_0 = arith.constant 0 : index
    %c0_1 = arith.constant 0 : index
    %0 = vector.load %arg1[%c0, %c0_0, %c0_1] : memref<2x64x16xf32, #tpu.memory_space<vmem>>, vector<2x64x16xf32>
    %c0_2 = arith.constant 0 : index
    %c0_3 = arith.constant 0 : index
    %1 = vector.load %arg10[%c0_2, %c0_3] : memref<12x128xf32, #tpu.memory_space<vmem>>, vector<12x128xf32>
    %2 = vector.extract_strided_slice %1 {offsets = [0, 0], sizes = [1, 32], strides = [1, 1]} : vector<12x128xf32> to vector<1x32xf32>
    %3 = vector.shape_cast %2 : vector<1x32xf32> to vector<32xf32>
    %4 = vector.extract_strided_slice %1 {offsets = [1, 0], sizes = [1, 96], strides = [1, 1]} : vector<12x128xf32> to vector<1x96xf32>
    %5 = vector.shape_cast %4 : vector<1x96xf32> to vector<96xf32>
    %6 = vector.extract_strided_slice %1 {offsets = [2, 0], sizes = [1, 32], strides = [1, 1]} : vector<12x128xf32> to vector<1x32xf32>
    %7 = vector.shape_cast %6 : vector<1x32xf32> to vector<32xf32>
    %8 = vector.extract_strided_slice %1 {offsets = [3, 0], sizes = [1, 32], strides = [1, 1]} : vector<12x128xf32> to vector<1x32xf32>
    %9 = vector.shape_cast %8 : vector<1x32xf32> to vector<32xf32>
    %10 = vector.extract_strided_slice %1 {offsets = [4, 0], sizes = [1, 32], strides = [1, 1]} : vector<12x128xf32> to vector<1x32xf32>
    %11 = vector.shape_cast %10 : vector<1x32xf32> to vector<32xf32>
    %12 = vector.extract_strided_slice %1 {offsets = [5, 0], sizes = [1, 64], strides = [1, 1]} : vector<12x128xf32> to vector<1x64xf32>
    %13 = vector.shape_cast %12 : vector<1x64xf32> to vector<64xf32>
    %14 = vector.extract_strided_slice %1 {offsets = [6, 0], sizes = [1, 32], strides = [1, 1]} : vector<12x128xf32> to vector<1x32xf32>
    %15 = vector.shape_cast %14 : vector<1x32xf32> to vector<32xf32>
    %16 = vector.extract_strided_slice %1 {offsets = [7, 0], sizes = [1, 32], strides = [1, 1]} : vector<12x128xf32> to vector<1x32xf32>
    %17 = vector.shape_cast %16 : vector<1x32xf32> to vector<32xf32>
    %18 = vector.extract_strided_slice %1 {offsets = [8, 0], sizes = [1, 32], strides = [1, 1]} : vector<12x128xf32> to vector<1x32xf32>
    %19 = vector.shape_cast %18 : vector<1x32xf32> to vector<32xf32>
    %20 = vector.extract_strided_slice %1 {offsets = [9, 0], sizes = [1, 16], strides = [1, 1]} : vector<12x128xf32> to vector<1x16xf32>
    %21 = vector.shape_cast %20 : vector<1x16xf32> to vector<16xf32>
    %22 = vector.extract_strided_slice %1 {offsets = [10, 0], sizes = [1, 32], strides = [1, 1]} : vector<12x128xf32> to vector<1x32xf32>
    %23 = vector.shape_cast %22 : vector<1x32xf32> to vector<32xf32>
    %24 = vector.extract_strided_slice %1 {offsets = [11, 0], sizes = [1, 4], strides = [1, 1]} : vector<12x128xf32> to vector<1x4xf32>
    %25 = vector.shape_cast %24 : vector<1x4xf32> to vector<4xf32>
    %c0_4 = arith.constant 0 : index
    %c0_5 = arith.constant 0 : index
    %26 = vector.load %arg2[%c0_4, %c0_5] : memref<16x32xbf16, #tpu.memory_space<vmem>>, vector<16x32xbf16>
    %27 = arith.truncf %0 : vector<2x64x16xf32> to vector<2x64x16xbf16>
    %cst = arith.constant dense<0.000000e+00> : vector<2x64x32xf32>
    %28 = tpu.matmul %27, %26, %cst {dimension_numbers = #tpu.dot_dimension_numbers<[2], [0], [0, 1], [1], [0, 0, 0, 1, 1, 1], [], []>} : vector<2x64x16xbf16>, vector<16x32xbf16>, vector<2x64x32xf32> -> vector<2x64x32xf32>
    %29 = vector.shape_cast %3 : vector<32xf32> to vector<1x1x32xf32>
    %30 = vector.broadcast %29 : vector<1x1x32xf32> to vector<2x64x32xf32>
    %31 = arith.addf %28, %30 : vector<2x64x32xf32>
    %c0_6 = arith.constant 0 : index
    %c0_7 = arith.constant 0 : index
    %32 = vector.load %arg3[%c0_6, %c0_7] : memref<32x96xbf16, #tpu.memory_space<vmem>>, vector<32x96xbf16>
    %33 = arith.truncf %31 : vector<2x64x32xf32> to vector<2x64x32xbf16>
    %cst_8 = arith.constant dense<0.000000e+00> : vector<2x64x96xf32>
    %34 = tpu.matmul %33, %32, %cst_8 {dimension_numbers = #tpu.dot_dimension_numbers<[2], [0], [0, 1], [1], [0, 0, 0, 1, 1, 1], [], []>} : vector<2x64x32xbf16>, vector<32x96xbf16>, vector<2x64x96xf32> -> vector<2x64x96xf32>
    %35 = vector.shape_cast %5 : vector<96xf32> to vector<1x1x96xf32>
    %36 = vector.broadcast %35 : vector<1x1x96xf32> to vector<2x64x96xf32>
    %37 = arith.addf %34, %36 : vector<2x64x96xf32>
    %38 = vector.extract_strided_slice %37 {offsets = [0, 0, 0], sizes = [2, 64, 32], strides = [1, 1, 1]} : vector<2x64x96xf32> to vector<2x64x32xf32>
    %39 = vector.extract_strided_slice %37 {offsets = [0, 0, 32], sizes = [2, 64, 32], strides = [1, 1, 1]} : vector<2x64x96xf32> to vector<2x64x32xf32>
    %40 = vector.extract_strided_slice %37 {offsets = [0, 0, 64], sizes = [2, 64, 32], strides = [1, 1, 1]} : vector<2x64x96xf32> to vector<2x64x32xf32>
    %41 = arith.truncf %38 : vector<2x64x32xf32> to vector<2x64x32xbf16>
    %42 = arith.truncf %39 : vector<2x64x32xf32> to vector<2x64x32xbf16>
    %cst_9 = arith.constant dense<0.000000e+00> : vector<2x64x64xf32>
    %43 = tpu.matmul %41, %42, %cst_9 {dimension_numbers = #tpu.dot_dimension_numbers<[2], [2], [1], [1], [0, 0, 0, 1, 1, 1], [0], [0]>} : vector<2x64x32xbf16>, vector<2x64x32xbf16>, vector<2x64x64xf32> -> vector<2x64x64xf32>
    %cst_10 = arith.constant 0.176776692 : f32
    %44 = vector.broadcast %cst_10 : f32 to vector<2x64x64xf32>
    %45 = arith.mulf %43, %44 : vector<2x64x64xf32>
    %cst_11 = arith.constant dense<0xFF800000> : vector<2x64xf32>
    %46 = vector.multi_reduction <maximumf>, %45, %cst_11 [2] : vector<2x64x64xf32> to vector<2x64xf32>
    %47 = vector.shape_cast %46 : vector<2x64xf32> to vector<2x64x1xf32>
    %48 = vector.broadcast %47 : vector<2x64x1xf32> to vector<2x64x64xf32>
    %49 = arith.subf %45, %48 : vector<2x64x64xf32>
    %50 = math.exp %49 : vector<2x64x64xf32>
    %cst_12 = arith.constant dense<0.000000e+00> : vector<2x64xf32>
    %51 = vector.multi_reduction <add>, %50, %cst_12 [2] : vector<2x64x64xf32> to vector<2x64xf32>
    %52 = vector.shape_cast %51 : vector<2x64xf32> to vector<2x64x1xf32>
    %53 = tpu.reciprocal %52 {approx = true} : vector<2x64x1xf32> -> vector<2x64x1xf32>
    %54 = vector.broadcast %53 : vector<2x64x1xf32> to vector<2x64x64xf32>
    %55 = arith.mulf %50, %54 : vector<2x64x64xf32>
    %56 = arith.truncf %55 : vector<2x64x64xf32> to vector<2x64x64xbf16>
    %57 = arith.truncf %40 : vector<2x64x32xf32> to vector<2x64x32xbf16>
    %cst_13 = arith.constant dense<0.000000e+00> : vector<2x64x32xf32>
    %58 = tpu.matmul %56, %57, %cst_13 {dimension_numbers = #tpu.dot_dimension_numbers<[2], [1], [1], [2], [0, 0, 0, 1, 1, 2], [0], [0]>} : vector<2x64x64xbf16>, vector<2x64x32xbf16>, vector<2x64x32xf32> -> vector<2x64x32xf32>
    %c0_14 = arith.constant 0 : index
    %c0_15 = arith.constant 0 : index
    %59 = vector.load %arg4[%c0_14, %c0_15] : memref<32x32xbf16, #tpu.memory_space<vmem>>, vector<32x32xbf16>
    %60 = arith.truncf %58 : vector<2x64x32xf32> to vector<2x64x32xbf16>
    %cst_16 = arith.constant dense<0.000000e+00> : vector<2x64x32xf32>
    %61 = tpu.matmul %60, %59, %cst_16 {dimension_numbers = #tpu.dot_dimension_numbers<[2], [0], [0, 1], [1], [0, 0, 0, 1, 1, 1], [], []>} : vector<2x64x32xbf16>, vector<32x32xbf16>, vector<2x64x32xf32> -> vector<2x64x32xf32>
    %62 = vector.shape_cast %7 : vector<32xf32> to vector<1x1x32xf32>
    %63 = vector.broadcast %62 : vector<1x1x32xf32> to vector<2x64x32xf32>
    %64 = arith.addf %61, %63 : vector<2x64x32xf32>
    %65 = arith.addf %31, %64 : vector<2x64x32xf32>
    %cst_17 = arith.constant dense<0.000000e+00> : vector<2x64xf32>
    %66 = vector.multi_reduction <add>, %65, %cst_17 [2] : vector<2x64x32xf32> to vector<2x64xf32>
    %67 = vector.shape_cast %66 : vector<2x64xf32> to vector<2x64x1xf32>
    %cst_18 = arith.constant 3.200000e+01 : f32
    %68 = vector.broadcast %cst_18 : f32 to vector<2x64x1xf32>
    %69 = arith.divf %67, %68 : vector<2x64x1xf32>
    %70 = vector.broadcast %69 : vector<2x64x1xf32> to vector<2x64x32xf32>
    %71 = arith.subf %65, %70 : vector<2x64x32xf32>
    %72 = arith.mulf %71, %71 : vector<2x64x32xf32>
    %cst_19 = arith.constant dense<0.000000e+00> : vector<2x64xf32>
    %73 = vector.multi_reduction <add>, %72, %cst_19 [2] : vector<2x64x32xf32> to vector<2x64xf32>
    %74 = vector.shape_cast %73 : vector<2x64xf32> to vector<2x64x1xf32>
    %cst_20 = arith.constant 3.200000e+01 : f32
    %75 = vector.broadcast %cst_20 : f32 to vector<2x64x1xf32>
    %76 = arith.divf %74, %75 : vector<2x64x1xf32>
    %77 = vector.broadcast %69 : vector<2x64x1xf32> to vector<2x64x32xf32>
    %78 = arith.subf %65, %77 : vector<2x64x32xf32>
    %cst_21 = arith.constant 9.99999974E-6 : f32
    %79 = vector.broadcast %cst_21 : f32 to vector<2x64x1xf32>
    %80 = arith.addf %76, %79 : vector<2x64x1xf32>
    %81 = math.rsqrt %80 : vector<2x64x1xf32>
    %82 = vector.broadcast %81 : vector<2x64x1xf32> to vector<2x64x32xf32>
    %83 = arith.mulf %78, %82 : vector<2x64x32xf32>
    %84 = vector.shape_cast %9 : vector<32xf32> to vector<1x1x32xf32>
    %85 = vector.broadcast %84 : vector<1x1x32xf32> to vector<2x64x32xf32>
    %86 = arith.mulf %83, %85 : vector<2x64x32xf32>
    %87 = vector.shape_cast %11 : vector<32xf32> to vector<1x1x32xf32>
    %88 = vector.broadcast %87 : vector<1x1x32xf32> to vector<2x64x32xf32>
    %89 = arith.addf %86, %88 : vector<2x64x32xf32>
    %c0_22 = arith.constant 0 : index
    %c0_23 = arith.constant 0 : index
    %90 = vector.load %arg5[%c0_22, %c0_23] : memref<32x64xbf16, #tpu.memory_space<vmem>>, vector<32x64xbf16>
    %91 = arith.truncf %89 : vector<2x64x32xf32> to vector<2x64x32xbf16>
    %cst_24 = arith.constant dense<0.000000e+00> : vector<2x64x64xf32>
    %92 = tpu.matmul %91, %90, %cst_24 {dimension_numbers = #tpu.dot_dimension_numbers<[2], [0], [0, 1], [1], [0, 0, 0, 1, 1, 1], [], []>} : vector<2x64x32xbf16>, vector<32x64xbf16>, vector<2x64x64xf32> -> vector<2x64x64xf32>
    %93 = vector.shape_cast %13 : vector<64xf32> to vector<1x1x64xf32>
    %94 = vector.broadcast %93 : vector<1x1x64xf32> to vector<2x64x64xf32>
    %95 = arith.addf %92, %94 : vector<2x64x64xf32>
    %cst_25 = arith.constant 0.000000e+00 : f32
    %96 = vector.broadcast %cst_25 : f32 to vector<2x64x64xf32>
    %97 = arith.maximumf %95, %96 : vector<2x64x64xf32>
    %c0_26 = arith.constant 0 : index
    %c0_27 = arith.constant 0 : index
    %98 = vector.load %arg6[%c0_26, %c0_27] : memref<64x32xbf16, #tpu.memory_space<vmem>>, vector<64x32xbf16>
    %99 = arith.truncf %97 : vector<2x64x64xf32> to vector<2x64x64xbf16>
    %cst_28 = arith.constant dense<0.000000e+00> : vector<2x64x32xf32>
    %100 = tpu.matmul %99, %98, %cst_28 {dimension_numbers = #tpu.dot_dimension_numbers<[2], [0], [0, 1], [1], [0, 0, 0, 1, 1, 1], [], []>} : vector<2x64x64xbf16>, vector<64x32xbf16>, vector<2x64x32xf32> -> vector<2x64x32xf32>
    %101 = vector.shape_cast %15 : vector<32xf32> to vector<1x1x32xf32>
    %102 = vector.broadcast %101 : vector<1x1x32xf32> to vector<2x64x32xf32>
    %103 = arith.addf %100, %102 : vector<2x64x32xf32>
    %104 = arith.addf %89, %103 : vector<2x64x32xf32>
    %cst_29 = arith.constant dense<0.000000e+00> : vector<2x64xf32>
    %105 = vector.multi_reduction <add>, %104, %cst_29 [2] : vector<2x64x32xf32> to vector<2x64xf32>
    %106 = vector.shape_cast %105 : vector<2x64xf32> to vector<2x64x1xf32>
    %cst_30 = arith.constant 3.200000e+01 : f32
    %107 = vector.broadcast %cst_30 : f32 to vector<2x64x1xf32>
    %108 = arith.divf %106, %107 : vector<2x64x1xf32>
    %109 = vector.broadcast %108 : vector<2x64x1xf32> to vector<2x64x32xf32>
    %110 = arith.subf %104, %109 : vector<2x64x32xf32>
    %111 = arith.mulf %110, %110 : vector<2x64x32xf32>
    %cst_31 = arith.constant dense<0.000000e+00> : vector<2x64xf32>
    %112 = vector.multi_reduction <add>, %111, %cst_31 [2] : vector<2x64x32xf32> to vector<2x64xf32>
    %113 = vector.shape_cast %112 : vector<2x64xf32> to vector<2x64x1xf32>
    %cst_32 = arith.constant 3.200000e+01 : f32
    %114 = vector.broadcast %cst_32 : f32 to vector<2x64x1xf32>
    %115 = arith.divf %113, %114 : vector<2x64x1xf32>
    %116 = vector.broadcast %108 : vector<2x64x1xf32> to vector<2x64x32xf32>
    %117 = arith.subf %104, %116 : vector<2x64x32xf32>
    %cst_33 = arith.constant 9.99999974E-6 : f32
    %118 = vector.broadcast %cst_33 : f32 to vector<2x64x1xf32>
    %119 = arith.addf %115, %118 : vector<2x64x1xf32>
    %120 = math.rsqrt %119 : vector<2x64x1xf32>
    %121 = vector.broadcast %120 : vector<2x64x1xf32> to vector<2x64x32xf32>
    %122 = arith.mulf %117, %121 : vector<2x64x32xf32>
    %123 = vector.shape_cast %17 : vector<32xf32> to vector<1x1x32xf32>
    %124 = vector.broadcast %123 : vector<1x1x32xf32> to vector<2x64x32xf32>
    %125 = arith.mulf %122, %124 : vector<2x64x32xf32>
    %126 = vector.shape_cast %19 : vector<32xf32> to vector<1x1x32xf32>
    %127 = vector.broadcast %126 : vector<1x1x32xf32> to vector<2x64x32xf32>
    %128 = arith.addf %125, %127 : vector<2x64x32xf32>
    %c0_34 = arith.constant 0 : index
    %c0_35 = arith.constant 0 : index
    %129 = vector.load %arg7[%c0_34, %c0_35] : memref<32x16xbf16, #tpu.memory_space<vmem>>, vector<32x16xbf16>
    %130 = arith.truncf %128 : vector<2x64x32xf32> to vector<2x64x32xbf16>
    %cst_36 = arith.constant dense<0.000000e+00> : vector<2x64x16xf32>
    %131 = tpu.matmul %130, %129, %cst_36 {dimension_numbers = #tpu.dot_dimension_numbers<[2], [0], [0, 1], [1], [0, 0, 0, 1, 1, 1], [], []>} : vector<2x64x32xbf16>, vector<32x16xbf16>, vector<2x64x16xf32> -> vector<2x64x16xf32>
    %132 = vector.shape_cast %21 : vector<16xf32> to vector<1x1x16xf32>
    %133 = vector.broadcast %132 : vector<1x1x16xf32> to vector<2x64x16xf32>
    %134 = arith.addf %131, %133 : vector<2x64x16xf32>
    %c0_37 = arith.constant 0 : index
    %c0_38 = arith.constant 0 : index
    %135 = vector.load %arg8[%c0_37, %c0_38] : memref<32x32xbf16, #tpu.memory_space<vmem>>, vector<32x32xbf16>
    %136 = arith.truncf %128 : vector<2x64x32xf32> to vector<2x64x32xbf16>
    %cst_39 = arith.constant dense<0.000000e+00> : vector<2x64x32xf32>
    %137 = tpu.matmul %136, %135, %cst_39 {dimension_numbers = #tpu.dot_dimension_numbers<[2], [0], [0, 1], [1], [0, 0, 0, 1, 1, 1], [], []>} : vector<2x64x32xbf16>, vector<32x32xbf16>, vector<2x64x32xf32> -> vector<2x64x32xf32>
    %138 = vector.shape_cast %23 : vector<32xf32> to vector<1x1x32xf32>
    %139 = vector.broadcast %138 : vector<1x1x32xf32> to vector<2x64x32xf32>
    %140 = arith.addf %137, %139 : vector<2x64x32xf32>
    %cst_40 = arith.constant 0.000000e+00 : f32
    %141 = vector.broadcast %cst_40 : f32 to vector<2x64x32xf32>
    %142 = arith.maximumf %140, %141 : vector<2x64x32xf32>
    %c0_41 = arith.constant 0 : index
    %c0_42 = arith.constant 0 : index
    %143 = vector.load %arg9[%c0_41, %c0_42] : memref<32x4xbf16, #tpu.memory_space<vmem>>, vector<32x4xbf16>
    %144 = arith.truncf %142 : vector<2x64x32xf32> to vector<2x64x32xbf16>
    %cst_43 = arith.constant dense<0.000000e+00> : vector<2x64x4xf32>
    %145 = tpu.matmul %144, %143, %cst_43 {dimension_numbers = #tpu.dot_dimension_numbers<[2], [0], [0, 1], [1], [0, 0, 0, 1, 1, 1], [], []>} : vector<2x64x32xbf16>, vector<32x4xbf16>, vector<2x64x4xf32> -> vector<2x64x4xf32>
    %146 = vector.shape_cast %25 : vector<4xf32> to vector<1x1x4xf32>
    %147 = vector.broadcast %146 : vector<1x1x4xf32> to vector<2x64x4xf32>
    %148 = arith.addf %145, %147 : vector<2x64x4xf32>
    %149 = arith.negf %148 : vector<2x64x4xf32>
    %150 = math.exp %149 : vector<2x64x4xf32>
    %cst_44 = arith.constant 1.000000e+00 : f32
    %151 = vector.broadcast %cst_44 : f32 to vector<2x64x4xf32>
    %152 = arith.addf %151, %150 : vector<2x64x4xf32>
    %153 = arith.divf %151, %152 : vector<2x64x4xf32>
    %cst_45 = arith.constant 0.000000e+00 : f32
    %154 = vector.broadcast %cst_45 : f32 to vector<2x64x76xf32>
    %155 = tpu.concatenate %128, %134, %153, %154 in 2 : vector<2x64x32xf32>, vector<2x64x16xf32>, vector<2x64x4xf32>, vector<2x64x76xf32> -> vector<2x64x128xf32>
    %c0_46 = arith.constant 0 : index
    %c0_47 = arith.constant 0 : index
    %c0_48 = arith.constant 0 : index
    %156 = vector.load %arg11[%c0_46, %c0_47, %c0_48] : memref<2x64x128xf32, #tpu.memory_space<vmem>>, vector<2x64x128xf32>
    tpu.vector_store %arg11[%c0_46, %c0_47, %c0_48], %155 {strides = array<i32>} : memref<2x64x128xf32, #tpu.memory_space<vmem>>, vector<2x64x128xf32>,
    return
  }
  func.func @transform_0(%arg0: i32) -> (i32, i32, i32) {
    %c0_i32 = arith.constant 0 : i32
    %c0_i32_0 = arith.constant 0 : i32
    %c0_i32_1 = arith.constant 0 : i32
    %c0_i32_2 = arith.constant 0 : i32
    return %c0_i32, %c0_i32_0, %c0_i32_1 : i32, i32, i32
  }
  func.func @transform_1(%arg0: i32) -> (i32, i32) {
    %c0_i32 = arith.constant 0 : i32
    %c0_i32_0 = arith.constant 0 : i32
    %c0_i32_1 = arith.constant 0 : i32
    return %c0_i32, %c0_i32_0 : i32, i32
  }
  func.func @transform_2(%arg0: i32) -> (i32, i32) {
    %c0_i32 = arith.constant 0 : i32
    %c0_i32_0 = arith.constant 0 : i32
    %c0_i32_1 = arith.constant 0 : i32
    return %c0_i32, %c0_i32_0 : i32, i32
  }
  func.func @transform_3(%arg0: i32) -> (i32, i32) {
    %c0_i32 = arith.constant 0 : i32
    %c0_i32_0 = arith.constant 0 : i32
    %c0_i32_1 = arith.constant 0 : i32
    return %c0_i32, %c0_i32_0 : i32, i32
  }
  func.func @transform_4(%arg0: i32) -> (i32, i32) {
    %c0_i32 = arith.constant 0 : i32
    %c0_i32_0 = arith.constant 0 : i32
    %c0_i32_1 = arith.constant 0 : i32
    return %c0_i32, %c0_i32_0 : i32, i32
  }
  func.func @transform_5(%arg0: i32) -> (i32, i32) {
    %c0_i32 = arith.constant 0 : i32
    %c0_i32_0 = arith.constant 0 : i32
    %c0_i32_1 = arith.constant 0 : i32
    return %c0_i32, %c0_i32_0 : i32, i32
  }
  func.func @transform_6(%arg0: i32) -> (i32, i32) {
    %c0_i32 = arith.constant 0 : i32
    %c0_i32_0 = arith.constant 0 : i32
    %c0_i32_1 = arith.constant 0 : i32
    return %c0_i32, %c0_i32_0 : i32, i32
  }
  func.func @transform_7(%arg0: i32) -> (i32, i32) {
    %c0_i32 = arith.constant 0 : i32
    %c0_i32_0 = arith.constant 0 : i32
    %c0_i32_1 = arith.constant 0 : i32
    return %c0_i32, %c0_i32_0 : i32, i32
  }
  func.func @transform_8(%arg0: i32) -> (i32, i32) {
    %c0_i32 = arith.constant 0 : i32
    %c0_i32_0 = arith.constant 0 : i32
    %c0_i32_1 = arith.constant 0 : i32
    return %c0_i32, %c0_i32_0 : i32, i32
  }
  func.func @transform_9(%arg0: i32) -> (i32, i32) {
    %c0_i32 = arith.constant 0 : i32
    %c0_i32_0 = arith.constant 0 : i32
    %c0_i32_1 = arith.constant 0 : i32
    return %c0_i32, %c0_i32_0 : i32, i32
  }
  func.func @transform_10(%arg0: i32) -> (i32, i32, i32) {
    %c0_i32 = arith.constant 0 : i32
    %c0_i32_0 = arith.constant 0 : i32
    %c0_i32_1 = arith.constant 0 : i32
    %c0_i32_2 = arith.constant 0 : i32
    return %c0_i32, %c0_i32_0, %c0_i32_1 : i32, i32, i32
  }
}

</mosaic_0001>

<bundles_post_ra>
// kernel: tpu_custom_call.1
= control target key start
LH: loop header
LB: loop body
LE: loop exit
PB: predicated region body
PF: predicated region fallthrough
CT: control target
= control target key end

     0   :  { %15 = vsyncpa [#allocation3], 0  ;;  %s5158_s0 = inlined_call_operand.hbm [shape: f32[2,64,16], index: 0, kind: input, shape index: {}]   ;;  %s5159_s1 = inlined_call_operand.hbm [shape: bf16[16,32], index: 1, kind: input, shape index: {}]   ;;  %s5160_s2 = inlined_call_operand.hbm [shape: bf16[32,96], index: 2, kind: input, shape index: {}]   ;;  %s5161_s3 = inlined_call_operand.hbm [shape: bf16[32,32], index: 3, kind: input, shape index: {}]   ;;  %s5162_s4 = inlined_call_operand.hbm [shape: bf16[32,64], index: 4, kind: input, shape index: {}]   ;;  %s5163_s5 = inlined_call_operand.hbm [shape: bf16[64,32], index: 5, kind: input, shape index: {}]   ;;  %s5164_s6 = inlined_call_operand.hbm [shape: bf16[32,16], index: 6, kind: input, shape index: {}]   ;;  %s5165_s7 = inlined_call_operand.hbm [shape: bf16[32,32], index: 7, kind: input, shape index: {}]   ;;  %s5166_s8 = inlined_call_operand.hbm [shape: bf16[32,4], index: 8, kind: input, shape index: {}]   ;;  %s5167_s9 = inlined_call_operand.hbm [shape: f32[12,128], index: 9, kind: input, shape index: {}]   ;;  %s5168_s10 = inlined_call_operand.hbm [shape: f32[2,64,128], index: 10, kind: output, shape index: {}]  }
   0x1   :  { %16 = vsyncpa [#allocation6], 0 }
   0x2   :  { %17 = vsyncpa [#allocation9], 0 }
   0x3   :  { %18 = vsyncpa [#allocation12], 0 }
   0x4   :  { %19 = vsyncpa [#allocation15], 0 }
   0x5   :  { %20 = vsyncpa [#allocation18], 0 }
   0x6   :  { %21 = vsyncpa [#allocation4], 0  ;;  %s3767_s13 = smov [#allocation5]   ;;  %s3511_s17 = scalar_lea.hbm %s5159_s1, 128 }
   0x7   :  { %s39_s14 = sshll.u32 %s3767_s13, 4  ;;  %p3512_p0 = scmp.ne.s32.totalorder %s5159_s1, %s3511_s17  ;;  %s40_s14 = int_to_ptr.vmem [resolvable:$true] %s39_s14 }
   0x8   :  { %p3515_p1 = scmp.lt.u32.totalorder %s3511_s17, %s5159_s1 }
   0xa   :  { %p3517_p2 = pnand %p3515_p1, %p3512_p0 }
   0xc   :  { %3520 = shalt.err (!%p3517_p2)
}
   0xd   :  { %s3521_s22 = scalar_lea.vmem %s40_s14, 128  ;;  %p3526_p4 = scmp.lt.s32.totalorder %s40_s14, %s40_s14 }
   0xe   :  { %p3522_p3 = scmp.ne.s32.totalorder %s40_s14, %s3521_s22  ;;  %p3527_p5 = scmp.lt.s32.totalorder %s3521_s22, %s3521_s22 }
  0x10   :  { %p3528_p6 = por %p3527_p5, %p3526_p4 }
  0x12   :  { %p3529_p7 = pnand %p3528_p6, %p3522_p3 }
  0x14   :  { %3532 = shalt.err (!%p3529_p7)
}
  0x15   :  { %s3768_s23 = smov 64   ;;  %s3769_s24 = smov 4  }
  0x16   :  { %45 = dma.hbm_to_vmem [thread:$0]  %s5159_s1, 128, %s40_s14, [#allocation6], %s3768_s23, %s3768_s23, %s3769_s24  }
  0x17   :  { %s3770_s27 = smov [#allocation8]   ;;  %s3771_s29 = smov [#allocation11]  }
  0x18   :  { %s63_s28 = sshll.u32 %s3770_s27, 4  ;;  %s87_s30 = sshll.u32 %s3771_s29, 4  ;;  %s64_s28 = int_to_ptr.vmem [resolvable:$true] %s63_s28  ;;  %s88_s30 = int_to_ptr.vmem [resolvable:$true] %s87_s30 }
  0x19   :  { %s3533_s13 = scalar_lea.hbm %s5161_s3, 256 }
  0x1a   :  { %p3534_p8 = scmp.ne.s32.totalorder %s5161_s3, %s3533_s13  ;;  %p3537_p9 = scmp.lt.u32.totalorder %s3533_s13, %s5161_s3 }
  0x1c   :  { %p3539_p10 = pnand %p3537_p9, %p3534_p8 }
  0x1e   :  { %3542 = shalt.err (!%p3539_p10)
}
  0x1f   :  { %s3543_s1 = scalar_lea.vmem %s64_s28, 256  ;;  %p3548_p12 = scmp.lt.s32.totalorder %s64_s28, %s64_s28 }
  0x20   :  { %p3544_p11 = scmp.ne.s32.totalorder %s64_s28, %s3543_s1  ;;  %p3549_p13 = scmp.lt.s32.totalorder %s3543_s1, %s3543_s1 }
  0x22   :  { %p3550_p0 = por %p3549_p13, %p3548_p12 }
  0x24   :  { %p3551_p1 = pnand %p3550_p0, %p3544_p11 }
  0x26   :  { %3554 = shalt.err (!%p3551_p1)
}
  0x27   :  { %69 = dma.hbm_to_vmem [thread:$0]  %s5161_s3, 256, %s64_s28, [#allocation9], %s3768_s23, %s3768_s23, %s3769_s24  }
  0x28   :  { %s3555_s22 = scalar_lea.hbm %s5163_s5, 512 }
  0x29   :  { %p3556_p2 = scmp.ne.s32.totalorder %s5163_s5, %s3555_s22  ;;  %p3559_p3 = scmp.lt.u32.totalorder %s3555_s22, %s5163_s5 }
  0x2b   :  { %p3561_p4 = pnand %p3559_p3, %p3556_p2 }
  0x2d   :  { %3564 = shalt.err (!%p3561_p4)
}
  0x2e   :  { %s3565_s11 = scalar_lea.vmem %s88_s30, 512  ;;  %p3570_p6 = scmp.lt.s32.totalorder %s88_s30, %s88_s30 }
  0x2f   :  { %p3566_p5 = scmp.ne.s32.totalorder %s88_s30, %s3565_s11  ;;  %p3571_p7 = scmp.lt.s32.totalorder %s3565_s11, %s3565_s11 }
  0x31   :  { %p3572_p8 = por %p3571_p7, %p3570_p6 }
  0x33   :  { %p3573_p9 = pnand %p3572_p8, %p3566_p5 }
  0x35   :  { %3576 = shalt.err (!%p3573_p9)
}
  0x36   :  { %93 = dma.hbm_to_vmem [thread:$0]  %s5163_s5, 512, %s88_s30, [#allocation12], %s3768_s23, %s3768_s23, %s3769_s24  }
  0x37   :  { %s3772_s12 = smov [#allocation14]   ;;  %s3773_s15 = smov [#allocation2]  }
  0x38   :  { %s111_s13 = sshll.u32 %s3772_s12, 4  ;;  %s27_s16 = sshll.u32 %s3773_s15, 4  ;;  %s112_s13 = int_to_ptr.vmem [resolvable:$true] %s111_s13  ;;  %s28_s16 = int_to_ptr.vmem [resolvable:$true] %s27_s16 }
  0x39   :  { %s3577_s1 = scalar_lea.hbm %s5165_s7, 256 }
  0x3a   :  { %p3578_p10 = scmp.ne.s32.totalorder %s5165_s7, %s3577_s1  ;;  %p3581_p11 = scmp.lt.u32.totalorder %s3577_s1, %s5165_s7 }
  0x3c   :  { %p3583_p12 = pnand %p3581_p11, %p3578_p10 }
  0x3e   :  { %3586 = shalt.err (!%p3583_p12)
}
  0x3f   :  { %s3587_s5 = scalar_lea.vmem %s112_s13, 256  ;;  %p3592_p0 = scmp.lt.s32.totalorder %s112_s13, %s112_s13 }
  0x40   :  { %p3588_p13 = scmp.ne.s32.totalorder %s112_s13, %s3587_s5  ;;  %p3593_p1 = scmp.lt.s32.totalorder %s3587_s5, %s3587_s5 }
  0x42   :  { %p3594_p2 = por %p3593_p1, %p3592_p0 }
  0x44   :  { %p3595_p3 = pnand %p3594_p2, %p3588_p13 }
  0x46   :  { %3598 = shalt.err (!%p3595_p3)
}
  0x47   :  { %117 = dma.hbm_to_vmem [thread:$0]  %s5165_s7, 256, %s112_s13, [#allocation15], %s3768_s23, %s3768_s23, %s3769_s24  }
  0x48   :  { %s3599_s27 = scalar_lea.hbm %s5158_s0, 2048 }
  0x49   :  { %p3600_p4 = scmp.ne.s32.totalorder %s5158_s0, %s3599_s27  ;;  %p3603_p5 = scmp.lt.u32.totalorder %s3599_s27, %s5158_s0 }
  0x4b   :  { %p3605_p6 = pnand %p3603_p5, %p3600_p4 }
  0x4d   :  { %3608 = shalt.err (!%p3605_p6)
}
  0x4e   :  { %s3609_s12 = scalar_lea.vmem %s28_s16, 2048  ;;  %p3614_p8 = scmp.lt.s32.totalorder %s28_s16, %s28_s16 }
  0x4f   :  { %p3610_p7 = scmp.ne.s32.totalorder %s28_s16, %s3609_s12  ;;  %p3615_p9 = scmp.lt.s32.totalorder %s3609_s12, %s3609_s12 }
  0x51   :  { %p3616_p10 = por %p3615_p9, %p3614_p8 }
  0x53   :  { %p3617_p11 = pnand %p3616_p10, %p3610_p7 }
  0x55   :  { %3620 = shalt.err (!%p3617_p11)
}
  0x56   :  { %s3774_s7 = smov 128   ;;  %s3775_s13 = smov 8  }
  0x57   :  { %33 = dma.hbm_to_vmem [thread:$0]  %s5158_s0, 2048, %s28_s16, [#allocation3], %s3774_s7, %s3774_s7, %s3775_s13  }
  0x58   :  { %s3776_s18 = smov [#allocation7]   ;;  %s3777_s14 = smov [#allocation10]  }
  0x59   :  { %s51_s1 = sshll.u32 %s3776_s18, 4  ;;  %s75_s19 = sshll.u32 %s3777_s14, 4  ;;  %s52_s1 = int_to_ptr.vmem [resolvable:$true] %s51_s1  ;;  %s76_s19 = int_to_ptr.vmem [resolvable:$true] %s75_s19 }
  0x5a   :  { %s3621_s5 = scalar_lea.hbm %s5160_s2, 256 }
  0x5b   :  { %p3622_p12 = scmp.ne.s32.totalorder %s5160_s2, %s3621_s5  ;;  %p3625_p13 = scmp.lt.u32.totalorder %s3621_s5, %s5160_s2 }
  0x5d   :  { %p3627_p0 = pnand %p3625_p13, %p3622_p12 }
  0x5f   :  { %3630 = shalt.err (!%p3627_p0)
}
  0x60   :  { %s3631_s0 = scalar_lea.vmem %s52_s1, 256  ;;  %p3636_p2 = scmp.lt.s32.totalorder %s52_s1, %s52_s1 }
  0x61   :  { %p3632_p1 = scmp.ne.s32.totalorder %s52_s1, %s3631_s0  ;;  %p3637_p3 = scmp.lt.s32.totalorder %s3631_s0, %s3631_s0 }
  0x63   :  { %p3638_p4 = por %p3637_p3, %p3636_p2 }
  0x65   :  { %p3639_p5 = pnand %p3638_p4, %p3632_p1 }
  0x67   :  { %3642 = shalt.err (!%p3639_p5)
}
  0x68   :  { %57 = dma.hbm_to_vmem [thread:$0]  %s5160_s2, 256, %s52_s1, [#allocation6], %s3768_s23, %s3768_s23, %s3769_s24  }
  0x69   :  { %s3643_s3 = scalar_lea.hbm %s5162_s4, 256 }
  0x6a   :  { %p3644_p6 = scmp.ne.s32.totalorder %s5162_s4, %s3643_s3  ;;  %p3647_p7 = scmp.lt.u32.totalorder %s3643_s3, %s5162_s4 }
  0x6c   :  { %p3649_p8 = pnand %p3647_p7, %p3644_p6 }
  0x6e   :  { %3652 = shalt.err (!%p3649_p8)
}
  0x6f   :  { %s3653_s18 = scalar_lea.vmem %s76_s19, 256  ;;  %p3658_p10 = scmp.lt.s32.totalorder %s76_s19, %s76_s19 }
  0x70   :  { %p3654_p9 = scmp.ne.s32.totalorder %s76_s19, %s3653_s18  ;;  %p3659_p11 = scmp.lt.s32.totalorder %s3653_s18, %s3653_s18 }
  0x72   :  { %p3660_p12 = por %p3659_p11, %p3658_p10 }
  0x74   :  { %p3661_p13 = pnand %p3660_p12, %p3654_p9 }
  0x76   :  { %3664 = shalt.err (!%p3661_p13)
}
  0x77   :  { %81 = dma.hbm_to_vmem [thread:$0]  %s5162_s4, 256, %s76_s19, [#allocation9], %s3768_s23, %s3768_s23, %s3769_s24  }
  0x78   :  { %s3778_s14 = smov [#allocation13]   ;;  %s3779_s21 = smov [#allocation16]  }
  0x79   :  { %s99_s20 = sshll.u32 %s3778_s14, 4  ;;  %s123_s5 = sshll.u32 %s3779_s21, 4  ;;  %s100_s20 = int_to_ptr.vmem [resolvable:$true] %s99_s20  ;;  %s124_s5 = int_to_ptr.vmem [resolvable:$true] %s123_s5 }
  0x7a   :  { %s3665_s25 = scalar_lea.hbm %s5164_s6, 256 }
  0x7b   :  { %p3666_p0 = scmp.ne.s32.totalorder %s5164_s6, %s3665_s25  ;;  %p3669_p1 = scmp.lt.u32.totalorder %s3665_s25, %s5164_s6 }
  0x7d   :  { %p3671_p2 = pnand %p3669_p1, %p3666_p0 }
  0x7f   :  { %3674 = shalt.err (!%p3671_p2)
}
  0x80   :  { %s3675_s4 = scalar_lea.vmem %s100_s20, 256  ;;  %p3680_p4 = scmp.lt.s32.totalorder %s100_s20, %s100_s20 }
  0x81   :  { %p3676_p3 = scmp.ne.s32.totalorder %s100_s20, %s3675_s4  ;;  %p3681_p5 = scmp.lt.s32.totalorder %s3675_s4, %s3675_s4 }
  0x83   :  { %p3682_p6 = por %p3681_p5, %p3680_p4 }
  0x85   :  { %p3683_p7 = pnand %p3682_p6, %p3676_p3 }
  0x87   :  { %3686 = shalt.err (!%p3683_p7)
}
  0x88   :  { %105 = dma.hbm_to_vmem [thread:$0]  %s5164_s6, 256, %s100_s20, [#allocation12], %s3768_s23, %s3768_s23, %s3769_s24  }
  0x89   :  { %s3687_s28 = scalar_lea.hbm %s5166_s8, 256 }
  0x8a   :  { %p3688_p8 = scmp.ne.s32.totalorder %s5166_s8, %s3687_s28  ;;  %p3691_p9 = scmp.lt.u32.totalorder %s3687_s28, %s5166_s8 }
  0x8c   :  { %p3693_p10 = pnand %p3691_p9, %p3688_p8 }
  0x8e   :  { %3696 = shalt.err (!%p3693_p10)
}
  0x8f   :  { %s3697_s2 = scalar_lea.vmem %s124_s5, 256  ;;  %p3702_p12 = scmp.lt.s32.totalorder %s124_s5, %s124_s5 }
  0x90   :  { %p3698_p11 = scmp.ne.s32.totalorder %s124_s5, %s3697_s2  ;;  %p3703_p13 = scmp.lt.s32.totalorder %s3697_s2, %s3697_s2 }
  0x92   :  { %p3704_p0 = por %p3703_p13, %p3702_p12 }
  0x94   :  { %p3705_p1 = pnand %p3704_p0, %p3698_p11 }
  0x96   :  { %3708 = shalt.err (!%p3705_p1)
}
  0x97   :  { %129 = dma.hbm_to_vmem [thread:$0]  %s5166_s8, 256, %s124_s5, [#allocation15], %s3768_s23, %s3768_s23, %s3769_s24  }
  0x98   :  { %s3780_s14 = smov [#allocation17]   ;;  %s3709_s22 = scalar_lea.hbm %s5167_s9, 256 }
  0x99   :  { %s135_s20 = sshll.u32 %s3780_s14, 4  ;;  %p3710_p2 = scmp.ne.s32.totalorder %s5167_s9, %s3709_s22  ;;  %s136_s20 = int_to_ptr.vmem [resolvable:$true] %s135_s20 }
  0x9a   :  { %p3713_p3 = scmp.lt.u32.totalorder %s3709_s22, %s5167_s9 }
  0x9c   :  { %p3715_p4 = pnand %p3713_p3, %p3710_p2 }
  0x9e   :  { %3718 = shalt.err (!%p3715_p4)
}
  0x9f   :  { %s3719_s27 = scalar_lea.vmem %s136_s20, 256  ;;  %p3724_p6 = scmp.lt.s32.totalorder %s136_s20, %s136_s20 }
  0xa0   :  { %p3720_p5 = scmp.ne.s32.totalorder %s136_s20, %s3719_s27  ;;  %p3725_p7 = scmp.lt.s32.totalorder %s3719_s27, %s3719_s27 }
  0xa2   :  { %p3726_p8 = por %p3725_p7, %p3724_p6 }
  0xa4   :  { %p3727_p9 = pnand %p3726_p8, %p3720_p5 }
  0xa6   :  { %3730 = shalt.err (!%p3727_p9)
}
  0xa7   :  { %141 = dma.hbm_to_vmem [thread:$0]  %s5167_s9, 256, %s136_s20, [#allocation18], %s3774_s7, %s3774_s7, %s3775_s13  }
  0xa8   :  { %3753 = dma.done.wait [#allocation3], 2048  }
  0xa9   :  { %3754 = vsyncadd [#allocation3], 4294965248 }
  0xaa   :  { %3755 = dma.done.wait [#allocation6], 384  }
  0xab   :  { %3756 = vsyncadd [#allocation6], 4294966912 }
  0xac   :  { %3757 = dma.done.wait [#allocation9], 512  }
  0xad   :  { %3758 = vsyncadd [#allocation9], 4294966784 }
  0xae   :  { %3759 = dma.done.wait [#allocation12], 768  }
  0xaf   :  { %3760 = vsyncadd [#allocation12], 4294966528 }
  0xb0   :  { %3761 = dma.done.wait [#allocation15], 512  }
  0xb1   :  { %3762 = vsyncadd [#allocation15], 4294966784 }
  0xb2   :  { %3763 = dma.done.wait [#allocation18], 256  }
  0xb3   :  { %3764 = vsyncadd [#allocation18], 4294967040  ;;  %v3301_v0 = vld [vmem:[#allocation5] sm:$0xff]   ;;  %v174_v2 = vld [vmem:[#allocation2 + $0x8] sm:$0xff]  ;;  %vm211_vm0 = vcmask 130048   ;;  %v201_v27 = vlaneseq  ;;  %vm361_vm1 = vcmask 261120  }
  0xb4   :  { %v173_v1 = vld [vmem:[#allocation2] sm:$0xff]  ;;  %v175_v3 = vld [vmem:[#allocation2 + $0x10] sm:$0xff]  ;;  %3049 = vmatprep.subr.bf16.mxu0 %v3301_v0  ;;  %v176_v5 = vld [vmem:[#allocation2 + $0x18] sm:$0xff]  ;;  %s3781_s9 = smov 96   ;;  %vm709_vm2 = vcmask 523264   ;;  %s3783_s5 = smov 48  }
  0xb5   :  { %v193_v4 = vpack.c.bf16 %v174_v2, %v173_v1  ;;  %v177_v6 = vld [vmem:[#allocation2 + $0x20] sm:$0xff]  ;;  %v178_v7 = vld [vmem:[#allocation2 + $0x28] sm:$0xff]  ;;  %3050 = vmatpush3.bf16.msra.mxu0 %v3301_v0  ;;  %v194_v8 = vpack.c.bf16 %v176_v5, %v175_v3  ;;  %v179_v10 = vld [vmem:[#allocation2 + $0x30] sm:$0xff]  ;;  %v3998_v28 = vshrl.u32 %v201_v27, 7  ;;  %vm2751_vm3 = vcmask 392192   ;;  %s3784_s4 = smov [#allocation19]  }
  0xb6   :  { %v195_v9 = vpack.c.bf16 %v178_v7, %v177_v6  ;;  %v180_v11 = vld [vmem:[#allocation2 + $0x38] sm:$0xff]  ;;  %v181_v12 = vld [vmem:[#allocation2 + $0x40] sm:$0xff]  ;;  %v182_v13 = vld [vmem:[#allocation2 + $0x48] sm:$0xff]  ;;  %vm2768_vm4 = vcmask 424960   ;;  %s2806_s19 = sshll.u32 %s3784_s4, 4  ;;  %s2807_s19 = int_to_ptr.vmem [resolvable:$true] %s2806_s19 }
  0xb7   :  { %3051 = vmatprep.mubr.msk.bf16.mxu0 %vm211_vm0, %v193_v4  ;;  %v196_v14 = vpack.c.bf16 %v180_v11, %v179_v10  ;;  %v197_v15 = vpack.c.bf16 %v182_v13, %v181_v12  ;;  %v183_v16 = vld [vmem:[#allocation2 + $0x50] sm:$0xff]  ;;  %v184_v17 = vld [vmem:[#allocation2 + $0x58] sm:$0xff]  ;;  %v185_v18 = vld [vmem:[#allocation2 + $0x60] sm:$0xff]  ;;  %v203_v29 = vsub.s32 0, %v3998_v28  ;;  %s3731_s29 = scalar_lea.vmem %s2807_s19, 2048  ;;  %p3736_p11 = scmp.lt.s32.totalorder %s2807_s19, %s2807_s19 }
  0xb8   :  { %3052 = vmatmul.mubr.msk.bf16.vlgmr.msra.gmra.mrb[0].mxu0 %vm211_vm0, %v194_v8  ;;  %v186_v19 = vld [vmem:[#allocation2 + $0x68] sm:$0xff]  ;;  %v198_v20 = vpack.c.bf16 %v184_v17, %v183_v16  ;;  %v187_v22 = vld [vmem:[#allocation2 + $0x70] sm:$0xff]  ;;  %v188_v23 = vld [vmem:[#allocation2 + $0x78] sm:$0xff]  ;;  %v347_v8 = vsub.s32 1, %v3998_v28  ;;  %p3732_p10 = scmp.ne.s32.totalorder %s2807_s19, %s3731_s29  ;;  %p3737_p12 = scmp.lt.s32.totalorder %s3731_s29, %s3731_s29 }
  0xb9   :  { %3055 = vmatprep.mubr.msk.bf16.mxu0 %vm211_vm0, %v195_v9  ;;  %v199_v21 = vpack.c.bf16 %v186_v19, %v185_v18  ;;  %v200_v24 = vpack.c.bf16 %v188_v23, %v187_v22  ;;  %v3302_v25 = vld [vmem:[#allocation7] sm:$0xff]   ;;  %v3303_v26 = vld [vmem:[#allocation7 + $0x8] sm:$0xff]  }
  0xba   :  { %3067 = vmatprep.subr.bf16.mxu1 %v3302_v25  ;;  %v4001_v30 = vld [vmem:[#allocation17] sm:$0xff]  ;;  %p3738_p13 = por %p3737_p12, %p3736_p11 }
  0xbb   :  { %3068 = vmatpush3.bf16.msra.mxu1 %v3302_v25  ;;  %v204_v31 = vrot.slane %v4001_v30, %v203_v29  ;;  %v348_v9 = vrot.slane %v4001_v30, %v347_v8 }
  0xbc   :  { %3069 = vmatprep.subr.bf16.mxu1 %v3303_v26  ;;  %p3739_p0 = pnand %p3738_p13, %p3732_p10 }
  0xbf   :  { %3070 = vmatpush3.bf16.msra.mxu1 %v3303_v26 }
  0xc0   :  { %3056 = vmatmul.mubr.msk.bf16.gmra.mrb[4].mxu0 %vm211_vm0, %v196_v14 }
  0xc1   :  { %3059 = vmatprep.mubr.msk.bf16.mxu0 %vm211_vm0, %v197_v15 }
  0xc8   :  { %3060 = vmatmul.mubr.msk.bf16.gmra.mrb[8].mxu0 %vm211_vm0, %v198_v20 }
  0xc9   :  { %3063 = vmatprep.mubr.msk.bf16.mxu0 %vm211_vm0, %v199_v21 }
  0xd0   :  { %3064 = vmatmul.mubr.msk.bf16.gmra.mrb[12].mxu0 %vm211_vm0, %v200_v24 }
 0x18b   :  { %v3053_v32 = vpop.f32.mrb[0].mxu0 }
 0x18c   :  { %v270_v33 = vpop.f32.mrb[1].mxu0  ;;  %v4012_v39 = vadd.f32 %v3053_v32, %v204_v31 }
 0x18d   :  { %v3054_v34 = vpop.f32.mrb[2].mxu0  ;;  %v4008_v37 = vadd.f32 %v270_v33, %v204_v31 }
 0x18e   :  { %v4006_v35 = vadd.f32 %v3054_v34, %v204_v31  ;;  %v273_v36 = vpop.f32.mrb[3].mxu0 }
 0x18f   :  { %v4010_v38 = vadd.f32 %v273_v36, %v204_v31 }
 0x190   :  { %v338_v41 = vpack.c.bf16 %v4006_v35, %v4012_v39 }
 0x191   :  { %v337_v40 = vpack.c.bf16 %v4010_v38, %v4008_v37 }
 0x193   :  { %v3057_v42 = vpop.f32.mrb[4].mxu0  ;;  %3071 = vmatprep.mubr.msk.bf16.mxu1 %vm361_vm1, %v337_v40 }
 0x194   :  { %v4019_v43 = vadd.f32 %v3057_v42, %v204_v31  ;;  %v286_v44 = vpop.f32.mrb[5].mxu0  ;;  %3072 = vmatmul.mubr.msk.bf16.vlgmr.msra.gmra.mrb[0].mxu1 %vm361_vm1, %v338_v41 }
 0x195   :  { %v4022_v45 = vadd.f32 %v286_v44, %v204_v31  ;;  %v3058_v46 = vpop.f32.mrb[6].mxu0 }
 0x196   :  { %v4024_v47 = vadd.f32 %v3058_v46, %v204_v31  ;;  %v289_v48 = vpop.f32.mrb[7].mxu0 }
 0x197   :  { %v4026_v49 = vadd.f32 %v289_v48, %v204_v31 }
 0x198   :  { %v340_v50 = vpack.c.bf16 %v4024_v47, %v4019_v43 }
 0x199   :  { %v339_v51 = vpack.c.bf16 %v4026_v49, %v4022_v45 }
 0x19b   :  { %v3061_v52 = vpop.f32.mrb[8].mxu0  ;;  %3075 = vmatprep.mubr.msk.bf16.mxu1 %vm361_vm1, %v339_v51 }
 0x19c   :  { %v4033_v53 = vadd.f32 %v3061_v52, %v204_v31  ;;  %v302_v54 = vpop.f32.mrb[9].mxu0  ;;  %3076 = vmatmul.mubr.msk.bf16.gmra.mrb[4].mxu1 %vm361_vm1, %v340_v50 }
 0x19d   :  { %v4036_v55 = vadd.f32 %v302_v54, %v204_v31  ;;  %v3062_v56 = vpop.f32.mrb[10].mxu0 }
 0x19e   :  { %v4038_v57 = vadd.f32 %v3062_v56, %v204_v31  ;;  %v305_v58 = vpop.f32.mrb[11].mxu0 }
 0x19f   :  { %v4040_v59 = vadd.f32 %v305_v58, %v204_v31 }
 0x1a0   :  { %v342_v60 = vpack.c.bf16 %v4038_v57, %v4033_v53 }
 0x1a1   :  { %v341_v61 = vpack.c.bf16 %v4040_v59, %v4036_v55 }
 0x1a3   :  { %3079 = vmatprep.mubr.msk.bf16.mxu1 %vm361_vm1, %v341_v61  ;;  %v3065_v62 = vpop.f32.mrb[12].mxu0 }
 0x1a4   :  { %v4047_v63 = vadd.f32 %v3065_v62, %v204_v31  ;;  %3080 = vmatmul.mubr.msk.bf16.gmra.mrb[8].mxu1 %vm361_vm1, %v342_v60  ;;  %v318_v0 = vpop.f32.mrb[13].mxu0 }
 0x1a5   :  { %v4050_v1 = vadd.f32 %v318_v0, %v204_v31  ;;  %v3066_v2 = vpop.f32.mrb[14].mxu0 }
 0x1a6   :  { %v4052_v3 = vadd.f32 %v3066_v2, %v204_v31  ;;  %v321_v4 = vpop.f32.mrb[15].mxu0 }
 0x1a7   :  { %v4054_v5 = vadd.f32 %v321_v4, %v204_v31 }
 0x1a8   :  { %v344_v6 = vpack.c.bf16 %v4052_v3, %v4047_v63 }
 0x1a9   :  { %v343_v7 = vpack.c.bf16 %v4054_v5, %v4050_v1 }
 0x1ab   :  { %3083 = vmatprep.mubr.msk.bf16.mxu1 %vm361_vm1, %v343_v7 }
 0x1ac   :  { %3084 = vmatmul.mubr.msk.bf16.gmra.mrb[12].mxu1 %vm361_vm1, %v344_v6 }
 0x267   :  { %v3073_v10 = vpop.f32.mrb[0].mxu1 }
 0x268   :  { %v420_v11 = vpop.f32.mrb[1].mxu1  ;;  %v429_v13 = vadd.f32 %v3073_v10, %v348_v9 }
 0x269   :  { %v3074_v12 = vpop.f32.mrb[2].mxu1  ;;  %v421_v16 = vadd.f32 %v420_v11, %v348_v9 }
 0x26a   :  { %v432_v14 = vadd.f32 %v3074_v12, %v348_v9  ;;  %v423_v15 = vpop.f32.mrb[3].mxu1 }
 0x26b   :  { %v424_v17 = vadd.f32 %v423_v15, %v348_v9 }
 0x26c   :  { %v4066_v18 = vpack.c.bf16 %v432_v14, %v429_v13 }
 0x26d   :  { %v483_v19 = vpack.c.bf16 %v424_v17, %v421_v16 }
 0x26f   :  { %495 = vrot.lane.b32.xlu0 %v483_v19, %s3781_s9  ;;  %3095 = vmatprep.mubr.msk.bf16.mxu0 %vm361_vm1, %v483_v19  ;;  %v3077_v20 = vpop.f32.mrb[4].mxu1 }
 0x270   :  { %v445_v21 = vadd.f32 %v3077_v20, %v348_v9  ;;  %v436_v22 = vpop.f32.mrb[5].mxu1 }
 0x271   :  { %v437_v23 = vadd.f32 %v436_v22, %v348_v9  ;;  %v3078_v24 = vpop.f32.mrb[6].mxu1 }
 0x272   :  { %v448_v25 = vadd.f32 %v3078_v24, %v348_v9  ;;  %v439_v26 = vpop.f32.mrb[7].mxu1 }
 0x273   :  { %v440_v27 = vadd.f32 %v439_v26, %v348_v9  ;;  %497 = vrot.lane.b32.xlu0 %v4066_v18, %s3781_s9 }
 0x274   :  { %v4072_v31 = vpack.c.bf16 %v448_v25, %v445_v21 }
 0x275   :  { %v4074_v32 = vpack.c.bf16 %v440_v27, %v437_v23 }
 0x277   :  { %v3081_v33 = vpop.f32.mrb[8].mxu1  ;;  %499 = vrot.lane.b32.xlu1 %v4074_v32, %s3781_s9  ;;  %501 = vrot.lane.b32.xlu0 %v4072_v31, %s3781_s9 }
 0x278   :  { %v461_v34 = vadd.f32 %v3081_v33, %v348_v9  ;;  %v452_v36 = vpop.f32.mrb[9].mxu1 }
 0x279   :  { %v453_v40 = vadd.f32 %v452_v36, %v348_v9  ;;  %v3082_v41 = vpop.f32.mrb[10].mxu1 }
 0x27a   :  { %v464_v42 = vadd.f32 %v3082_v41, %v348_v9  ;;  %v455_v44 = vpop.f32.mrb[11].mxu1 }
 0x27b   :  { %v456_v46 = vadd.f32 %v455_v44, %v348_v9 }
 0x27c   :  { %v4080_v48 = vpack.c.bf16 %v464_v42, %v461_v34 }
 0x27d   :  { %v4082_v50 = vpack.c.bf16 %v456_v46, %v453_v40 }
 0x27f   :  { %596 = vrot.lane.b32.xlu1 %v4082_v50, %s3781_s9  ;;  %v3085_v51 = vpop.f32.mrb[12].mxu1  ;;  %3111 = vmatprep.mubr.msk.bf16.mxu1 %vm361_vm1, %v4082_v50 }
 0x280   :  { %v477_v52 = vadd.f32 %v3085_v51, %v348_v9  ;;  %v468_v54 = vpop.f32.mrb[13].mxu1 }
 0x281   :  { %v469_v56 = vadd.f32 %v468_v54, %v348_v9  ;;  %v3086_v58 = vpop.f32.mrb[14].mxu1 }
 0x282   :  { %v480_v60 = vadd.f32 %v3086_v58, %v348_v9  ;;  %v471_v61 = vpop.f32.mrb[15].mxu1 }
 0x283   :  { %598 = vrot.lane.b32.xlu1 %v4080_v48, %s3781_s9  ;;  %v472_v62 = vadd.f32 %v471_v61, %v348_v9 }
 0x284   :  { %v4090_v0 = vpack.c.bf16 %v480_v60, %v477_v52 }
 0x285   :  { %v4092_v2 = vpack.c.bf16 %v472_v62, %v469_v56 }
 0x287   :  { %602 = vrot.lane.b32.xlu1 %v4090_v0, %s3781_s9  ;;  %600 = vrot.lane.b32.xlu0 %v4092_v2, %s3781_s9 }
 0x28b   :  { %894 = vrot.lane.b32.xlu1 %v483_v19, %s3768_s23 }
 0x28f   :  { %896 = vrot.lane.b32.xlu1 %v4066_v18, %s3768_s23 }
 0x2e1   :  { %v496_v4 = vpop.permute.xlu0 %495 }
 0x2e2   :  { %3275 = vmatprep.subr.msk.bf16.mxu0 %vm361_vm1, %v496_v4  ;;  %v516_v6 = vsel %vm361_vm1, %v496_v4, 0 }
 0x2e3   :  { %3088 = vmatpush3.bf16.xpose.msra.mxu0 %v516_v6 }
 0x2e5   :  { %v498_v7 = vpop.permute.xlu0 %497 }
 0x2e6   :  { %3276 = vmatprep.subr.msk.bf16.mxu0 %vm361_vm1, %v498_v7  ;;  %v519_v10 = vsel %vm361_vm1, %v498_v7, 0 }
 0x2e9   :  { %v500_v9 = vpop.permute.xlu1 %499  ;;  %v502_v14 = vpop.permute.xlu0 %501 }
 0x2ea   :  { %v522_v12 = vsel %vm361_vm1, %v500_v9, 0  ;;  %v525_v19 = vsel %vm361_vm1, %v502_v14, 0 }
 0x2eb   :  { %3090 = vmatpush3.bf16.xpose.msra.mxu0 %v519_v10 }
 0x2ec   :  { %3277 = vmatprep.subr.msk.bf16.mxu0 %vm361_vm1, %v500_v9 }
 0x2f1   :  { %v597_v11 = vpop.permute.xlu1 %596 }
 0x2f2   :  { %3279 = vmatprep.subr.msk.bf16.mxu1 %vm361_vm1, %v597_v11  ;;  %v617_v13 = vsel %vm361_vm1, %v597_v11, 0 }
 0x2f3   :  { %3092 = vmatpush3.bf16.xpose.msra.mxu0 %v522_v12  ;;  %3104 = vmatpush3.bf16.xpose.msra.mxu1 %v617_v13 }
 0x2f4   :  { %3278 = vmatprep.subr.msk.bf16.mxu0 %vm361_vm1, %v502_v14 }
 0x2f5   :  { %v599_v15 = vpop.permute.xlu1 %598 }
 0x2f6   :  { %3280 = vmatprep.subr.msk.bf16.mxu1 %vm361_vm1, %v599_v15  ;;  %v620_v20 = vsel %vm361_vm1, %v599_v15, 0 }
 0x2f9   :  { %v603_v16 = vpop.permute.xlu1 %602  ;;  %v601_v17 = vpop.permute.xlu0 %600 }
 0x2fa   :  { %v623_v22 = vsel %vm361_vm1, %v601_v17, 0  ;;  %v626_v24 = vsel %vm361_vm1, %v603_v16, 0 }
 0x2fb   :  { %3094 = vmatpush3.bf16.xpose.msra.mxu0 %v525_v19  ;;  %3106 = vmatpush3.bf16.xpose.msra.mxu1 %v620_v20 }
 0x2fc   :  { %3281 = vmatprep.subr.msk.bf16.mxu1 %vm361_vm1, %v601_v17 }
 0x2fd   :  { %v895_v21 = vpop.permute.xlu1 %894 }
 0x2fe   :  { %3119 = vmatprep.subr.bf16.mxu0 %v895_v21 }
 0x301   :  { %v897_v23 = vpop.permute.xlu1 %896 }
 0x302   :  { %3096 = vmatmul.mubr.msk.bf16.vlgmr.msra.gmra.mrb[16].mxu0 %vm361_vm1, %v4066_v18 }
 0x303   :  { %3099 = vmatprep.mubr.msk.bf16.mxu0 %vm361_vm1, %v4074_v32  ;;  %3108 = vmatpush3.bf16.xpose.msra.mxu1 %v623_v22 }
 0x304   :  { %3120 = vmatpush3.bf16.msra.mxu0 %v895_v21  ;;  %3282 = vmatprep.subr.msk.bf16.mxu1 %vm361_vm1, %v603_v16 }
 0x305   :  { %3121 = vmatprep.subr.bf16.mxu0 %v897_v23 }
 0x308   :  { %3122 = vmatpush3.bf16.msra.mxu0 %v897_v23 }
 0x30a   :  { %3100 = vmatmul.mubr.msk.bf16.gmra.mrb[20].mxu0 %vm361_vm1, %v4072_v31 }
 0x30b   :  { %3110 = vmatpush3.bf16.xpose.msra.mxu1 %v626_v24 }
 0x312   :  { %3112 = vmatmul.mubr.msk.bf16.vlgmr.msra.gmra.mrb[16].mxu1 %vm361_vm1, %v4080_v48 }
 0x313   :  { %3115 = vmatprep.mubr.msk.bf16.mxu1 %vm361_vm1, %v4092_v2 }
 0x31a   :  { %3116 = vmatmul.mubr.msk.bf16.gmra.mrb[20].mxu1 %vm361_vm1, %v4090_v0 }
 0x3d5   :  { %v3097_v18 = vpop.f32.mrb[16].mxu0 }
 0x3d6   :  { %v4129_v25 = vmul.f32 0.17677669, %v3097_v18  ;;  %v561_v26 = vpop.f32.mrb[17].mxu0 }
 0x3d7   :  { %v3098_v27 = vpop.f32.mrb[18].mxu0  ;;  %v4131_v33 = vmul.f32 0.17677669, %v561_v26 }
 0x3d8   :  { %v564_v34 = vpop.f32.mrb[19].mxu0  ;;  %v716_v36 = vsel %vm709_vm2, %v4129_v25, -inf  ;;  %v4137_v41 = vmul.f32 0.17677669, %v3098_v27 }
 0x3d9   :  { %v4135_v40 = vmul.f32 0.17677669, %v564_v34  ;;  %717 = vmax.xlane.f32.xlu0 %v716_v36  ;;  %v710_v44 = vsel %vm709_vm2, %v4131_v33, -inf }
 0x3da   :  { %v719_v56 = vsel %vm709_vm2, %v4137_v41, -inf }
 0x3db   :  { %v713_v42 = vsel %vm709_vm2, %v4135_v40, -inf }
 0x3dc   :  { %714 = vmax.xlane.f32.xlu1 %v713_v42 }
 0x3dd   :  { %711 = vmax.xlane.f32.xlu0 %v710_v44  ;;  %v3101_v46 = vpop.f32.mrb[20].mxu0 }
 0x3de   :  { %v4143_v51 = vmul.f32 0.17677669, %v3101_v46  ;;  %v577_v52 = vpop.f32.mrb[21].mxu0 }
 0x3df   :  { %v3102_v54 = vpop.f32.mrb[22].mxu0  ;;  %v4147_v58 = vmul.f32 0.17677669, %v577_v52 }
 0x3e0   :  { %v4149_v60 = vmul.f32 0.17677669, %v3102_v54  ;;  %v580_v61 = vpop.f32.mrb[23].mxu0  ;;  %v728_v62 = vsel %vm709_vm2, %v4143_v51, -inf }
 0x3e1   :  { %720 = vmax.xlane.f32.xlu0 %v719_v56  ;;  %729 = vmax.xlane.f32.xlu1 %v728_v62  ;;  %v4153_v4 = vmul.f32 0.17677669, %v580_v61  ;;  %v722_v6 = vsel %vm709_vm2, %v4147_v58, -inf }
 0x3e2   :  { %v731_v7 = vsel %vm709_vm2, %v4149_v60, -inf }
 0x3e3   :  { %v725_v13 = vsel %vm709_vm2, %v4153_v4, -inf }
 0x3e5   :  { %v3113_v9 = vpop.f32.mrb[16].mxu1  ;;  %723 = vmax.xlane.f32.xlu1 %v722_v6  ;;  %732 = vmax.xlane.f32.xlu0 %v731_v7 }
 0x3e6   :  { %v4159_v10 = vmul.f32 0.17677669, %v3113_v9  ;;  %v662_v11 = vpop.f32.mrb[17].mxu1 }
 0x3e7   :  { %v3114_v12 = vpop.f32.mrb[18].mxu1  ;;  %v4163_v14 = vmul.f32 0.17677669, %v662_v11 }
 0x3e8   :  { %v4165_v15 = vmul.f32 0.17677669, %v3114_v12  ;;  %v665_v16 = vpop.f32.mrb[19].mxu1  ;;  %v740_v17 = vsel %vm709_vm2, %v4159_v10, -inf }
 0x3e9   :  { %741 = vmax.xlane.f32.xlu1 %v740_v17  ;;  %726 = vmax.xlane.f32.xlu0 %v725_v13  ;;  %v4169_v19 = vmul.f32 0.17677669, %v665_v16  ;;  %v734_v20 = vsel %vm709_vm2, %v4163_v14, -inf }
 0x3ea   :  { %v743_v21 = vsel %vm709_vm2, %v4165_v15, -inf }
 0x3eb   :  { %v737_v26 = vsel %vm709_vm2, %v4169_v19, -inf }
 0x3ed   :  { %v3117_v22 = vpop.f32.mrb[20].mxu1  ;;  %735 = vmax.xlane.f32.xlu1 %v734_v20  ;;  %744 = vmax.xlane.f32.xlu0 %v743_v21 }
 0x3ee   :  { %v4175_v23 = vmul.f32 0.17677669, %v3117_v22  ;;  %v678_v24 = vpop.f32.mrb[21].mxu1 }
 0x3ef   :  { %v3118_v18 = vpop.f32.mrb[22].mxu1  ;;  %v4179_v27 = vmul.f32 0.17677669, %v678_v24 }
 0x3f0   :  { %v4181_v34 = vmul.f32 0.17677669, %v3118_v18  ;;  %v681_v36 = vpop.f32.mrb[23].mxu1  ;;  %v752_v42 = vsel %vm709_vm2, %v4175_v23, -inf }
 0x3f1   :  { %753 = vmax.xlane.f32.xlu1 %v752_v42  ;;  %738 = vmax.xlane.f32.xlu0 %v737_v26  ;;  %v4185_v44 = vmul.f32 0.17677669, %v681_v36  ;;  %v746_v46 = vsel %vm709_vm2, %v4179_v27, -inf }
 0x3f2   :  { %v755_v52 = vsel %vm709_vm2, %v4181_v34, -inf }
 0x3f3   :  { %v749_v54 = vsel %vm709_vm2, %v4185_v44, -inf }
 0x3f5   :  { %747 = vmax.xlane.f32.xlu1 %v746_v46  ;;  %756 = vmax.xlane.f32.xlu0 %v755_v52 }
 0x3f9   :  { %750 = vmax.xlane.f32.xlu0 %v749_v54 }
 0x406   :  { %900 = vrot.lane.b32.xlu1 %v4072_v31, %s3768_s23 }
 0x40f   :  { %898 = vrot.lane.b32.xlu0 %v4074_v32, %s3768_s23 }
 0x466   :  { %v718_v56 = vpop.xlane.xlu0 %717 }
 0x467   :  { %v760_v61 = vsub.f32 %v4129_v25, %v718_v56 }
 0x469   :  { %v778_v62 = vmul.f32 1.442695, %v760_v61  ;;  %v715_v6 = vpop.xlane.xlu1 %714 }
 0x46a   :  { %v712_v7 = vpop.xlane.xlu0 %711  ;;  %v759_v11 = vsub.f32 %v4135_v40, %v715_v6 }
 0x46b   :  { %3318 = vpow2.f32 %v778_v62  ;;  %v758_v9 = vsub.f32 %v4131_v33, %v712_v7 }
 0x46c   :  { %v776_v32 = vmul.f32 1.442695, %v759_v11 }
 0x46d   :  { %v774_v12 = vmul.f32 1.442695, %v758_v9 }
 0x46e   :  { %v721_v13 = vpop.xlane.xlu0 %720  ;;  %v730_v16 = vpop.xlane.xlu1 %729 }
 0x46f   :  { %3320 = vpow2.f32 %v774_v12  ;;  %v761_v31 = vsub.f32 %v4137_v41, %v721_v13  ;;  %v764_v17 = vsub.f32 %v4143_v51, %v730_v16 }
 0x471   :  { %v780_v20 = vmul.f32 1.442695, %v761_v31  ;;  %v786_v21 = vmul.f32 1.442695, %v764_v17 }
 0x472   :  { %v724_v25 = vpop.xlane.xlu1 %723  ;;  %v733_v22 = vpop.xlane.xlu0 %732 }
 0x473   :  { %3322 = vpow2.f32 %v780_v20  ;;  %v762_v24 = vsub.f32 %v4147_v58, %v724_v25  ;;  %v765_v33 = vsub.f32 %v4149_v60, %v733_v22 }
 0x474   :  { %3324 = vpow2.f32 %v786_v21 }
 0x475   :  { %v4204_v40 = vpop.eup %3318  ;;  %3326 = vpow2.f32 %v776_v32  ;;  %v782_v18 = vmul.f32 1.442695, %v762_v24  ;;  %v788_v26 = vmul.f32 1.442695, %v765_v33 }
 0x476   :  { %v742_v36 = vpop.xlane.xlu1 %741  ;;  %v727_v41 = vpop.xlane.xlu0 %726  ;;  %v812_v51 = vsel %vm709_vm2, %v4204_v40, 0.0 }
 0x477   :  { %3328 = vpow2.f32 %v782_v18  ;;  %v763_v42 = vsub.f32 %v4153_v4, %v727_v41  ;;  %813 = vadd.xlane.f32.xlu1 %v812_v51  ;;  %v768_v58 = vsub.f32 %v4159_v10, %v742_v36 }
 0x478   :  { %3330 = vpow2.f32 %v788_v26 }
 0x479   :  { %v4209_v46 = vpop.eup %3320  ;;  %v784_v60 = vmul.f32 1.442695, %v763_v42  ;;  %v794_v62 = vmul.f32 1.442695, %v768_v58 }
 0x47a   :  { %v736_v52 = vpop.xlane.xlu1 %735  ;;  %v745_v54 = vpop.xlane.xlu0 %744  ;;  %v806_v56 = vsel %vm709_vm2, %v4209_v46, 0.0 }
 0x47b   :  { %807 = vadd.xlane.f32.xlu1 %v806_v56  ;;  %3332 = vpow2.f32 %v784_v60  ;;  %v766_v6 = vsub.f32 %v4163_v14, %v736_v52  ;;  %v769_v16 = vsub.f32 %v4165_v15, %v745_v54 }
 0x47c   :  { %3334 = vpow2.f32 %v794_v62 }
 0x47d   :  { %v4214_v61 = vpop.eup %3322  ;;  %v790_v14 = vmul.f32 1.442695, %v766_v6  ;;  %v796_v24 = vmul.f32 1.442695, %v769_v16 }
 0x47e   :  { %v4217_v4 = vpop.eup %3324  ;;  %v754_v7 = vpop.xlane.xlu1 %753  ;;  %v815_v10 = vsel %vm709_vm2, %v4214_v61, 0.0 }
 0x47f   :  { %v739_v9 = vpop.xlane.xlu0 %738  ;;  %v4221_v11 = vpop.eup %3326  ;;  %v772_v12 = vsub.f32 %v4175_v23, %v754_v7  ;;  %v824_v13 = vsel %vm709_vm2, %v4217_v4, 0.0  ;;  %816 = vadd.xlane.f32.xlu0 %v815_v10 }
 0x480   :  { %825 = vadd.xlane.f32.xlu1 %v824_v13  ;;  %v809_v23 = vsel %vm709_vm2, %v4221_v11, 0.0  ;;  %v767_v33 = vsub.f32 %v4169_v19, %v739_v9 }
 0x481   :  { %v4227_v31 = vpop.eup %3328  ;;  %v802_v17 = vmul.f32 1.442695, %v772_v12 }
 0x482   :  { %v748_v32 = vpop.xlane.xlu1 %747  ;;  %v818_v21 = vsel %vm709_vm2, %v4227_v31, 0.0  ;;  %v4233_v25 = vpop.eup %3330 }
 0x483   :  { %v757_v20 = vpop.xlane.xlu0 %756  ;;  %3336 = vpow2.f32 %v802_v17  ;;  %v770_v22 = vsub.f32 %v4179_v27, %v748_v32  ;;  %810 = vadd.xlane.f32.xlu0 %v809_v23  ;;  %v827_v41 = vsel %vm709_vm2, %v4233_v25, 0.0  ;;  %v792_v27 = vmul.f32 1.442695, %v767_v33 }
 0x484   :  { %v773_v15 = vsub.f32 %v4181_v34, %v757_v20  ;;  %819 = vadd.xlane.f32.xlu1 %v818_v21  ;;  %3338 = vpow2.f32 %v790_v14  ;;  %v3304_v21 = vld [vmem:[#allocation8] sm:$0xff]  }
 0x485   :  { %v798_v18 = vmul.f32 1.442695, %v770_v22  ;;  %v4240_v51 = vpop.eup %3332 }
 0x486   :  { %v804_v26 = vmul.f32 1.442695, %v773_v15  ;;  %v821_v58 = vsel %vm709_vm2, %v4240_v51, 0.0  ;;  %v4245_v19 = vpop.eup %3334  ;;  %v901_v60 = vpop.permute.xlu1 %900 }
 0x487   :  { %v751_v36 = vpop.xlane.xlu0 %750  ;;  %3340 = vpow2.f32 %v798_v18  ;;  %828 = vadd.xlane.f32.xlu0 %v827_v41 }
 0x488   :  { %3342 = vpow2.f32 %v796_v24  ;;  %v771_v34 = vsub.f32 %v4185_v44, %v751_v36  ;;  %v836_v44 = vsel %vm709_vm2, %v4245_v19, 0.0 }
 0x489   :  { %3344 = vpow2.f32 %v804_v26 }
 0x48a   :  { %3346 = vpow2.f32 %v792_v27  ;;  %v800_v54 = vmul.f32 1.442695, %v771_v34 }
 0x48b   :  { %v899_v42 = vpop.permute.xlu0 %898  ;;  %822 = vadd.xlane.f32.xlu0 %v821_v58 }
 0x48c   :  { %3123 = vmatprep.subr.bf16.mxu0 %v899_v42  ;;  %3348 = vpow2.f32 %v800_v54 }
 0x48d   :  { %3124 = vmatpush3.bf16.msra.mxu0 %v899_v42  ;;  %v4247_v52 = vpop.eup %3336 }
 0x48e   :  { %3125 = vmatprep.subr.bf16.mxu0 %v901_v60  ;;  %v848_v56 = vsel %vm709_vm2, %v4247_v52, 0.0  ;;  %v4253_v62 = vpop.eup %3338 }
 0x48f   :  { %849 = vadd.xlane.f32.xlu1 %v848_v56  ;;  %837 = vadd.xlane.f32.xlu0 %v836_v44  ;;  %v830_v10 = vsel %vm709_vm2, %v4253_v62, 0.0 }
 0x491   :  { %3126 = vmatpush3.bf16.msra.mxu0 %v901_v60  ;;  %v4255_v6 = vpop.eup %3340 }
 0x492   :  { %v4257_v7 = vpop.eup %3342  ;;  %v842_v9 = vsel %vm709_vm2, %v4255_v6, 0.0  ;;  %3151 = vmatprep.subr.bf16.mxu0 %v3304_v21 }
 0x493   :  { %v4263_v12 = vpop.eup %3344  ;;  %843 = vadd.xlane.f32.xlu1 %v842_v9  ;;  %831 = vadd.xlane.f32.xlu0 %v830_v10  ;;  %v839_v13 = vsel %vm709_vm2, %v4257_v7, 0.0 }
 0x494   :  { %v851_v16 = vsel %vm709_vm2, %v4263_v12, 0.0  ;;  %v4269_v14 = vpop.eup %3346 }
 0x495   :  { %v833_v17 = vsel %vm709_vm2, %v4269_v14, 0.0 }
 0x496   :  { %v4273_v32 = vpop.eup %3348 }
 0x497   :  { %840 = vadd.xlane.f32.xlu0 %v839_v13  ;;  %852 = vadd.xlane.f32.xlu1 %v851_v16  ;;  %v845_v20 = vsel %vm709_vm2, %v4273_v32, 0.0 }
 0x49b   :  { %834 = vadd.xlane.f32.xlu0 %v833_v17 }
 0x49f   :  { %846 = vadd.xlane.f32.xlu0 %v845_v20 }
 0x4a8   :  { %985 = vrot.lane.b32.xlu1 %v4080_v48, %s3768_s23 }
 0x4ac   :  { %987 = vrot.lane.b32.xlu1 %v4092_v2, %s3768_s23 }
 0x4b0   :  { %989 = vrot.lane.b32.xlu1 %v4090_v0, %s3768_s23 }
 0x4b5   :  { %983 = vrot.lane.b32.xlu0 %v4082_v50, %s3768_s23  ;;  %s3782_s23 = smov 32  }
 0x504   :  { %v814_v23 = vpop.xlane.xlu1 %813 }
 0x508   :  { %v808_v22 = vpop.xlane.xlu1 %807 }
 0x50c   :  { %v817_v15 = vpop.xlane.xlu0 %816 }
 0x50d   :  { %v826_v24 = vpop.xlane.xlu1 %825  ;;  %3350 = vrcp.f32 %v817_v15 }
 0x50e   :  { %3352 = vrcp.f32 %v808_v22 }
 0x50f   :  { %3354 = vrcp.f32 %v814_v23 }
 0x510   :  { %v811_v33 = vpop.xlane.xlu0 %810 }
 0x511   :  { %3356 = vrcp.f32 %v811_v33  ;;  %v820_v48 = vpop.xlane.xlu1 %819 }
 0x514   :  { %v829_v18 = vpop.xlane.xlu0 %828 }
 0x515   :  { %3358 = vrcp.f32 %v829_v18 }
 0x516   :  { %3360 = vrcp.f32 %v820_v48 }
 0x517   :  { %v3351_v2 = vpop.eup %3350  ;;  %3362 = vrcp.f32 %v826_v24 }
 0x518   :  { %v823_v0 = vpop.xlane.xlu0 %822  ;;  %v3353_v26 = vpop.eup %3352  ;;  %v873_v41 = vmul.f32 %v3351_v2, %v4214_v61 }
 0x519   :  { %3364 = vrcp.f32 %v823_v0  ;;  %v3355_v50 = vpop.eup %3354  ;;  %v870_v42 = vmul.f32 %v3353_v26, %v4209_v46 }
 0x51a   :  { %v872_v60 = vmul.f32 %v3355_v50, %v4204_v40 }
 0x51b   :  { %v3357_v36 = vpop.eup %3356 }
 0x51c   :  { %v850_v27 = vpop.xlane.xlu1 %849  ;;  %v838_v34 = vpop.xlane.xlu0 %837  ;;  %v871_v58 = vmul.f32 %v3357_v36, %v4221_v11  ;;  %v887_v56 = vpack.c.bf16 %v873_v41, %v872_v60 }
 0x51e   :  { %v886_v54 = vpack.c.bf16 %v871_v58, %v870_v42 }
 0x51f   :  { %v3359_v44 = vpop.eup %3358 }
 0x520   :  { %3127 = vmatprep.mubr.msk.bf16.mxu0 %vm709_vm2, %v886_v54  ;;  %v832_v9 = vpop.xlane.xlu0 %831  ;;  %v3361_v10 = vpop.eup %3360  ;;  %v877_v17 = vmul.f32 %v3359_v44, %v4233_v25 }
 0x521   :  { %3128 = vmatmul.mubr.msk.bf16.vlgmr.msra.gmra.mrb[24].mxu0 %vm709_vm2, %v887_v56  ;;  %v3363_v13 = vpop.eup %3362  ;;  %v844_v16 = vpop.xlane.xlu1 %843  ;;  %v874_v11 = vmul.f32 %v3361_v10, %v4227_v31  ;;  %3366 = vrcp.f32 %v832_v9 }
 0x522   :  { %3152 = vmatpush3.bf16.msra.mxu0 %v3304_v21  ;;  %v876_v20 = vmul.f32 %v3363_v13, %v4217_v4 }
 0x523   :  { %v3365_v61 = vpop.eup %3364 }
 0x524   :  { %v841_v46 = vpop.xlane.xlu0 %840  ;;  %v875_v40 = vmul.f32 %v3365_v61, %v4240_v51  ;;  %v889_v22 = vpack.c.bf16 %v877_v17, %v876_v20 }
 0x525   :  { %v853_v15 = vpop.xlane.xlu1 %852 }
 0x526   :  { %v888_v23 = vpack.c.bf16 %v875_v40, %v874_v11 }
 0x528   :  { %3131 = vmatprep.mubr.msk.bf16.mxu0 %vm709_vm2, %v888_v23  ;;  %v835_v24 = vpop.xlane.xlu0 %834 }
 0x529   :  { %3368 = vrcp.f32 %v835_v24  ;;  %3132 = vmatmul.mubr.msk.bf16.gmra.mrb[28].mxu0 %vm709_vm2, %v889_v22  ;;  %v986_v25 = vpop.permute.xlu1 %985 }
 0x52a   :  { %3370 = vrcp.f32 %v841_v46 }
 0x52b   :  { %v3367_v33 = vpop.eup %3366 }
 0x52c   :  { %v847_v21 = vpop.xlane.xlu0 %846  ;;  %v878_v48 = vmul.f32 %v3367_v33, %v4253_v62 }
 0x52d   :  { %3372 = vrcp.f32 %v847_v21  ;;  %v988_v51 = vpop.permute.xlu1 %987 }
 0x52e   :  { %3374 = vrcp.f32 %v838_v34 }
 0x52f   :  { %3376 = vrcp.f32 %v844_v16 }
 0x530   :  { %v984_v31 = vpop.permute.xlu0 %983  ;;  %3378 = vrcp.f32 %v853_v15 }
 0x531   :  { %3135 = vmatprep.subr.bf16.mxu1 %v984_v31  ;;  %3380 = vrcp.f32 %v850_v27  ;;  %v990_v36 = vpop.permute.xlu1 %989 }
 0x532   :  { %3136 = vmatpush3.bf16.msra.mxu1 %v984_v31 }
 0x533   :  { %v3369_v4 = vpop.eup %3368  ;;  %3137 = vmatprep.subr.bf16.mxu1 %v986_v25 }
 0x534   :  { %v879_v18 = vmul.f32 %v3369_v4, %v4269_v14  ;;  %v3371_v0 = vpop.eup %3370 }
 0x535   :  { %v881_v34 = vmul.f32 %v3371_v0, %v4257_v7 }
 0x536   :  { %3138 = vmatpush3.bf16.msra.mxu1 %v986_v25  ;;  %v890_v2 = vpack.c.bf16 %v879_v18, %v878_v48  ;;  %v1086_v48 = vsub.s32 2, %v3998_v28 }
 0x537   :  { %3139 = vmatprep.subr.bf16.mxu1 %v988_v51  ;;  %v3373_v26 = vpop.eup %3372 }
 0x538   :  { %3143 = vmatprep.mubr.msk.bf16.mxu1 %vm709_vm2, %v890_v2  ;;  %v3375_v50 = vpop.eup %3374  ;;  %v883_v62 = vmul.f32 %v3373_v26, %v4273_v32  ;;  %v3305_v32 = vld [vmem:[#allocation8 + $0x8] sm:$0xff]   ;;  %v4321_v18 = vrot.slane %v4001_v30, %v1086_v48 }
 0x539   :  { %v3377_v41 = vpop.eup %3376  ;;  %v880_v14 = vmul.f32 %v3375_v50, %v4245_v19  ;;  %3153 = vmatprep.subr.bf16.mxu0 %v3305_v32 }
 0x53a   :  { %3140 = vmatpush3.bf16.msra.mxu1 %v988_v51  ;;  %v882_v42 = vmul.f32 %v3377_v41, %v4255_v6  ;;  %v3379_v60 = vpop.eup %3378  ;;  %3154 = vmatpush3.bf16.msra.mxu0 %v3305_v32 }
 0x53b   :  { %3141 = vmatprep.subr.bf16.mxu1 %v990_v36  ;;  %v891_v58 = vpack.c.bf16 %v881_v34, %v880_v14  ;;  %v3381_v54 = vpop.eup %3380  ;;  %v885_v56 = vmul.f32 %v3379_v60, %v4263_v12 }
 0x53c   :  { %v892_v27 = vpack.c.bf16 %v883_v62, %v882_v42  ;;  %v884_v7 = vmul.f32 %v3381_v54, %v4247_v52 }
 0x53e   :  { %3142 = vmatpush3.bf16.msra.mxu1 %v990_v36  ;;  %v893_v44 = vpack.c.bf16 %v885_v56, %v884_v7 }
 0x541   :  { %3144 = vmatmul.mubr.msk.bf16.vlgmr.msra.gmra.mrb[24].mxu1 %vm709_vm2, %v891_v58 }
 0x542   :  { %3147 = vmatprep.mubr.msk.bf16.mxu1 %vm709_vm2, %v892_v27 }
 0x549   :  { %3148 = vmatmul.mubr.msk.bf16.gmra.mrb[28].mxu1 %vm709_vm2, %v893_v44 }
 0x5f4   :  { %v3129_v19 = vpop.f32.mrb[24].mxu0 }
 0x5f5   :  { %v952_v6 = vpop.f32.mrb[25].mxu0 }
 0x5f6   :  { %v3130_v9 = vpop.f32.mrb[26].mxu0 }
 0x5f7   :  { %v1077_v10 = vpack.c.bf16 %v3130_v9, %v3129_v19  ;;  %v955_v13 = vpop.f32.mrb[27].mxu0 }
 0x5f8   :  { %v1076_v16 = vpack.c.bf16 %v955_v13, %v952_v6 }
 0x5fa   :  { %3155 = vmatprep.mubr.msk.bf16.mxu0 %vm361_vm1, %v1076_v16 }
 0x5fb   :  { %3156 = vmatmul.mubr.msk.bf16.vlgmr.msra.gmra.mrb[32].mxu0 %vm361_vm1, %v1077_v10 }
 0x5fc   :  { %v3133_v61 = vpop.f32.mrb[28].mxu0 }
 0x5fd   :  { %v968_v12 = vpop.f32.mrb[29].mxu0 }
 0x5fe   :  { %v3134_v17 = vpop.f32.mrb[30].mxu0 }
 0x5ff   :  { %v1079_v52 = vpack.c.bf16 %v3134_v17, %v3133_v61  ;;  %v971_v46 = vpop.f32.mrb[31].mxu0 }
 0x600   :  { %v1078_v11 = vpack.c.bf16 %v971_v46, %v968_v12 }
 0x602   :  { %3159 = vmatprep.mubr.msk.bf16.mxu0 %vm361_vm1, %v1078_v11 }
 0x603   :  { %3160 = vmatmul.mubr.msk.bf16.gmra.mrb[36].mxu0 %vm361_vm1, %v1079_v52 }
 0x614   :  { %v3145_v40 = vpop.f32.mrb[24].mxu1 }
 0x615   :  { %v1041_v20 = vpop.f32.mrb[25].mxu1 }
 0x616   :  { %v3146_v23 = vpop.f32.mrb[26].mxu1 }
 0x617   :  { %v1081_v22 = vpack.c.bf16 %v3146_v23, %v3145_v40  ;;  %v1044_v15 = vpop.f32.mrb[27].mxu1 }
 0x618   :  { %v1080_v24 = vpack.c.bf16 %v1044_v15, %v1041_v20 }
 0x61a   :  { %3163 = vmatprep.mubr.msk.bf16.mxu0 %vm361_vm1, %v1080_v24 }
 0x61b   :  { %3164 = vmatmul.mubr.msk.bf16.gmra.mrb[40].mxu0 %vm361_vm1, %v1081_v22 }
 0x61c   :  { %v3149_v21 = vpop.f32.mrb[28].mxu1 }
 0x61d   :  { %v1057_v25 = vpop.f32.mrb[29].mxu1 }
 0x61e   :  { %v3150_v31 = vpop.f32.mrb[30].mxu1 }
 0x61f   :  { %v1083_v33 = vpack.c.bf16 %v3150_v31, %v3149_v21  ;;  %v1060_v4 = vpop.f32.mrb[31].mxu1 }
 0x620   :  { %v1082_v51 = vpack.c.bf16 %v1060_v4, %v1057_v25 }
 0x622   :  { %3167 = vmatprep.mubr.msk.bf16.mxu0 %vm361_vm1, %v1082_v51 }
 0x623   :  { %3168 = vmatmul.mubr.msk.bf16.gmra.mrb[44].mxu0 %vm361_vm1, %v1083_v33 }
 0x6ce   :  { %v3157_v2 = vpop.f32.mrb[32].mxu0 }
 0x6cf   :  { %v1158_v0 = vpop.f32.mrb[33].mxu0  ;;  %v1167_v26 = vadd.f32 %v3157_v2, %v4321_v18 }
 0x6d0   :  { %v1159_v50 = vadd.f32 %v1158_v0, %v4321_v18  ;;  %v3158_v36 = vpop.f32.mrb[34].mxu0 }
 0x6d1   :  { %v1161_v41 = vpop.f32.mrb[35].mxu0  ;;  %v1170_v14 = vadd.f32 %v3158_v36, %v4321_v18  ;;  %v4336_v58 = vadd.f32 %v1167_v26, %v4012_v39 }
 0x6d2   :  { %v1162_v34 = vadd.f32 %v1161_v41, %v4321_v18  ;;  %v4327_v62 = vadd.f32 %v1159_v50, %v4008_v37 }
 0x6d3   :  { %v4341_v37 = vadd.f32 %v1170_v14, %v4006_v35 }
 0x6d4   :  { %v1237_v42 = vsel %vm361_vm1, %v4327_v62, 0.0  ;;  %v4333_v30 = vadd.f32 %v1162_v34, %v4010_v38  ;;  %v1243_v38 = vsel %vm361_vm1, %v4336_v58, 0.0 }
 0x6d5   :  { %1238 = vadd.xlane.f32.xlu0 %v1237_v42  ;;  %v1246_v6 = vsel %vm361_vm1, %v4341_v37, 0.0 }
 0x6d6   :  { %v3161_v60 = vpop.f32.mrb[36].mxu0  ;;  %v1240_v27 = vsel %vm361_vm1, %v4333_v30, 0.0 }
 0x6d7   :  { %1241 = vadd.xlane.f32.xlu1 %v1240_v27  ;;  %v1174_v54 = vpop.f32.mrb[37].mxu0  ;;  %v1183_v56 = vadd.f32 %v3161_v60, %v4321_v18 }
 0x6d8   :  { %v1175_v7 = vadd.f32 %v1174_v54, %v4321_v18  ;;  %v3162_v44 = vpop.f32.mrb[38].mxu0 }
 0x6d9   :  { %1244 = vadd.xlane.f32.xlu0 %v1243_v38  ;;  %v1177_v39 = vpop.f32.mrb[39].mxu0  ;;  %v1186_v35 = vadd.f32 %v3162_v44, %v4321_v18  ;;  %v4360_v13 = vadd.f32 %v1183_v56, %v4019_v43 }
 0x6da   :  { %v1178_v32 = vadd.f32 %v1177_v39, %v4321_v18  ;;  %v4349_v19 = vadd.f32 %v1175_v7, %v4022_v45 }
 0x6db   :  { %v1255_v16 = vsel %vm361_vm1, %v4360_v13, 0.0  ;;  %v4367_v61 = vadd.f32 %v1186_v35, %v4024_v47 }
 0x6dc   :  { %v1249_v9 = vsel %vm361_vm1, %v4349_v19, 0.0  ;;  %v4357_v10 = vadd.f32 %v1178_v32, %v4026_v49 }
 0x6dd   :  { %1247 = vadd.xlane.f32.xlu0 %v1246_v6  ;;  %1250 = vadd.xlane.f32.xlu1 %v1249_v9  ;;  %v1258_v49 = vsel %vm361_vm1, %v4367_v61, 0.0 }
 0x6de   :  { %v1252_v45 = vsel %vm361_vm1, %v4357_v10, 0.0 }
 0x6e1   :  { %1253 = vadd.xlane.f32.xlu0 %v1252_v45  ;;  %1256 = vadd.xlane.f32.xlu1 %v1255_v16 }
 0x6e5   :  { %1259 = vadd.xlane.f32.xlu0 %v1258_v49 }
 0x6ee   :  { %v3165_v12 = vpop.f32.mrb[40].mxu0 }
 0x6ef   :  { %v1190_v43 = vpop.f32.mrb[41].mxu0  ;;  %v1199_v17 = vadd.f32 %v3165_v12, %v4321_v18 }
 0x6f0   :  { %v1191_v52 = vadd.f32 %v1190_v43, %v4321_v18  ;;  %v3166_v46 = vpop.f32.mrb[42].mxu0 }
 0x6f1   :  { %v1193_v11 = vpop.f32.mrb[43].mxu0  ;;  %v1202_v40 = vadd.f32 %v3166_v46, %v4321_v18  ;;  %v4384_v15 = vadd.f32 %v1199_v17, %v4033_v53 }
 0x6f2   :  { %v1194_v20 = vadd.f32 %v1193_v11, %v4321_v18  ;;  %v4376_v47 = vadd.f32 %v1191_v52, %v4036_v55 }
 0x6f3   :  { %v4389_v25 = vadd.f32 %v1202_v40, %v4038_v57 }
 0x6f4   :  { %v1261_v23 = vsel %vm361_vm1, %v4376_v47, 0.0  ;;  %v4381_v22 = vadd.f32 %v1194_v20, %v4040_v59  ;;  %v1267_v59 = vsel %vm361_vm1, %v4384_v15, 0.0 }
 0x6f5   :  { %1262 = vadd.xlane.f32.xlu1 %v1261_v23  ;;  %v1270_v57 = vsel %vm361_vm1, %v4389_v25, 0.0 }
 0x6f6   :  { %v3169_v24 = vpop.f32.mrb[44].mxu0  ;;  %v1264_v21 = vsel %vm361_vm1, %v4381_v22, 0.0 }
 0x6f7   :  { %1265 = vadd.xlane.f32.xlu0 %v1264_v21  ;;  %v1206_v55 = vpop.f32.mrb[45].mxu0  ;;  %v1215_v31 = vadd.f32 %v3169_v24, %v4321_v18 }
 0x6f8   :  { %v1207_v33 = vadd.f32 %v1206_v55, %v4321_v18  ;;  %v3170_v4 = vpop.f32.mrb[46].mxu0 }
 0x6f9   :  { %1268 = vadd.xlane.f32.xlu1 %v1267_v59  ;;  %v1209_v53 = vpop.f32.mrb[47].mxu0  ;;  %v1218_v51 = vadd.f32 %v3170_v4, %v4321_v18  ;;  %v4408_v36 = vadd.f32 %v1215_v31, %v4047_v63 }
 0x6fa   :  { %v1210_v2 = vadd.f32 %v1209_v53, %v4321_v18  ;;  %v4400_v0 = vadd.f32 %v1207_v33, %v4050_v1 }
 0x6fb   :  { %1271 = vadd.xlane.f32.xlu0 %v1270_v57  ;;  %v4413_v41 = vadd.f32 %v1218_v51, %v4052_v3  ;;  %v1279_v1 = vsel %vm361_vm1, %v4408_v36, 0.0 }
 0x6fc   :  { %v1273_v26 = vsel %vm361_vm1, %v4400_v0, 0.0  ;;  %v4405_v50 = vadd.f32 %v1210_v2, %v4054_v5 }
 0x6fd   :  { %1274 = vadd.xlane.f32.xlu1 %v1273_v26  ;;  %v1282_v34 = vsel %vm361_vm1, %v4413_v41, 0.0 }
 0x6fe   :  { %v1276_v18 = vsel %vm361_vm1, %v4405_v50, 0.0 }
 0x6ff   :  { %1277 = vadd.xlane.f32.xlu0 %v1276_v18 }
 0x701   :  { %1280 = vadd.xlane.f32.xlu1 %v1279_v1 }
 0x703   :  { %1283 = vadd.xlane.f32.xlu0 %v1282_v34 }
 0x762   :  { %v1239_v5 = vpop.xlane.xlu0 %1238 }
 0x763   :  { %v1286_v14 = vmul.f32 0.03125, %v1239_v5 }
 0x764   :  { %v1242_v63 = vpop.xlane.xlu1 %1241 }
 0x765   :  { %v4420_v42 = vsub.f32 %v4327_v62, %v1286_v14  ;;  %v1287_v60 = vmul.f32 0.03125, %v1242_v63 }
 0x766   :  { %v1245_v27 = vpop.xlane.xlu0 %1244 }
 0x767   :  { %v4423_v3 = vsub.f32 %v4333_v30, %v1287_v60  ;;  %v1288_v54 = vmul.f32 0.03125, %v1245_v27  ;;  %v1318_v56 = vmul.f32 %v4420_v42, %v4420_v42 }
 0x769   :  { %v4428_v7 = vsub.f32 %v4336_v58, %v1288_v54  ;;  %v1334_v44 = vsel %vm361_vm1, %v1318_v56, 0.0  ;;  %v1319_v38 = vmul.f32 %v4423_v3, %v4423_v3 }
 0x76a   :  { %v1251_v39 = vpop.xlane.xlu1 %1250  ;;  %1335 = vadd.xlane.f32.xlu1 %v1334_v44  ;;  %v1248_v62 = vpop.xlane.xlu0 %1247 }
 0x76b   :  { %v1290_v32 = vmul.f32 0.03125, %v1251_v39  ;;  %v1289_v6 = vmul.f32 0.03125, %v1248_v62  ;;  %v1337_v30 = vsel %vm361_vm1, %v1319_v38, 0.0  ;;  %v1320_v35 = vmul.f32 %v4428_v7, %v4428_v7 }
 0x76c   :  { %1338 = vadd.xlane.f32.xlu0 %v1337_v30 }
 0x76d   :  { %v4437_v9 = vsub.f32 %v4349_v19, %v1290_v32  ;;  %v4440_v58 = vsub.f32 %v4341_v37, %v1289_v6  ;;  %v1340_v45 = vsel %vm361_vm1, %v1320_v35, 0.0 }
 0x76e   :  { %v1257_v16 = vpop.xlane.xlu1 %1256  ;;  %1341 = vadd.xlane.f32.xlu1 %v1340_v45  ;;  %v1254_v49 = vpop.xlane.xlu0 %1253 }
 0x76f   :  { %v1292_v12 = vmul.f32 0.03125, %v1257_v16  ;;  %v1291_v43 = vmul.f32 0.03125, %v1254_v49  ;;  %v1322_v17 = vmul.f32 %v4437_v9, %v4437_v9  ;;  %v1321_v52 = vmul.f32 %v4440_v58, %v4440_v58 }
 0x771   :  { %v4448_v46 = vsub.f32 %v4360_v13, %v1292_v12  ;;  %v4451_v19 = vsub.f32 %v4357_v10, %v1291_v43  ;;  %v1346_v37 = vsel %vm361_vm1, %v1322_v17, 0.0  ;;  %v1343_v11 = vsel %vm361_vm1, %v1321_v52, 0.0 }
 0x772   :  { %1347 = vadd.xlane.f32.xlu1 %v1346_v37  ;;  %1344 = vadd.xlane.f32.xlu0 %v1343_v11  ;;  %v1260_v40 = vpop.xlane.xlu0 %1259  ;;  %v3308_v11 = vld [vmem:[#allocation11] sm:$0xff]  }
 0x773   :  { %v1293_v20 = vmul.f32 0.03125, %v1260_v40  ;;  %v1324_v23 = vmul.f32 %v4448_v46, %v4448_v46  ;;  %v1323_v24 = vmul.f32 %v4451_v19, %v4451_v19  ;;  %3191 = vmatprep.subr.bf16.mxu0 %v3308_v11 }
 0x774   :  { %3192 = vmatpush3.bf16.msra.mxu0 %v3308_v11 }
 0x775   :  { %v4460_v13 = vsub.f32 %v4367_v61, %v1293_v20  ;;  %v1352_v10 = vsel %vm361_vm1, %v1324_v23, 0.0  ;;  %v1349_v21 = vsel %vm361_vm1, %v1323_v24, 0.0 }
 0x776   :  { %1353 = vadd.xlane.f32.xlu1 %v1352_v10  ;;  %1350 = vadd.xlane.f32.xlu0 %v1349_v21 }
 0x777   :  { %v1325_v55 = vmul.f32 %v4460_v13, %v4460_v13 }
 0x779   :  { %v1355_v31 = vsel %vm361_vm1, %v1325_v55, 0.0 }
 0x77a   :  { %1356 = vadd.xlane.f32.xlu0 %v1355_v31 }
 0x782   :  { %v1263_v33 = vpop.xlane.xlu1 %1262 }
 0x783   :  { %v1294_v4 = vmul.f32 0.03125, %v1263_v33 }
 0x784   :  { %v1266_v59 = vpop.xlane.xlu0 %1265 }
 0x785   :  { %v4468_v53 = vsub.f32 %v4376_v47, %v1294_v4  ;;  %v1295_v61 = vmul.f32 0.03125, %v1266_v59 }
 0x786   :  { %v1269_v51 = vpop.xlane.xlu1 %1268 }
 0x787   :  { %v4471_v2 = vsub.f32 %v4381_v22, %v1295_v61  ;;  %v1296_v57 = vmul.f32 0.03125, %v1269_v51  ;;  %v1326_v26 = vmul.f32 %v4468_v53, %v4468_v53 }
 0x788   :  { %v1272_v18 = vpop.xlane.xlu0 %1271 }
 0x789   :  { %v4476_v1 = vsub.f32 %v4384_v15, %v1296_v57  ;;  %v1297_v34 = vmul.f32 0.03125, %v1272_v18  ;;  %v1358_v5 = vsel %vm361_vm1, %v1326_v26, 0.0  ;;  %v1327_v47 = vmul.f32 %v4471_v2, %v4471_v2 }
 0x78a   :  { %v1275_v14 = vpop.xlane.xlu1 %1274  ;;  %1359 = vadd.xlane.f32.xlu1 %v1358_v5  ;;  %v1448_v57 = vsub.s32 3, %v3998_v28 }
 0x78b   :  { %v4482_v63 = vsub.f32 %v4389_v25, %v1297_v34  ;;  %v1298_v22 = vmul.f32 0.03125, %v1275_v14  ;;  %v1361_v60 = vsel %vm361_vm1, %v1327_v47, 0.0  ;;  %v1328_v27 = vmul.f32 %v4476_v1, %v4476_v1  ;;  %v3306_v25 = vld [vmem:[#allocation10] sm:$0xff]  }
 0x78c   :  { %1362 = vadd.xlane.f32.xlu0 %v1361_v60  ;;  %v1278_v15 = vpop.xlane.xlu0 %1277  ;;  %3171 = vmatprep.subr.bf16.mxu1 %v3306_v25 }
 0x78d   :  { %v4488_v54 = vsub.f32 %v4400_v0, %v1298_v22  ;;  %v1299_v56 = vmul.f32 0.03125, %v1278_v15  ;;  %v1364_v44 = vsel %vm361_vm1, %v1328_v27, 0.0  ;;  %v1329_v38 = vmul.f32 %v4482_v63, %v4482_v63  ;;  %3172 = vmatpush3.bf16.msra.mxu1 %v3306_v25  ;;  %v4516_v22 = vld [vmem:[#allocation17] sm:$0xff] }
 0x78e   :  { %v1281_v39 = vpop.xlane.xlu1 %1280  ;;  %1365 = vadd.xlane.f32.xlu1 %v1364_v44  ;;  %v4521_v60 = vrot.slane %v4516_v22, %v1448_v57  ;;  %v1468_v27 = vsub.s32 4, %v3998_v28 }
 0x78f   :  { %v4494_v62 = vsub.f32 %v4405_v50, %v1299_v56  ;;  %v1300_v32 = vmul.f32 0.03125, %v1281_v39  ;;  %v1367_v6 = vsel %vm361_vm1, %v1329_v38, 0.0  ;;  %v1330_v30 = vmul.f32 %v4488_v54, %v4488_v54  ;;  %v3307_v50 = vld [vmem:[#allocation10 + $0x8] sm:$0xff]  }
 0x790   :  { %1368 = vadd.xlane.f32.xlu0 %v1367_v6  ;;  %v1284_v0 = vpop.xlane.xlu0 %1283  ;;  %3173 = vmatprep.subr.bf16.mxu1 %v3307_v50 }
 0x791   :  { %v4500_v35 = vsub.f32 %v4408_v36, %v1300_v32  ;;  %v1301_v45 = vmul.f32 0.03125, %v1284_v0  ;;  %v1370_v16 = vsel %vm361_vm1, %v1330_v30, 0.0  ;;  %v1331_v49 = vmul.f32 %v4494_v62, %v4494_v62  ;;  %3174 = vmatpush3.bf16.msra.mxu1 %v3307_v50 }
 0x792   :  { %1371 = vadd.xlane.f32.xlu1 %v1370_v16  ;;  %v4527_v30 = vrot.slane %v4516_v22, %v1468_v27 }
 0x793   :  { %v4506_v12 = vsub.f32 %v4413_v41, %v1301_v45  ;;  %v1373_v43 = vsel %vm361_vm1, %v1331_v49, 0.0  ;;  %v1332_v17 = vmul.f32 %v4500_v35, %v4500_v35  ;;  %v3309_v41 = vld [vmem:[#allocation11 + $0x8] sm:$0xff]  }
 0x794   :  { %1374 = vadd.xlane.f32.xlu0 %v1373_v43  ;;  %3193 = vmatprep.subr.bf16.mxu0 %v3309_v41 }
 0x795   :  { %v1376_v36 = vsel %vm361_vm1, %v1332_v17, 0.0  ;;  %v1333_v52 = vmul.f32 %v4506_v12, %v4506_v12  ;;  %3194 = vmatpush3.bf16.msra.mxu0 %v3309_v41 }
 0x796   :  { %1377 = vadd.xlane.f32.xlu1 %v1376_v36 }
 0x797   :  { %v1379_v37 = vsel %vm361_vm1, %v1333_v52, 0.0 }
 0x798   :  { %1380 = vadd.xlane.f32.xlu0 %v1379_v37 }
 0x7f7   :  { %v1336_v40 = vpop.xlane.xlu1 %1335 }
 0x7f8   :  { %v1382_v20 = vmul.f32 0.03125, %v1336_v40 }
 0x7f9   :  { %v1339_v23 = vpop.xlane.xlu0 %1338 }
 0x7fa   :  { %v1398_v24 = vadd.f32 1e-05, %v1382_v20  ;;  %v1383_v10 = vmul.f32 0.03125, %v1339_v23 }
 0x7fb   :  { %v1342_v21 = vpop.xlane.xlu1 %1341 }
 0x7fc   :  { %3382 = vrsqrt.f32 %v1398_v24  ;;  %v1399_v55 = vadd.f32 1e-05, %v1383_v10  ;;  %v1384_v31 = vmul.f32 0.03125, %v1342_v21 }
 0x7fe   :  { %3384 = vrsqrt.f32 %v1399_v55  ;;  %v1400_v33 = vadd.f32 1e-05, %v1384_v31 }
 0x7ff   :  { %v1348_v4 = vpop.xlane.xlu1 %1347  ;;  %v1345_v59 = vpop.xlane.xlu0 %1344 }
 0x800   :  { %3386 = vrsqrt.f32 %v1400_v33  ;;  %v1386_v61 = vmul.f32 0.03125, %v1348_v4  ;;  %v1385_v51 = vmul.f32 0.03125, %v1345_v59 }
 0x802   :  { %v1402_v26 = vadd.f32 1e-05, %v1386_v61  ;;  %v1401_v18 = vadd.f32 1e-05, %v1385_v51 }
 0x803   :  { %v1354_v34 = vpop.xlane.xlu1 %1353  ;;  %v1351_v5 = vpop.xlane.xlu0 %1350 }
 0x804   :  { %3388 = vrsqrt.f32 %v1402_v26  ;;  %v1388_v47 = vmul.f32 0.03125, %v1354_v34  ;;  %v1387_v14 = vmul.f32 0.03125, %v1351_v5 }
 0x805   :  { %3390 = vrsqrt.f32 %v1401_v18 }
 0x806   :  { %v3383_v15 = vpop.eup %3382  ;;  %v1404_v56 = vadd.f32 1e-05, %v1388_v47  ;;  %v1403_v44 = vadd.f32 1e-05, %v1387_v14 }
 0x807   :  { %v1430_v38 = vmul.f32 %v3383_v15, %v4420_v42  ;;  %v1357_v39 = vpop.xlane.xlu0 %1356 }
 0x808   :  { %v3385_v25 = vpop.eup %3384  ;;  %3392 = vrsqrt.f32 %v1404_v56  ;;  %v1389_v32 = vmul.f32 0.03125, %v1357_v39 }
 0x809   :  { %v1431_v6 = vmul.f32 %v3385_v25, %v4423_v3  ;;  %3394 = vrsqrt.f32 %v1403_v44  ;;  %v1450_v0 = vmul.f32 %v4521_v60, %v1430_v38 }
 0x80a   :  { %v3387_v45 = vpop.eup %3386  ;;  %v1405_v16 = vadd.f32 1e-05, %v1389_v32 }
 0x80b   :  { %v1451_v49 = vmul.f32 %v4521_v60, %v1431_v6  ;;  %v1432_v50 = vmul.f32 %v3387_v45, %v4428_v7  ;;  %v4533_v42 = vadd.f32 %v4527_v30, %v1450_v0 }
 0x80c   :  { %3396 = vrsqrt.f32 %v1405_v16 }
 0x80d   :  { %v4536_v43 = vadd.f32 %v4527_v30, %v1451_v49  ;;  %v1452_v52 = vmul.f32 %v4521_v60, %v1432_v50 }
 0x80e   :  { %v3389_v3 = vpop.eup %3388 }
 0x80f   :  { %v3391_v17 = vpop.eup %3390  ;;  %v1490_v36 = vpack.c.bf16 %v4536_v43, %v4533_v42  ;;  %v1434_v37 = vmul.f32 %v3389_v3, %v4437_v9  ;;  %v4547_v23 = vadd.f32 %v4527_v30, %v1452_v52 }
 0x810   :  { %v1433_v11 = vmul.f32 %v3391_v17, %v4440_v58 }
 0x811   :  { %3175 = vmatprep.mubr.msk.bf16.mxu1 %vm361_vm1, %v1490_v36  ;;  %v1454_v9 = vmul.f32 %v4521_v60, %v1434_v37 }
 0x812   :  { %v3393_v7 = vpop.eup %3392  ;;  %v1453_v41 = vmul.f32 %v4521_v60, %v1433_v11 }
 0x813   :  { %v3395_v40 = vpop.eup %3394  ;;  %v1436_v20 = vmul.f32 %v3393_v7, %v4448_v46  ;;  %v4561_v59 = vadd.f32 %v4527_v30, %v1454_v9 }
 0x814   :  { %v4550_v24 = vadd.f32 %v4527_v30, %v1453_v41  ;;  %v1435_v10 = vmul.f32 %v3395_v40, %v4451_v19 }
 0x815   :  { %v1456_v46 = vmul.f32 %v4521_v60, %v1436_v20 }
 0x816   :  { %v3397_v21 = vpop.eup %3396  ;;  %v1491_v58 = vpack.c.bf16 %v4550_v24, %v4547_v23  ;;  %v1455_v55 = vmul.f32 %v4521_v60, %v1435_v10 }
 0x817   :  { %v1437_v31 = vmul.f32 %v3397_v21, %v4460_v13  ;;  %v1360_v33 = vpop.xlane.xlu1 %1359  ;;  %v4570_v5 = vadd.f32 %v4527_v30, %v1456_v46 }
 0x818   :  { %v1390_v4 = vmul.f32 0.03125, %v1360_v33  ;;  %3176 = vmatmul.mubr.msk.bf16.vlgmr.msra.gmra.mrb[32].mxu1 %vm361_vm1, %v1491_v58  ;;  %v4564_v19 = vadd.f32 %v4527_v30, %v1455_v55 }
 0x819   :  { %v1363_v61 = vpop.xlane.xlu0 %1362  ;;  %v1457_v51 = vmul.f32 %v4521_v60, %v1437_v31 }
 0x81a   :  { %v1406_v26 = vadd.f32 1e-05, %v1390_v4  ;;  %v1391_v18 = vmul.f32 0.03125, %v1363_v61  ;;  %v1492_v13 = vpack.c.bf16 %v4564_v19, %v4561_v59 }
 0x81b   :  { %v1366_v34 = vpop.xlane.xlu1 %1365  ;;  %v4573_v47 = vadd.f32 %v4527_v30, %v1457_v51 }
 0x81c   :  { %3398 = vrsqrt.f32 %v1406_v26  ;;  %v1407_v14 = vadd.f32 1e-05, %v1391_v18  ;;  %v1392_v27 = vmul.f32 0.03125, %v1366_v34  ;;  %3179 = vmatprep.mubr.msk.bf16.mxu1 %vm361_vm1, %v1492_v13 }
 0x81d   :  { %v1369_v15 = vpop.xlane.xlu0 %1368  ;;  %v1493_v56 = vpack.c.bf16 %v4573_v47, %v4570_v5 }
 0x81e   :  { %3400 = vrsqrt.f32 %v1407_v14  ;;  %v1408_v44 = vadd.f32 1e-05, %v1392_v27  ;;  %v1393_v38 = vmul.f32 0.03125, %v1369_v15 }
 0x81f   :  { %v1372_v39 = vpop.xlane.xlu1 %1371 }
 0x820   :  { %3402 = vrsqrt.f32 %v1408_v44  ;;  %v1409_v25 = vadd.f32 1e-05, %v1393_v38  ;;  %v1394_v32 = vmul.f32 0.03125, %v1372_v39  ;;  %3180 = vmatmul.mubr.msk.bf16.gmra.mrb[36].mxu1 %vm361_vm1, %v1493_v56 }
 0x821   :  { %v1375_v6 = vpop.xlane.xlu0 %1374 }
 0x822   :  { %3404 = vrsqrt.f32 %v1409_v25  ;;  %v1410_v0 = vadd.f32 1e-05, %v1394_v32  ;;  %v1395_v45 = vmul.f32 0.03125, %v1375_v6  ;;  %v3310_v25 = vld [vmem:[#allocation11 + $0x10] sm:$0xff]   ;;  %v3311_v32 = vld [vmem:[#allocation11 + $0x18] sm:$0xff]  }
 0x823   :  { %v1378_v16 = vpop.xlane.xlu1 %1377  ;;  %3195 = vmatprep.subr.bf16.mxu0 %v3310_v25 }
 0x824   :  { %3406 = vrsqrt.f32 %v1410_v0  ;;  %v1411_v49 = vadd.f32 1e-05, %v1395_v45  ;;  %v1396_v50 = vmul.f32 0.03125, %v1378_v16  ;;  %3196 = vmatpush3.bf16.msra.mxu0 %v3310_v25 }
 0x825   :  { %v1381_v3 = vpop.xlane.xlu0 %1380  ;;  %3197 = vmatprep.subr.bf16.mxu0 %v3311_v32 }
 0x826   :  { %v3399_v17 = vpop.eup %3398  ;;  %3408 = vrsqrt.f32 %v1411_v49  ;;  %v1412_v36 = vadd.f32 1e-05, %v1396_v50  ;;  %v1397_v52 = vmul.f32 0.03125, %v1381_v3 }
 0x827   :  { %v1438_v37 = vmul.f32 %v3399_v17, %v4468_v53 }
 0x828   :  { %v3401_v11 = vpop.eup %3400  ;;  %3410 = vrsqrt.f32 %v1412_v36  ;;  %v1413_v7 = vadd.f32 1e-05, %v1397_v52  ;;  %3198 = vmatpush3.bf16.msra.mxu0 %v3311_v32 }
 0x829   :  { %v1439_v41 = vmul.f32 %v3401_v11, %v4471_v2  ;;  %v1458_v40 = vmul.f32 %v4521_v60, %v1438_v37 }
 0x82a   :  { %v3403_v20 = vpop.eup %3402  ;;  %3412 = vrsqrt.f32 %v1413_v7 }
 0x82b   :  { %v1440_v10 = vmul.f32 %v3403_v20, %v4476_v1  ;;  %v1459_v9 = vmul.f32 %v4521_v60, %v1439_v41  ;;  %v4586_v55 = vadd.f32 %v4527_v30, %v1458_v40 }
 0x82c   :  { %v3405_v21 = vpop.eup %3404 }
 0x82d   :  { %v1441_v58 = vmul.f32 %v3405_v21, %v4482_v63  ;;  %v4589_v53 = vadd.f32 %v4527_v30, %v1459_v9  ;;  %v1460_v31 = vmul.f32 %v4521_v60, %v1440_v10 }
 0x82e   :  { %v3407_v2 = vpop.eup %3406 }
 0x82f   :  { %v1442_v33 = vmul.f32 %v3407_v2, %v4488_v54  ;;  %v1494_v46 = vpack.c.bf16 %v4589_v53, %v4586_v55  ;;  %v1461_v1 = vmul.f32 %v4521_v60, %v1441_v58  ;;  %v4599_v63 = vadd.f32 %v4527_v30, %v1460_v31 }
 0x830   :  { %v3409_v4 = vpop.eup %3408 }
 0x831   :  { %v1443_v61 = vmul.f32 %v3409_v4, %v4494_v62  ;;  %3183 = vmatprep.mubr.msk.bf16.mxu1 %vm361_vm1, %v1494_v46  ;;  %v4602_v51 = vadd.f32 %v4527_v30, %v1461_v1  ;;  %v1462_v26 = vmul.f32 %v4521_v60, %v1442_v33 }
 0x832   :  { %v3411_v18 = vpop.eup %3410 }
 0x833   :  { %v1444_v54 = vmul.f32 %v3411_v18, %v4500_v35  ;;  %v1495_v13 = vpack.c.bf16 %v4602_v51, %v4599_v63  ;;  %v1463_v34 = vmul.f32 %v4521_v60, %v1443_v61  ;;  %v4612_v27 = vadd.f32 %v4527_v30, %v1462_v26 }
 0x834   :  { %v3413_v14 = vpop.eup %3412 }
 0x835   :  { %v1445_v62 = vmul.f32 %v3413_v14, %v4506_v12  ;;  %3184 = vmatmul.mubr.msk.bf16.gmra.mrb[40].mxu1 %vm361_vm1, %v1495_v13  ;;  %v4615_v15 = vadd.f32 %v4527_v30, %v1463_v34  ;;  %v1464_v56 = vmul.f32 %v4521_v60, %v1444_v54 }
 0x837   :  { %v1496_v35 = vpack.c.bf16 %v4615_v15, %v4612_v27  ;;  %v1465_v44 = vmul.f32 %v4521_v60, %v1445_v62  ;;  %v4623_v38 = vadd.f32 %v4527_v30, %v1464_v56  ;;  %v1500_v60 = vsub.s32 5, %v3998_v28 }
 0x839   :  { %3187 = vmatprep.mubr.msk.bf16.mxu1 %vm361_vm1, %v1496_v35  ;;  %v4626_v12 = vadd.f32 %v4527_v30, %v1465_v44  ;;  %v1501_v6 = vrot.slane %v4516_v22, %v1500_v60 }
 0x83b   :  { %v1497_v39 = vpack.c.bf16 %v4626_v12, %v4623_v38 }
 0x83d   :  { %3188 = vmatmul.mubr.msk.bf16.gmra.mrb[44].mxu1 %vm361_vm1, %v1497_v39 }
 0x8eb   :  { %v3177_v0 = vpop.f32.mrb[32].mxu1 }
 0x8ec   :  { %v1581_v45 = vadd.f32 %v3177_v0, %v1501_v6  ;;  %v1572_v16 = vpop.f32.mrb[33].mxu1 }
 0x8ed   :  { %v1573_v30 = vadd.f32 %v1572_v16, %v1501_v6  ;;  %v3178_v49 = vpop.f32.mrb[34].mxu1 }
 0x8ee   :  { %v1584_v50 = vadd.f32 %v3178_v49, %v1501_v6  ;;  %v1575_v3 = vpop.f32.mrb[35].mxu1  ;;  %v1637_v36 = vmax.f32 %v1581_v45, 0.0 }
 0x8ef   :  { %v1576_v17 = vadd.f32 %v1575_v3, %v1501_v6  ;;  %v1635_v37 = vmax.f32 %v1573_v30, 0.0 }
 0x8f0   :  { %v1638_v52 = vmax.f32 %v1584_v50, 0.0 }
 0x8f1   :  { %v1636_v11 = vmax.f32 %v1576_v17, 0.0 }
 0x8f2   :  { %v1660_v7 = vpack.c.bf16 %v1638_v52, %v1637_v36 }
 0x8f3   :  { %v1659_v41 = vpack.c.bf16 %v1636_v11, %v1635_v37  ;;  %v3181_v40 = vpop.f32.mrb[36].mxu1 }
 0x8f4   :  { %v1597_v20 = vadd.f32 %v3181_v40, %v1501_v6  ;;  %v1588_v10 = vpop.f32.mrb[37].mxu1 }
 0x8f5   :  { %v1589_v9 = vadd.f32 %v1588_v10, %v1501_v6  ;;  %v3182_v21 = vpop.f32.mrb[38].mxu1  ;;  %3199 = vmatprep.mubr.msk.bf16.mxu0 %vm709_vm2, %v1659_v41 }
 0x8f6   :  { %v1600_v58 = vadd.f32 %v3182_v21, %v1501_v6  ;;  %v1591_v31 = vpop.f32.mrb[39].mxu1  ;;  %3200 = vmatmul.mubr.msk.bf16.vlgmr.msra.gmra.mrb[48].mxu0 %vm709_vm2, %v1660_v7  ;;  %v1641_v33 = vmax.f32 %v1597_v20, 0.0  ;;  %v1669_v20 = vsub.s32 6, %v3998_v28 }
 0x8f7   :  { %v1592_v2 = vadd.f32 %v1591_v31, %v1501_v6  ;;  %v1639_v1 = vmax.f32 %v1589_v9, 0.0 }
 0x8f8   :  { %v1642_v46 = vmax.f32 %v1600_v58, 0.0  ;;  %v4643_v10 = vrot.slane %v4516_v22, %v1669_v20 }
 0x8f9   :  { %v1640_v4 = vmax.f32 %v1592_v2, 0.0 }
 0x8fa   :  { %v1662_v61 = vpack.c.bf16 %v1642_v46, %v1641_v33 }
 0x8fb   :  { %v1661_v26 = vpack.c.bf16 %v1640_v4, %v1639_v1 }
 0x8fd   :  { %3203 = vmatprep.mubr.msk.bf16.mxu0 %vm709_vm2, %v1661_v26 }
 0x8fe   :  { %3204 = vmatmul.mubr.msk.bf16.gmra.mrb[52].mxu0 %vm709_vm2, %v1662_v61 }
 0x908   :  { %v3185_v18 = vpop.f32.mrb[40].mxu1 }
 0x909   :  { %v1613_v54 = vadd.f32 %v3185_v18, %v1501_v6  ;;  %v1604_v13 = vpop.f32.mrb[41].mxu1 }
 0x90a   :  { %v1605_v34 = vadd.f32 %v1604_v13, %v1501_v6  ;;  %v3186_v14 = vpop.f32.mrb[42].mxu1 }
 0x90b   :  { %v1616_v62 = vadd.f32 %v3186_v14, %v1501_v6  ;;  %v1607_v56 = vpop.f32.mrb[43].mxu1  ;;  %v1645_v44 = vmax.f32 %v1613_v54, 0.0 }
 0x90c   :  { %v1608_v35 = vadd.f32 %v1607_v56, %v1501_v6  ;;  %v1643_v25 = vmax.f32 %v1605_v34, 0.0 }
 0x90d   :  { %v1646_v39 = vmax.f32 %v1616_v62, 0.0 }
 0x90e   :  { %v1644_v32 = vmax.f32 %v1608_v35, 0.0 }
 0x90f   :  { %v1664_v60 = vpack.c.bf16 %v1646_v39, %v1645_v44 }
 0x910   :  { %v1663_v0 = vpack.c.bf16 %v1644_v32, %v1643_v25  ;;  %v3189_v45 = vpop.f32.mrb[44].mxu1 }
 0x911   :  { %v1629_v16 = vadd.f32 %v3189_v45, %v1501_v6  ;;  %v1620_v30 = vpop.f32.mrb[45].mxu1 }
 0x912   :  { %v1621_v49 = vadd.f32 %v1620_v30, %v1501_v6  ;;  %v3190_v50 = vpop.f32.mrb[46].mxu1  ;;  %3207 = vmatprep.mubr.msk.bf16.mxu0 %vm709_vm2, %v1663_v0 }
 0x913   :  { %v1632_v3 = vadd.f32 %v3190_v50, %v1501_v6  ;;  %v1623_v17 = vpop.f32.mrb[47].mxu1  ;;  %3208 = vmatmul.mubr.msk.bf16.gmra.mrb[56].mxu0 %vm709_vm2, %v1664_v60  ;;  %v1649_v52 = vmax.f32 %v1629_v16, 0.0 }
 0x914   :  { %v1624_v36 = vadd.f32 %v1623_v17, %v1501_v6  ;;  %v1647_v11 = vmax.f32 %v1621_v49, 0.0 }
 0x915   :  { %v1650_v37 = vmax.f32 %v1632_v3, 0.0 }
 0x916   :  { %v1648_v7 = vmax.f32 %v1624_v36, 0.0 }
 0x917   :  { %v1666_v41 = vpack.c.bf16 %v1650_v37, %v1649_v52 }
 0x918   :  { %v1665_v40 = vpack.c.bf16 %v1648_v7, %v1647_v11 }
 0x91a   :  { %3211 = vmatprep.mubr.msk.bf16.mxu0 %vm709_vm2, %v1665_v40 }
 0x91b   :  { %3212 = vmatmul.mubr.msk.bf16.gmra.mrb[60].mxu0 %vm709_vm2, %v1666_v41 }
 0x9c9   :  { %v3201_v9 = vpop.f32.mrb[48].mxu0 }
 0x9ca   :  { %v1753_v21 = vpop.f32.mrb[49].mxu0  ;;  %v1762_v58 = vadd.f32 %v3201_v9, %v4643_v10 }
 0x9cb   :  { %v1754_v6 = vadd.f32 %v1753_v21, %v4643_v10  ;;  %v3202_v31 = vpop.f32.mrb[50].mxu0 }
 0x9cc   :  { %v1756_v2 = vpop.f32.mrb[51].mxu0  ;;  %v1765_v33 = vadd.f32 %v3202_v31, %v4643_v10  ;;  %v4658_v26 = vadd.f32 %v1762_v58, %v4547_v23 }
 0x9cd   :  { %v1757_v46 = vadd.f32 %v1756_v2, %v4643_v10  ;;  %v4650_v1 = vadd.f32 %v1754_v6, %v4533_v42 }
 0x9ce   :  { %v4663_v13 = vadd.f32 %v1765_v33, %v4550_v24 }
 0x9cf   :  { %v1832_v4 = vsel %vm361_vm1, %v4650_v1, 0.0  ;;  %v4655_v61 = vadd.f32 %v1757_v46, %v4536_v43  ;;  %v1838_v43 = vsel %vm361_vm1, %v4658_v26, 0.0 }
 0x9d0   :  { %1833 = vadd.xlane.f32.xlu1 %v1832_v4  ;;  %v1841_v24 = vsel %vm361_vm1, %v4663_v13, 0.0 }
 0x9d1   :  { %v3205_v18 = vpop.f32.mrb[52].mxu0  ;;  %v1835_v54 = vsel %vm361_vm1, %v4655_v61, 0.0 }
 0x9d2   :  { %1836 = vadd.xlane.f32.xlu0 %v1835_v54  ;;  %v1769_v42 = vpop.f32.mrb[53].mxu0  ;;  %v1778_v34 = vadd.f32 %v3205_v18, %v4643_v10 }
 0x9d3   :  { %v1770_v14 = vadd.f32 %v1769_v42, %v4643_v10  ;;  %v3206_v62 = vpop.f32.mrb[54].mxu0 }
 0x9d4   :  { %1839 = vadd.xlane.f32.xlu1 %v1838_v43  ;;  %v1772_v23 = vpop.f32.mrb[55].mxu0  ;;  %v1781_v56 = vadd.f32 %v3206_v62, %v4643_v10  ;;  %v4682_v32 = vadd.f32 %v1778_v34, %v4570_v5 }
 0x9d5   :  { %v1773_v35 = vadd.f32 %v1772_v23, %v4643_v10  ;;  %v4674_v44 = vadd.f32 %v1770_v14, %v4561_v59 }
 0x9d6   :  { %1842 = vadd.xlane.f32.xlu0 %v1841_v24  ;;  %v4687_v0 = vadd.f32 %v1781_v56, %v4573_v47  ;;  %v1850_v59 = vsel %vm361_vm1, %v4682_v32, 0.0 }
 0x9d7   :  { %v1844_v39 = vsel %vm361_vm1, %v4674_v44, 0.0  ;;  %v4679_v25 = vadd.f32 %v1773_v35, %v4564_v19 }
 0x9d8   :  { %1845 = vadd.xlane.f32.xlu1 %v1844_v39  ;;  %v1853_v45 = vsel %vm361_vm1, %v4687_v0, 0.0 }
 0x9d9   :  { %v1847_v60 = vsel %vm361_vm1, %v4679_v25, 0.0 }
 0x9da   :  { %1848 = vadd.xlane.f32.xlu0 %v1847_v60 }
 0x9dc   :  { %1851 = vadd.xlane.f32.xlu1 %v1850_v59 }
 0x9de   :  { %1854 = vadd.xlane.f32.xlu0 %v1853_v45 }
 0x9e6   :  { %v3209_v19 = vpop.f32.mrb[56].mxu0 }
 0x9e7   :  { %v1785_v16 = vpop.f32.mrb[57].mxu0  ;;  %v1794_v5 = vadd.f32 %v3209_v19, %v4643_v10 }
 0x9e8   :  { %v1786_v30 = vadd.f32 %v1785_v16, %v4643_v10  ;;  %v3210_v49 = vpop.f32.mrb[58].mxu0 }
 0x9e9   :  { %v1788_v50 = vpop.f32.mrb[59].mxu0  ;;  %v1797_v47 = vadd.f32 %v3210_v49, %v4643_v10  ;;  %v4706_v37 = vadd.f32 %v1794_v5, %v4599_v63 }
 0x9ea   :  { %v1789_v3 = vadd.f32 %v1788_v50, %v4643_v10  ;;  %v4698_v17 = vadd.f32 %v1786_v30, %v4586_v55 }
 0x9eb   :  { %v4711_v41 = vadd.f32 %v1797_v47, %v4602_v51 }
 0x9ec   :  { %v1856_v36 = vsel %vm361_vm1, %v4698_v17, 0.0  ;;  %v4703_v52 = vadd.f32 %v1789_v3, %v4589_v53  ;;  %v1862_v53 = vsel %vm361_vm1, %v4706_v37, 0.0 }
 0x9ed   :  { %1857 = vadd.xlane.f32.xlu1 %v1856_v36  ;;  %v1865_v51 = vsel %vm361_vm1, %v4711_v41, 0.0 }
 0x9ee   :  { %v3213_v11 = vpop.f32.mrb[60].mxu0  ;;  %v1859_v7 = vsel %vm361_vm1, %v4703_v52, 0.0 }
 0x9ef   :  { %1860 = vadd.xlane.f32.xlu0 %v1859_v7  ;;  %v1801_v55 = vpop.f32.mrb[61].mxu0  ;;  %v1810_v40 = vadd.f32 %v3213_v11, %v4643_v10 }
 0x9f0   :  { %v1802_v20 = vadd.f32 %v1801_v55, %v4643_v10  ;;  %v3214_v9 = vpop.f32.mrb[62].mxu0 }
 0x9f1   :  { %1863 = vadd.xlane.f32.xlu1 %v1862_v53  ;;  %v1804_v63 = vpop.f32.mrb[63].mxu0  ;;  %v1813_v21 = vadd.f32 %v3214_v9, %v4643_v10  ;;  %v4730_v33 = vadd.f32 %v1810_v40, %v4623_v38 }
 0x9f2   :  { %v1805_v58 = vadd.f32 %v1804_v63, %v4643_v10  ;;  %v4722_v6 = vadd.f32 %v1802_v20, %v4612_v27 }
 0x9f3   :  { %1866 = vadd.xlane.f32.xlu0 %v1865_v51  ;;  %v4735_v46 = vadd.f32 %v1813_v21, %v4626_v12  ;;  %v1874_v27 = vsel %vm361_vm1, %v4730_v33, 0.0 }
 0x9f4   :  { %v1868_v31 = vsel %vm361_vm1, %v4722_v6, 0.0  ;;  %v4727_v2 = vadd.f32 %v1805_v58, %v4615_v15 }
 0x9f5   :  { %1869 = vadd.xlane.f32.xlu1 %v1868_v31  ;;  %v1877_v4 = vsel %vm361_vm1, %v4735_v46, 0.0 }
 0x9f6   :  { %v1871_v10 = vsel %vm361_vm1, %v4727_v2, 0.0 }
 0x9f7   :  { %1872 = vadd.xlane.f32.xlu0 %v1871_v10 }
 0x9f9   :  { %1875 = vadd.xlane.f32.xlu1 %v1874_v27 }
 0x9fb   :  { %1878 = vadd.xlane.f32.xlu0 %v1877_v4 }
 0xa5d   :  { %v1834_v15 = vpop.xlane.xlu1 %1833 }
 0xa5e   :  { %v1880_v18 = vmul.f32 0.03125, %v1834_v15 }
 0xa5f   :  { %v1837_v38 = vpop.xlane.xlu0 %1836 }
 0xa60   :  { %v4742_v54 = vsub.f32 %v4650_v1, %v1880_v18  ;;  %v1881_v42 = vmul.f32 0.03125, %v1837_v38 }
 0xa61   :  { %v1840_v34 = vpop.xlane.xlu1 %1839 }
 0xa62   :  { %v4745_v12 = vsub.f32 %v4655_v61, %v1881_v42  ;;  %v1882_v14 = vmul.f32 0.03125, %v1840_v34  ;;  %v1912_v62 = vmul.f32 %v4742_v54, %v4742_v54 }
 0xa63   :  { %v1843_v43 = vpop.xlane.xlu0 %1842 }
 0xa64   :  { %v4750_v23 = vsub.f32 %v4658_v26, %v1882_v14  ;;  %v1883_v56 = vmul.f32 0.03125, %v1843_v43  ;;  %v1928_v35 = vsel %vm361_vm1, %v1912_v62, 0.0  ;;  %v1913_v1 = vmul.f32 %v4745_v12, %v4745_v12 }
 0xa65   :  { %v1846_v24 = vpop.xlane.xlu1 %1845  ;;  %1929 = vadd.xlane.f32.xlu1 %v1928_v35 }
 0xa66   :  { %v4756_v39 = vsub.f32 %v4663_v13, %v1883_v56  ;;  %v1884_v61 = vmul.f32 0.03125, %v1846_v24  ;;  %v1931_v60 = vsel %vm361_vm1, %v1913_v1, 0.0  ;;  %v1914_v59 = vmul.f32 %v4750_v23, %v4750_v23  ;;  %v3312_v24 = vld [vmem:[#allocation14] sm:$0xff]  }
 0xa67   :  { %1932 = vadd.xlane.f32.xlu0 %v1931_v60  ;;  %v1849_v26 = vpop.xlane.xlu0 %1848  ;;  %3235 = vmatprep.subr.bf16.mxu0 %v3312_v24 }
 0xa68   :  { %v4762_v45 = vsub.f32 %v4674_v44, %v1884_v61  ;;  %v1885_v19 = vmul.f32 0.03125, %v1849_v26  ;;  %v1934_v16 = vsel %vm361_vm1, %v1914_v59, 0.0  ;;  %v1915_v5 = vmul.f32 %v4756_v39, %v4756_v39  ;;  %v3313_v61 = vld [vmem:[#allocation13] sm:$0xff]   ;;  %3236 = vmatpush3.bf16.msra.mxu0 %v3312_v24 }
 0xa69   :  { %v1852_v30 = vpop.xlane.xlu1 %1851  ;;  %1935 = vadd.xlane.f32.xlu1 %v1934_v16  ;;  %3215 = vmatprep.subr.bf16.mxu1 %v3313_v61 }
 0xa6a   :  { %v4768_v13 = vsub.f32 %v4679_v25, %v1885_v19  ;;  %v1886_v49 = vmul.f32 0.03125, %v1852_v30  ;;  %v1937_v50 = vsel %vm361_vm1, %v1915_v5, 0.0  ;;  %v1916_v47 = vmul.f32 %v4762_v45, %v4762_v45  ;;  %3216 = vmatpush3.bf16.msra.mxu1 %v3313_v61 }
 0xa6b   :  { %1938 = vadd.xlane.f32.xlu0 %v1937_v50  ;;  %v1855_v44 = vpop.xlane.xlu0 %1854  ;;  %v3315_v50 = vld [vmem:[#allocation14 + $0x8] sm:$0xff]  }
 0xa6c   :  { %v4774_v3 = vsub.f32 %v4682_v32, %v1886_v49  ;;  %v1887_v36 = vmul.f32 0.03125, %v1855_v44  ;;  %v1940_v11 = vsel %vm361_vm1, %v1916_v47, 0.0  ;;  %v1917_v7 = vmul.f32 %v4768_v13, %v4768_v13  ;;  %3237 = vmatprep.subr.bf16.mxu0 %v3315_v50 }
 0xa6d   :  { %1941 = vadd.xlane.f32.xlu1 %v1940_v11  ;;  %3238 = vmatpush3.bf16.msra.mxu0 %v3315_v50 }
 0xa6e   :  { %v4780_v25 = vsub.f32 %v4687_v0, %v1887_v36  ;;  %v1943_v55 = vsel %vm361_vm1, %v1917_v7, 0.0  ;;  %v1918_v40 = vmul.f32 %v4774_v3, %v4774_v3 }
 0xa6f   :  { %1944 = vadd.xlane.f32.xlu0 %v1943_v55 }
 0xa70   :  { %v1946_v20 = vsel %vm361_vm1, %v1918_v40, 0.0  ;;  %v1919_v32 = vmul.f32 %v4780_v25, %v4780_v25 }
 0xa71   :  { %1947 = vadd.xlane.f32.xlu1 %v1946_v20 }
 0xa72   :  { %v1949_v9 = vsel %vm361_vm1, %v1919_v32, 0.0 }
 0xa73   :  { %1950 = vadd.xlane.f32.xlu0 %v1949_v9 }
 0xa7a   :  { %v1858_v53 = vpop.xlane.xlu1 %1857 }
 0xa7b   :  { %v1888_v63 = vmul.f32 0.03125, %v1858_v53 }
 0xa7c   :  { %v1861_v21 = vpop.xlane.xlu0 %1860 }
 0xa7d   :  { %v4790_v0 = vsub.f32 %v4698_v17, %v1888_v63  ;;  %v1889_v58 = vmul.f32 0.03125, %v1861_v21 }
 0xa7e   :  { %v1864_v51 = vpop.xlane.xlu1 %1863 }
 0xa7f   :  { %v4793_v31 = vsub.f32 %v4703_v52, %v1889_v58  ;;  %v1890_v10 = vmul.f32 0.03125, %v1864_v51  ;;  %v1920_v27 = vmul.f32 %v4790_v0, %v4790_v0 }
 0xa80   :  { %v1867_v4 = vpop.xlane.xlu0 %1866 }
 0xa81   :  { %v4798_v15 = vsub.f32 %v4706_v37, %v1890_v10  ;;  %v1891_v18 = vmul.f32 0.03125, %v1867_v4  ;;  %v1952_v38 = vsel %vm361_vm1, %v1920_v27, 0.0  ;;  %v1921_v17 = vmul.f32 %v4793_v31, %v4793_v31 }
 0xa82   :  { %1953 = vadd.xlane.f32.xlu1 %v1952_v38  ;;  %v1870_v42 = vpop.xlane.xlu1 %1869  ;;  %v2042_v38 = vsub.s32 7, %v3998_v28 }
 0xa83   :  { %v4804_v34 = vsub.f32 %v4711_v41, %v1891_v18  ;;  %v1892_v52 = vmul.f32 0.03125, %v1870_v42  ;;  %v1955_v14 = vsel %vm361_vm1, %v1921_v17, 0.0  ;;  %v1922_v62 = vmul.f32 %v4798_v15, %v4798_v15 }
 0xa84   :  { %1956 = vadd.xlane.f32.xlu0 %v1955_v14  ;;  %v1873_v37 = vpop.xlane.xlu0 %1872 }
 0xa85   :  { %v4810_v43 = vsub.f32 %v4722_v6, %v1892_v52  ;;  %v1893_v56 = vmul.f32 0.03125, %v1873_v37  ;;  %v1958_v35 = vsel %vm361_vm1, %v1922_v62, 0.0  ;;  %v1923_v1 = vmul.f32 %v4804_v34, %v4804_v34 }
 0xa86   :  { %1959 = vadd.xlane.f32.xlu1 %v1958_v35  ;;  %v1876_v41 = vpop.xlane.xlu1 %1875 }
 0xa87   :  { %v4816_v60 = vsub.f32 %v4727_v2, %v1893_v56  ;;  %v1894_v59 = vmul.f32 0.03125, %v1876_v41  ;;  %v1961_v26 = vsel %vm361_vm1, %v1923_v1, 0.0  ;;  %v1924_v6 = vmul.f32 %v4810_v43, %v4810_v43  ;;  %v3314_v2 = vld [vmem:[#allocation13 + $0x8] sm:$0xff]   ;;  %v4844_v41 = vld [vmem:[#allocation17 + $0x8] sm:$0xf] }
 0xa88   :  { %1962 = vadd.xlane.f32.xlu0 %v1961_v26  ;;  %v1879_v19 = vpop.xlane.xlu0 %1878  ;;  %3217 = vmatprep.subr.bf16.mxu1 %v3314_v2  ;;  %v4842_v56 = vrot.slane %v4516_v22, %v2042_v38 }
 0xa89   :  { %v4822_v16 = vsub.f32 %v4730_v33, %v1894_v59  ;;  %v1895_v5 = vmul.f32 0.03125, %v1879_v19  ;;  %v1964_v30 = vsel %vm361_vm1, %v1924_v6, 0.0  ;;  %v1925_v49 = vmul.f32 %v4816_v60, %v4816_v60  ;;  %3218 = vmatpush3.bf16.msra.mxu1 %v3314_v2 }
 0xa8a   :  { %1965 = vadd.xlane.f32.xlu1 %v1964_v30  ;;  %v4850_v19 = vrot.slane %v4844_v41, %v203_v29 }
 0xa8b   :  { %v4828_v47 = vsub.f32 %v4735_v46, %v1895_v5  ;;  %v1967_v44 = vsel %vm361_vm1, %v1925_v49, 0.0  ;;  %v1926_v33 = vmul.f32 %v4822_v16, %v4822_v16  ;;  %v4837_v46 = vld [vmem:[#allocation16] sm:$0xff]  }
 0xa8c   :  { %1968 = vadd.xlane.f32.xlu0 %v1967_v44  ;;  %3255 = vmatprep.subr.bf16.mxu1 %v4837_v46 }
 0xa8d   :  { %v1970_v36 = vsel %vm361_vm1, %v1926_v33, 0.0  ;;  %v1927_v11 = vmul.f32 %v4828_v47, %v4828_v47 }
 0xa8e   :  { %1971 = vadd.xlane.f32.xlu1 %v1970_v36 }
 0xa8f   :  { %v1973_v7 = vsel %vm361_vm1, %v1927_v11, 0.0 }
 0xa90   :  { %1974 = vadd.xlane.f32.xlu0 %v1973_v7 }
 0xaf2   :  { %v1930_v55 = vpop.xlane.xlu1 %1929 }
 0xaf3   :  { %v1976_v40 = vmul.f32 0.03125, %v1930_v55 }
 0xaf4   :  { %v1933_v20 = vpop.xlane.xlu0 %1932 }
 0xaf5   :  { %v1992_v32 = vadd.f32 1e-05, %v1976_v40  ;;  %v1977_v9 = vmul.f32 0.03125, %v1933_v20 }
 0xaf6   :  { %v1936_v53 = vpop.xlane.xlu1 %1935 }
 0xaf7   :  { %3414 = vrsqrt.f32 %v1992_v32  ;;  %v1993_v63 = vadd.f32 1e-05, %v1977_v9  ;;  %v1978_v21 = vmul.f32 0.03125, %v1936_v53 }
 0xaf8   :  { %v1939_v58 = vpop.xlane.xlu0 %1938 }
 0xaf9   :  { %3416 = vrsqrt.f32 %v1993_v63  ;;  %v1994_v51 = vadd.f32 1e-05, %v1978_v21  ;;  %v1979_v10 = vmul.f32 0.03125, %v1939_v58 }
 0xafa   :  { %v1942_v27 = vpop.xlane.xlu1 %1941 }
 0xafb   :  { %3418 = vrsqrt.f32 %v1994_v51  ;;  %v1995_v4 = vadd.f32 1e-05, %v1979_v10  ;;  %v1980_v18 = vmul.f32 0.03125, %v1942_v27 }
 0xafc   :  { %v1945_v17 = vpop.xlane.xlu0 %1944 }
 0xafd   :  { %3420 = vrsqrt.f32 %v1995_v4  ;;  %v1996_v42 = vadd.f32 1e-05, %v1980_v18  ;;  %v1981_v52 = vmul.f32 0.03125, %v1945_v17 }
 0xafe   :  { %v1948_v14 = vpop.xlane.xlu1 %1947 }
 0xaff   :  { %3422 = vrsqrt.f32 %v1996_v42  ;;  %v1997_v62 = vadd.f32 1e-05, %v1981_v52  ;;  %v1982_v37 = vmul.f32 0.03125, %v1948_v14 }
 0xb00   :  { %v1951_v35 = vpop.xlane.xlu0 %1950 }
 0xb01   :  { %v3415_v1 = vpop.eup %3414  ;;  %3424 = vrsqrt.f32 %v1997_v62  ;;  %v1998_v24 = vadd.f32 1e-05, %v1982_v37  ;;  %v1983_v61 = vmul.f32 0.03125, %v1951_v35 }
 0xb02   :  { %v2024_v59 = vmul.f32 %v3415_v1, %v4742_v54 }
 0xb03   :  { %v3417_v26 = vpop.eup %3416  ;;  %3426 = vrsqrt.f32 %v1998_v24  ;;  %v1999_v6 = vadd.f32 1e-05, %v1983_v61 }
 0xb04   :  { %v2025_v22 = vmul.f32 %v3417_v26, %v4745_v12  ;;  %v2044_v5 = vmul.f32 %v4842_v56, %v2024_v59 }
 0xb05   :  { %v3419_v30 = vpop.eup %3418  ;;  %3428 = vrsqrt.f32 %v1999_v6 }
 0xb06   :  { %v2026_v49 = vmul.f32 %v3419_v30, %v4750_v23  ;;  %v2045_v2 = vmul.f32 %v4842_v56, %v2025_v22  ;;  %v4859_v33 = vadd.f32 %v4850_v19, %v2044_v5 }
 0xb07   :  { %v3421_v50 = vpop.eup %3420 }
 0xb08   :  { %v2046_v54 = vmul.f32 %v4842_v56, %v2026_v49  ;;  %v2027_v44 = vmul.f32 %v3421_v50, %v4756_v39  ;;  %v4862_v29 = vadd.f32 %v4850_v19, %v2045_v2 }
 0xb09   :  { %v3423_v12 = vpop.eup %3422 }
 0xb0a   :  { %v2047_v36 = vmul.f32 %v4842_v56, %v2027_v44  ;;  %v2028_v11 = vmul.f32 %v3423_v12, %v4762_v45  ;;  %v2084_v23 = vpack.c.bf16 %v4862_v29, %v4859_v33  ;;  %v4869_v55 = vadd.f32 %v4850_v19, %v2046_v54 }
 0xb0b   :  { %v3425_v7 = vpop.eup %3424 }
 0xb0c   :  { %v4872_v39 = vadd.f32 %v4850_v19, %v2047_v36  ;;  %v2029_v40 = vmul.f32 %v3425_v7, %v4768_v13  ;;  %3219 = vmatprep.mubr.msk.bf16.mxu1 %vm361_vm1, %v2084_v23  ;;  %3239 = vmatprep.mubr.msk.bf16.mxu0 %vm361_vm1, %v2084_v23  ;;  %v2048_v20 = vmul.f32 %v4842_v56, %v2028_v11 }
 0xb0d   :  { %v3427_v32 = vpop.eup %3426 }
 0xb0e   :  { %v2030_v45 = vmul.f32 %v3427_v32, %v4774_v3  ;;  %v2085_v9 = vpack.c.bf16 %v4872_v39, %v4869_v55  ;;  %v2049_v53 = vmul.f32 %v4842_v56, %v2029_v40  ;;  %v4883_v58 = vadd.f32 %v4850_v19, %v2048_v20 }
 0xb0f   :  { %v3429_v63 = vpop.eup %3428  ;;  %v1954_v21 = vpop.xlane.xlu1 %1953 }
 0xb10   :  { %v2031_v13 = vmul.f32 %v3429_v63, %v4780_v25  ;;  %v1984_v51 = vmul.f32 0.03125, %v1954_v21  ;;  %3220 = vmatmul.mubr.msk.bf16.vlgmr.msra.gmra.mrb[48].mxu1 %vm361_vm1, %v2085_v9  ;;  %3240 = vmatmul.mubr.msk.bf16.vlgmr.msra.gmra.mrb[64].mxu0 %vm361_vm1, %v2085_v9  ;;  %v4889_v10 = vadd.f32 %v4850_v19, %v2049_v53  ;;  %v2050_v3 = vmul.f32 %v4842_v56, %v2030_v45 }
 0xb11   :  { %v1957_v27 = vpop.xlane.xlu0 %1956  ;;  %3256 = vmatpush3.bf16.msra.mxu1 %v4837_v46 }
 0xb12   :  { %v2000_v4 = vadd.f32 1e-05, %v1984_v51  ;;  %v1985_v18 = vmul.f32 0.03125, %v1957_v27  ;;  %v2086_v38 = vpack.c.bf16 %v4889_v10, %v4883_v58  ;;  %v2051_v25 = vmul.f32 %v4842_v56, %v2031_v13 }
 0xb13   :  { %v1960_v17 = vpop.xlane.xlu1 %1959  ;;  %v4897_v42 = vadd.f32 %v4850_v19, %v2050_v3 }
 0xb14   :  { %3430 = vrsqrt.f32 %v2000_v4  ;;  %v2001_v52 = vadd.f32 1e-05, %v1985_v18  ;;  %v1986_v14 = vmul.f32 0.03125, %v1960_v17  ;;  %3223 = vmatprep.mubr.msk.bf16.mxu1 %vm361_vm1, %v2086_v38  ;;  %3243 = vmatprep.mubr.msk.bf16.mxu0 %vm361_vm1, %v2086_v38  ;;  %v4902_v46 = vadd.f32 %v4850_v19, %v2051_v25 }
 0xb15   :  { %v1963_v62 = vpop.xlane.xlu0 %1962 }
 0xb16   :  { %3432 = vrsqrt.f32 %v2001_v52  ;;  %v2002_v37 = vadd.f32 1e-05, %v1986_v14  ;;  %v1987_v35 = vmul.f32 0.03125, %v1963_v62  ;;  %v2087_v1 = vpack.c.bf16 %v4902_v46, %v4897_v42 }
 0xb17   :  { %v1966_v24 = vpop.xlane.xlu1 %1965 }
 0xb18   :  { %3434 = vrsqrt.f32 %v2002_v37  ;;  %v2003_v61 = vadd.f32 1e-05, %v1987_v35  ;;  %v1988_v59 = vmul.f32 0.03125, %v1966_v24  ;;  %3224 = vmatmul.mubr.msk.bf16.gmra.mrb[52].mxu1 %vm361_vm1, %v2087_v1  ;;  %3244 = vmatmul.mubr.msk.bf16.gmra.mrb[68].mxu0 %vm361_vm1, %v2087_v1  ;;  %v3317_v24 = vld [vmem:[#allocation16 + $0x8] sm:$0xff]  }
 0xb19   :  { %v1969_v26 = vpop.xlane.xlu0 %1968  ;;  %3257 = vmatprep.subr.bf16.mxu1 %v3317_v24 }
 0xb1a   :  { %3436 = vrsqrt.f32 %v2003_v61  ;;  %v2004_v6 = vadd.f32 1e-05, %v1988_v59  ;;  %v1989_v22 = vmul.f32 0.03125, %v1969_v26  ;;  %3258 = vmatpush3.bf16.msra.mxu1 %v3317_v24 }
 0xb1b   :  { %v1972_v5 = vpop.xlane.xlu1 %1971 }
 0xb1c   :  { %3438 = vrsqrt.f32 %v2004_v6  ;;  %v2005_v30 = vadd.f32 1e-05, %v1989_v22  ;;  %v1990_v49 = vmul.f32 0.03125, %v1972_v5 }
 0xb1d   :  { %v1975_v2 = vpop.xlane.xlu0 %1974 }
 0xb1e   :  { %v3431_v50 = vpop.eup %3430  ;;  %3440 = vrsqrt.f32 %v2005_v30  ;;  %v2006_v54 = vadd.f32 1e-05, %v1990_v49  ;;  %v1991_v44 = vmul.f32 0.03125, %v1975_v2 }
 0xb1f   :  { %v2032_v12 = vmul.f32 %v3431_v50, %v4790_v0 }
 0xb20   :  { %v3433_v36 = vpop.eup %3432  ;;  %3442 = vrsqrt.f32 %v2006_v54  ;;  %v2007_v11 = vadd.f32 1e-05, %v1991_v44 }
 0xb21   :  { %v2033_v23 = vmul.f32 %v3433_v36, %v4793_v31  ;;  %v2052_v7 = vmul.f32 %v4842_v56, %v2032_v12 }
 0xb22   :  { %v3435_v40 = vpop.eup %3434  ;;  %3444 = vrsqrt.f32 %v2007_v11 }
 0xb23   :  { %v2034_v20 = vmul.f32 %v3435_v40, %v4798_v15  ;;  %v2053_v32 = vmul.f32 %v4842_v56, %v2033_v23  ;;  %v4915_v53 = vadd.f32 %v4850_v19, %v2052_v7 }
 0xb24   :  { %v3437_v45 = vpop.eup %3436 }
 0xb25   :  { %v2035_v9 = vmul.f32 %v3437_v45, %v4804_v34  ;;  %v4918_v0 = vadd.f32 %v4850_v19, %v2053_v32  ;;  %v2054_v63 = vmul.f32 %v4842_v56, %v2034_v20 }
 0xb26   :  { %v3439_v31 = vpop.eup %3438 }
 0xb27   :  { %v2036_v21 = vmul.f32 %v3439_v31, %v4810_v43  ;;  %v2088_v13 = vpack.c.bf16 %v4918_v0, %v4915_v53  ;;  %v2055_v15 = vmul.f32 %v4842_v56, %v2035_v9  ;;  %v4926_v3 = vadd.f32 %v4850_v19, %v2054_v63 }
 0xb28   :  { %v3441_v51 = vpop.eup %3440 }
 0xb29   :  { %v2037_v34 = vmul.f32 %v3441_v51, %v4816_v60  ;;  %3227 = vmatprep.mubr.msk.bf16.mxu1 %vm361_vm1, %v2088_v13  ;;  %3247 = vmatprep.mubr.msk.bf16.mxu0 %vm361_vm1, %v2088_v13  ;;  %v4932_v27 = vadd.f32 %v4850_v19, %v2055_v15  ;;  %v2056_v43 = vmul.f32 %v4842_v56, %v2036_v21 }
 0xb2a   :  { %v3443_v4 = vpop.eup %3442 }
 0xb2b   :  { %v2038_v18 = vmul.f32 %v3443_v4, %v4822_v16  ;;  %v2089_v38 = vpack.c.bf16 %v4932_v27, %v4926_v3  ;;  %v2057_v25 = vmul.f32 %v4842_v56, %v2037_v34  ;;  %v4940_v60 = vadd.f32 %v4850_v19, %v2056_v43 }
 0xb2c   :  { %v3445_v17 = vpop.eup %3444 }
 0xb2d   :  { %v2039_v52 = vmul.f32 %v3445_v17, %v4828_v47  ;;  %3228 = vmatmul.mubr.msk.bf16.gmra.mrb[56].mxu1 %vm361_vm1, %v2089_v38  ;;  %3248 = vmatmul.mubr.msk.bf16.gmra.mrb[72].mxu0 %vm361_vm1, %v2089_v38  ;;  %v4946_v14 = vadd.f32 %v4850_v19, %v2057_v25  ;;  %v2058_v16 = vmul.f32 %v4842_v56, %v2038_v18 }
 0xb2f   :  { %v2090_v62 = vpack.c.bf16 %v4946_v14, %v4940_v60  ;;  %v2059_v37 = vmul.f32 %v4842_v56, %v2039_v52  ;;  %v4955_v47 = vadd.f32 %v4850_v19, %v2058_v16  ;;  %v4967_v56 = vrot.slane %v4844_v41, %v347_v8 }
 0xb31   :  { %3231 = vmatprep.mubr.msk.bf16.mxu1 %vm361_vm1, %v2090_v62  ;;  %3251 = vmatprep.mubr.msk.bf16.mxu0 %vm361_vm1, %v2090_v62  ;;  %v4958_v35 = vadd.f32 %v4850_v19, %v2059_v37  ;;  %v4972_v19 = vrot.slane %v4844_v41, %v1086_v48 }
 0xb33   :  { %v2091_v1 = vpack.c.bf16 %v4958_v35, %v4955_v47 }
 0xb35   :  { %3232 = vmatmul.mubr.msk.bf16.gmra.mrb[60].mxu1 %vm361_vm1, %v2091_v1  ;;  %3252 = vmatmul.mubr.msk.bf16.gmra.mrb[76].mxu0 %vm361_vm1, %v2091_v1 }
 0xbe3   :  { %v3221_v61 = vpop.f32.mrb[48].mxu1  ;;  %v3241_v59 = vpop.f32.mrb[64].mxu0 }
 0xbe4   :  { %v2175_v26 = vadd.f32 %v3221_v61, %v4967_v56  ;;  %v2292_v6 = vadd.f32 %v3241_v59, %v4972_v19  ;;  %v2166_v22 = vpop.f32.mrb[49].mxu1  ;;  %v2283_v5 = vpop.f32.mrb[65].mxu0 }
 0xbe5   :  { %v2284_v30 = vadd.f32 %v2283_v5, %v4972_v19  ;;  %v3222_v49 = vpop.f32.mrb[50].mxu1  ;;  %v3242_v2 = vpop.f32.mrb[66].mxu0  ;;  %v2167_v36 = vadd.f32 %v2166_v22, %v4967_v56 }
 0xbe6   :  { %v2295_v8 = vadd.f32 %v3242_v2, %v4972_v19  ;;  %v2286_v50 = vpop.f32.mrb[67].mxu0  ;;  %2627 = vrot.lane.b32.xlu1 %v2175_v26, %s3782_s23  ;;  %v2169_v48 = vpop.f32.mrb[51].mxu1  ;;  %v2348_v12 = vmax.f32 %v2292_v6, 0.0  ;;  %v2178_v9 = vadd.f32 %v3222_v49, %v4967_v56 }
 0xbe7   :  { %v2287_v54 = vadd.f32 %v2286_v50, %v4972_v19  ;;  %v2170_v44 = vadd.f32 %v2169_v48, %v4967_v56  ;;  %v2346_v23 = vmax.f32 %v2284_v30, 0.0 }
 0xbe8   :  { %v2349_v11 = vmax.f32 %v2295_v8, 0.0 }
 0xbe9   :  { %v2347_v7 = vmax.f32 %v2287_v54, 0.0  ;;  %2625 = vrot.lane.b32.xlu0 %v2170_v44, %s3782_s23 }
 0xbea   :  { %v2367_v40 = vpack.c.bf16 %v2349_v11, %v2348_v12  ;;  %2623 = vrot.lane.b32.xlu1 %v2167_v36, %s3782_s23 }
 0xbeb   :  { %v2366_v20 = vpack.c.bf16 %v2347_v7, %v2346_v23  ;;  %v3225_v32 = vpop.f32.mrb[52].mxu1  ;;  %v3245_v45 = vpop.f32.mrb[68].mxu0 }
 0xbec   :  { %v2191_v63 = vadd.f32 %v3225_v32, %v4967_v56  ;;  %v2308_v31 = vadd.f32 %v3245_v45, %v4972_v19  ;;  %v2182_v21 = vpop.f32.mrb[53].mxu1  ;;  %v2299_v13 = vpop.f32.mrb[69].mxu0 }
 0xbed   :  { %v2300_v15 = vadd.f32 %v2299_v13, %v4972_v19  ;;  %v3226_v51 = vpop.f32.mrb[54].mxu1  ;;  %v3246_v34 = vpop.f32.mrb[70].mxu0  ;;  %3259 = vmatprep.mubr.msk.bf16.mxu1 %vm361_vm1, %v2366_v20  ;;  %v2183_v17 = vadd.f32 %v2182_v21, %v4967_v56 }
 0xbee   :  { %v2311_v43 = vadd.f32 %v3246_v34, %v4972_v19  ;;  %2629 = vrot.lane.b32.xlu1 %v2178_v9, %s3782_s23  ;;  %v2302_v4 = vpop.f32.mrb[71].mxu0  ;;  %2635 = vrot.lane.b32.xlu0 %v2191_v63, %s3782_s23  ;;  %v2185_v18 = vpop.f32.mrb[55].mxu1  ;;  %v2352_v25 = vmax.f32 %v2308_v31, 0.0  ;;  %v2194_v52 = vadd.f32 %v3226_v51, %v4967_v56 }
 0xbef   :  { %v2303_v38 = vadd.f32 %v2302_v4, %v4972_v19  ;;  %3260 = vmatmul.mubr.msk.bf16.vlgmr.msra.gmra.mrb[64].mxu1 %vm361_vm1, %v2367_v40  ;;  %v2350_v62 = vmax.f32 %v2300_v15, 0.0  ;;  %v2186_v61 = vadd.f32 %v2185_v18, %v4967_v56 }
 0xbf0   :  { %v2353_v16 = vmax.f32 %v2311_v43, 0.0 }
 0xbf1   :  { %v2351_v37 = vmax.f32 %v2303_v38, 0.0 }
 0xbf2   :  { %v2369_v1 = vpack.c.bf16 %v2353_v16, %v2352_v25  ;;  %2637 = vrot.lane.b32.xlu1 %v2194_v52, %s3782_s23  ;;  %2631 = vrot.lane.b32.xlu0 %v2183_v17, %s3782_s23 }
 0xbf3   :  { %v2368_v24 = vpack.c.bf16 %v2351_v37, %v2350_v62 }
 0xbf5   :  { %3263 = vmatprep.mubr.msk.bf16.mxu1 %vm361_vm1, %v2368_v24 }
 0xbf6   :  { %2633 = vrot.lane.b32.xlu1 %v2186_v61, %s3782_s23 }
 0xbf7   :  { %3264 = vmatmul.mubr.msk.bf16.gmra.mrb[68].mxu1 %vm361_vm1, %v2369_v1 }
 0xc00   :  { %v3229_v59 = vpop.f32.mrb[56].mxu1  ;;  %v3249_v26 = vpop.f32.mrb[72].mxu0 }
 0xc01   :  { %v2207_v6 = vadd.f32 %v3229_v59, %v4967_v56  ;;  %v2324_v22 = vadd.f32 %v3249_v26, %v4972_v19  ;;  %v2198_v5 = vpop.f32.mrb[57].mxu1  ;;  %v2315_v30 = vpop.f32.mrb[73].mxu0 }
 0xc02   :  { %v2316_v49 = vadd.f32 %v2315_v30, %v4972_v19  ;;  %v3230_v2 = vpop.f32.mrb[58].mxu1  ;;  %v3250_v8 = vpop.f32.mrb[74].mxu0  ;;  %v2199_v11 = vadd.f32 %v2198_v5, %v4967_v56 }
 0xc03   :  { %v2210_v50 = vadd.f32 %v3230_v2, %v4967_v56  ;;  %v2327_v48 = vadd.f32 %v3250_v8, %v4972_v19  ;;  %v2318_v54 = vpop.f32.mrb[75].mxu0  ;;  %2643 = vrot.lane.b32.xlu0 %v2207_v6, %s3782_s23  ;;  %v2201_v44 = vpop.f32.mrb[59].mxu1  ;;  %v2356_v36 = vmax.f32 %v2324_v22, 0.0 }
 0xc04   :  { %v2319_v12 = vadd.f32 %v2318_v54, %v4972_v19  ;;  %v2354_v7 = vmax.f32 %v2316_v49, 0.0  ;;  %v2202_v32 = vadd.f32 %v2201_v44, %v4967_v56 }
 0xc05   :  { %v2357_v23 = vmax.f32 %v2327_v48, 0.0  ;;  %2645 = vrot.lane.b32.xlu1 %v2210_v50, %s3782_s23 }
 0xc06   :  { %v2355_v40 = vmax.f32 %v2319_v12, 0.0 }
 0xc07   :  { %v2371_v20 = vpack.c.bf16 %v2357_v23, %v2356_v36  ;;  %2639 = vrot.lane.b32.xlu0 %v2199_v11, %s3782_s23 }
 0xc08   :  { %v2370_v45 = vpack.c.bf16 %v2355_v40, %v2354_v7  ;;  %v3233_v9 = vpop.f32.mrb[60].mxu1  ;;  %v3253_v63 = vpop.f32.mrb[76].mxu0 }
 0xc09   :  { %v2223_v31 = vadd.f32 %v3233_v9, %v4967_v56  ;;  %v2340_v21 = vadd.f32 %v3253_v63, %v4972_v19  ;;  %2641 = vrot.lane.b32.xlu1 %v2202_v32, %s3782_s23  ;;  %v2214_v13 = vpop.f32.mrb[61].mxu1  ;;  %v2331_v15 = vpop.f32.mrb[77].mxu0 }
 0xc0a   :  { %v2332_v51 = vadd.f32 %v2331_v15, %v4972_v19  ;;  %v3234_v34 = vpop.f32.mrb[62].mxu1  ;;  %v3254_v43 = vpop.f32.mrb[78].mxu0  ;;  %3267 = vmatprep.mubr.msk.bf16.mxu1 %vm361_vm1, %v2370_v45  ;;  %v2215_v16 = vadd.f32 %v2214_v13, %v4967_v56 }
 0xc0b   :  { %v2226_v4 = vadd.f32 %v3234_v34, %v4967_v56  ;;  %v2343_v18 = vadd.f32 %v3254_v43, %v4972_v19  ;;  %v2334_v38 = vpop.f32.mrb[79].mxu0  ;;  %3268 = vmatmul.mubr.msk.bf16.gmra.mrb[72].mxu1 %vm361_vm1, %v2371_v20  ;;  %2651 = vrot.lane.b32.xlu0 %v2223_v31, %s3782_s23  ;;  %v2217_v25 = vpop.f32.mrb[63].mxu1  ;;  %v2360_v52 = vmax.f32 %v2340_v21, 0.0 }
 0xc0c   :  { %v2335_v17 = vadd.f32 %v2334_v38, %v4972_v19  ;;  %v2358_v37 = vmax.f32 %v2332_v51, 0.0  ;;  %v2218_v61 = vadd.f32 %v2217_v25, %v4967_v56  ;;  %v5033_v19 = vrot.slane %v4844_v41, %v1448_v57 }
 0xc0d   :  { %v2361_v62 = vmax.f32 %v2343_v18, 0.0  ;;  %2653 = vrot.lane.b32.xlu1 %v2226_v4, %s3782_s23 }
 0xc0e   :  { %v2359_v1 = vmax.f32 %v2335_v17, 0.0 }
 0xc0f   :  { %v2373_v24 = vpack.c.bf16 %v2361_v62, %v2360_v52  ;;  %2647 = vrot.lane.b32.xlu0 %v2215_v16, %s3782_s23 }
 0xc10   :  { %v2372_v59 = vpack.c.bf16 %v2359_v1, %v2358_v37 }
 0xc11   :  { %2649 = vrot.lane.b32.xlu1 %v2218_v61, %s3782_s23 }
 0xc12   :  { %3271 = vmatprep.mubr.msk.bf16.mxu1 %vm361_vm1, %v2372_v59 }
 0xc13   :  { %3272 = vmatmul.mubr.msk.bf16.gmra.mrb[76].mxu1 %vm361_vm1, %v2373_v24 }
 0xcc2   :  { %v3261_v26 = vpop.f32.mrb[64].mxu1 }
 0xcc3   :  { %v2457_v6 = vadd.f32 %v3261_v26, %v5033_v19  ;;  %v2448_v22 = vpop.f32.mrb[65].mxu1 }
 0xcc4   :  { %v2449_v56 = vadd.f32 %v2448_v22, %v5033_v19  ;;  %v3262_v5 = vpop.f32.mrb[66].mxu1 }
 0xcc5   :  { %v2922_v30 = vmul.f32 -1.442695, %v2457_v6  ;;  %v2460_v49 = vadd.f32 %v3262_v5, %v5033_v19  ;;  %v2451_v2 = vpop.f32.mrb[67].mxu1 }
 0xcc6   :  { %v2920_v8 = vmul.f32 -1.442695, %v2449_v56  ;;  %v2452_v50 = vadd.f32 %v2451_v2, %v5033_v19 }
 0xcc7   :  { %3446 = vpow2.f32 %v2922_v30  ;;  %v2923_v48 = vmul.f32 -1.442695, %v2460_v49 }
 0xcc8   :  { %3448 = vpow2.f32 %v2920_v8  ;;  %v2921_v28 = vmul.f32 -1.442695, %v2452_v50 }
 0xcc9   :  { %3450 = vpow2.f32 %v2923_v48 }
 0xcca   :  { %3452 = vpow2.f32 %v2921_v28  ;;  %v3265_v57 = vpop.f32.mrb[68].mxu1 }
 0xccb   :  { %v2473_v41 = vadd.f32 %v3265_v57, %v5033_v19  ;;  %v2464_v54 = vpop.f32.mrb[69].mxu1 }
 0xccc   :  { %v2465_v44 = vadd.f32 %v2464_v54, %v5033_v19  ;;  %v3266_v12 = vpop.f32.mrb[70].mxu1 }
 0xccd   :  { %v2926_v36 = vmul.f32 -1.442695, %v2473_v41  ;;  %v2476_v11 = vadd.f32 %v3266_v12, %v5033_v19  ;;  %v2467_v23 = vpop.f32.mrb[71].mxu1 }
 0xcce   :  { %v2924_v7 = vmul.f32 -1.442695, %v2465_v44  ;;  %v2468_v40 = vadd.f32 %v2467_v23, %v5033_v19 }
 0xccf   :  { %3454 = vpow2.f32 %v2926_v36  ;;  %v2927_v20 = vmul.f32 -1.442695, %v2476_v11 }
 0xcd0   :  { %3456 = vpow2.f32 %v2924_v7  ;;  %v2925_v32 = vmul.f32 -1.442695, %v2468_v40 }
 0xcd1   :  { %v3447_v45 = vpop.eup %3446  ;;  %3458 = vpow2.f32 %v2927_v20 }
 0xcd2   :  { %v3449_v9 = vpop.eup %3448  ;;  %v2561_v63 = vadd.f32 1.0, %v3447_v45  ;;  %3460 = vpow2.f32 %v2925_v32 }
 0xcd3   :  { %v3451_v31 = vpop.eup %3450  ;;  %v2559_v13 = vadd.f32 1.0, %v3449_v9 }
 0xcd4   :  { %v3453_v21 = vpop.eup %3452  ;;  %3462 = vrcp.f32 %v2561_v63  ;;  %v2562_v15 = vadd.f32 1.0, %v3451_v31 }
 0xcd5   :  { %v2560_v51 = vadd.f32 1.0, %v3453_v21 }
 0xcd6   :  { %3464 = vrcp.f32 %v2562_v15 }
 0xcd7   :  { %3466 = vrcp.f32 %v2559_v13 }
 0xcd8   :  { %3468 = vrcp.f32 %v2560_v51 }
 0xcd9   :  { %v3455_v34 = vpop.eup %3454 }
 0xcda   :  { %v3457_v43 = vpop.eup %3456  ;;  %v2565_v4 = vadd.f32 1.0, %v3455_v34 }
 0xcdb   :  { %v3459_v18 = vpop.eup %3458  ;;  %v2563_v25 = vadd.f32 1.0, %v3457_v43 }
 0xcdc   :  { %v3461_v38 = vpop.eup %3460  ;;  %3470 = vrcp.f32 %v2565_v4  ;;  %v2566_v17 = vadd.f32 1.0, %v3459_v18 }
 0xcdd   :  { %v2564_v16 = vadd.f32 1.0, %v3461_v38 }
 0xcde   :  { %v3463_v52 = vpop.eup %3462  ;;  %3472 = vrcp.f32 %v2566_v17  ;;  %v3269_v62 = vpop.f32.mrb[72].mxu1 }
 0xcdf   :  { %2691 = vrot.lane.b32.xlu0 %v3463_v52, %s3783_s5  ;;  %v2489_v37 = vadd.f32 %v3269_v62, %v5033_v19  ;;  %v2480_v1 = vpop.f32.mrb[73].mxu1  ;;  %3474 = vrcp.f32 %v2563_v25 }
 0xce0   :  { %v3465_v24 = vpop.eup %3464  ;;  %v2481_v61 = vadd.f32 %v2480_v1, %v5033_v19  ;;  %v3270_v59 = vpop.f32.mrb[74].mxu1  ;;  %3476 = vrcp.f32 %v2564_v16 }
 0xce1   :  { %v2930_v26 = vmul.f32 -1.442695, %v2489_v37  ;;  %2693 = vrot.lane.b32.xlu1 %v3465_v24, %s3783_s5  ;;  %v2492_v6 = vadd.f32 %v3270_v59, %v5033_v19  ;;  %v2483_v22 = vpop.f32.mrb[75].mxu1  ;;  %v3467_v56 = vpop.eup %3466 }
 0xce2   :  { %v2928_v5 = vmul.f32 -1.442695, %v2481_v61  ;;  %v2484_v30 = vadd.f32 %v2483_v22, %v5033_v19  ;;  %v3469_v2 = vpop.eup %3468 }
 0xce3   :  { %3478 = vpow2.f32 %v2930_v26  ;;  %v2931_v49 = vmul.f32 -1.442695, %v2492_v6  ;;  %2687 = vrot.lane.b32.xlu0 %v3467_v56, %s3783_s5  ;;  %v2628_v6 = vpop.permute.xlu1 %2627  ;;  %v2626_v56 = vpop.permute.xlu0 %2625 }
 0xce4   :  { %3480 = vpow2.f32 %v2928_v5  ;;  %v2929_v8 = vmul.f32 -1.442695, %v2484_v30 }
 0xce5   :  { %3482 = vpow2.f32 %v2931_v49  ;;  %2689 = vrot.lane.b32.xlu1 %v3469_v2, %s3783_s5 }
 0xce6   :  { %v3471_v50 = vpop.eup %3470  ;;  %3484 = vpow2.f32 %v2929_v8  ;;  %v3273_v48 = vpop.f32.mrb[76].mxu1 }
 0xce7   :  { %2699 = vrot.lane.b32.xlu0 %v3471_v50, %s3783_s5  ;;  %v2505_v28 = vadd.f32 %v3273_v48, %v5033_v19  ;;  %v2496_v57 = vpop.f32.mrb[77].mxu1  ;;  %v2624_v22 = vpop.permute.xlu1 %2623 }
 0xce8   :  { %v3473_v41 = vpop.eup %3472  ;;  %v2497_v54 = vadd.f32 %v2496_v57, %v5033_v19  ;;  %v3274_v44 = vpop.f32.mrb[78].mxu1 }
 0xce9   :  { %v2934_v12 = vmul.f32 -1.442695, %v2505_v28  ;;  %2701 = vrot.lane.b32.xlu1 %v3473_v41, %s3783_s5  ;;  %v2508_v36 = vadd.f32 %v3274_v44, %v5033_v19  ;;  %v2499_v11 = vpop.f32.mrb[79].mxu1  ;;  %v3475_v23 = vpop.eup %3474 }
 0xcea   :  { %v2932_v7 = vmul.f32 -1.442695, %v2497_v54  ;;  %v2500_v40 = vadd.f32 %v2499_v11, %v5033_v19  ;;  %v3477_v32 = vpop.eup %3476  ;;  %v2636_v30 = vpop.permute.xlu0 %2635 }
 0xceb   :  { %3486 = vpow2.f32 %v2934_v12  ;;  %v2935_v20 = vmul.f32 -1.442695, %v2508_v36  ;;  %2695 = vrot.lane.b32.xlu0 %v3475_v23, %s3783_s5  ;;  %v2630_v5 = vpop.permute.xlu1 %2629  ;;  %v2737_v36 = vsel %vm361_vm1, %v4869_v55, %v2628_v6 }
 0xcec   :  { %3488 = vpow2.f32 %v2932_v7  ;;  %v2933_v45 = vmul.f32 -1.442695, %v2500_v40  ;;  %v2738_v7 = vsel %vm361_vm1, %v4872_v39, %v2630_v5 }
 0xced   :  { %v3479_v9 = vpop.eup %3478  ;;  %3490 = vpow2.f32 %v2935_v20  ;;  %2697 = vrot.lane.b32.xlu1 %v3477_v32, %s3783_s5 }
 0xcee   :  { %v3481_v63 = vpop.eup %3480  ;;  %v2569_v31 = vadd.f32 1.0, %v3479_v9  ;;  %3492 = vpow2.f32 %v2933_v45  ;;  %v2632_v2 = vpop.permute.xlu0 %2631  ;;  %v2735_v45 = vsel %vm361_vm1, %v4859_v33, %v2624_v22 }
 0xcef   :  { %v3483_v21 = vpop.eup %3482  ;;  %v2567_v15 = vadd.f32 1.0, %v3481_v63  ;;  %v2638_v49 = vpop.permute.xlu1 %2637 }
 0xcf0   :  { %v3485_v13 = vpop.eup %3484  ;;  %3494 = vrcp.f32 %v2569_v31  ;;  %v2570_v51 = vadd.f32 1.0, %v3483_v21  ;;  %v2736_v31 = vsel %vm361_vm1, %v4862_v29, %v2626_v56 }
 0xcf1   :  { %v2568_v19 = vadd.f32 1.0, %v3485_v13 }
 0xcf2   :  { %3496 = vrcp.f32 %v2570_v51  ;;  %v2644_v50 = vpop.permute.xlu0 %2643 }
 0xcf3   :  { %3498 = vrcp.f32 %v2567_v15  ;;  %v2634_v8 = vpop.permute.xlu1 %2633  ;;  %v2741_v15 = vsel %vm361_vm1, %v4897_v42, %v2636_v30 }
 0xcf4   :  { %3500 = vrcp.f32 %v2568_v19 }
 0xcf5   :  { %v3487_v34 = vpop.eup %3486 }
 0xcf6   :  { %v3489_v43 = vpop.eup %3488  ;;  %v2573_v25 = vadd.f32 1.0, %v3487_v34  ;;  %v2640_v28 = vpop.permute.xlu0 %2639  ;;  %v2742_v34 = vsel %vm361_vm1, %v4902_v46, %v2638_v49 }
 0xcf7   :  { %v3491_v4 = vpop.eup %3490  ;;  %v2571_v18 = vadd.f32 1.0, %v3489_v43  ;;  %v2646_v48 = vpop.permute.xlu1 %2645 }
 0xcf8   :  { %v3493_v38 = vpop.eup %3492  ;;  %v2574_v16 = vadd.f32 1.0, %v3491_v4 }
 0xcf9   :  { %3502 = vrcp.f32 %v2571_v18  ;;  %v2572_v17 = vadd.f32 1.0, %v3493_v38  ;;  %v2739_v18 = vsel %vm361_vm1, %v4883_v58, %v2632_v2  ;;  %v2745_v58 = vsel %vm361_vm1, %v4926_v3, %v2644_v50 }
 0xcfa   :  { %v3495_v52 = vpop.eup %3494  ;;  %v5067_v41 = vpop.permute.xlu0 %2651 }
 0xcfb   :  { %3504 = vrcp.f32 %v2572_v17  ;;  %2707 = vrot.lane.b32.xlu0 %v3495_v52, %s3783_s5  ;;  %v2642_v57 = vpop.permute.xlu1 %2641  ;;  %v2740_v17 = vsel %vm361_vm1, %v4889_v10, %v2634_v8 }
 0xcfc   :  { %v3497_v62 = vpop.eup %3496  ;;  %3506 = vrcp.f32 %v2573_v25  ;;  %v2744_v56 = vsel %vm361_vm1, %v4918_v0, %v2642_v57  ;;  %v2749_v57 = vsel %vm361_vm1, %v4955_v47, %v5067_v41 }
 0xcfd   :  { %2709 = vrot.lane.b32.xlu1 %v3497_v62, %s3783_s5  ;;  %v3499_v37 = vpop.eup %3498  ;;  %3508 = vrcp.f32 %v2574_v16 }
 0xcfe   :  { %v3501_v1 = vpop.eup %3500  ;;  %v5071_v44 = vpop.permute.xlu0 %2647 }
 0xcff   :  { %2703 = vrot.lane.b32.xlu0 %v3499_v37, %s3783_s5  ;;  %v5069_v54 = vpop.permute.xlu1 %2653 }
 0xd01   :  { %2705 = vrot.lane.b32.xlu1 %v3501_v1, %s3783_s5 }
 0xd03   :  { %v3503_v24 = vpop.eup %3502  ;;  %v5073_v12 = vpop.permute.xlu1 %2649 }
 0xd04   :  { %2711 = vrot.lane.b32.xlu0 %v3503_v24, %s3783_s5  ;;  %v2746_v24 = vsel %vm361_vm1, %v4932_v27, %v2646_v48  ;;  %v2748_v0 = vsel %vm361_vm1, %v4946_v14, %v5073_v12  ;;  %v2750_v14 = vsel %vm361_vm1, %v4958_v35, %v5069_v54 }
 0xd05   :  { %v3505_v61 = vpop.eup %3504 }
 0xd06   :  { %2713 = vrot.lane.b32.xlu1 %v3505_v61, %s3783_s5  ;;  %v3507_v59 = vpop.eup %3506 }
 0xd07   :  { %v3509_v26 = vpop.eup %3508 }
 0xd08   :  { %2715 = vrot.lane.b32.xlu0 %v3507_v59, %s3783_s5 }
 0xd0a   :  { %2717 = vrot.lane.b32.xlu1 %v3509_v26, %s3783_s5  ;;  %v2743_v26 = vsel %vm361_vm1, %v4915_v53, %v2640_v28  ;;  %v2747_v53 = vsel %vm361_vm1, %v4940_v60, %v5071_v44 }
 0xd51   :  { %v2692_v11 = vpop.permute.xlu0 %2691 }
 0xd52   :  { %v2754_v23 = vsel %vm2751_vm3, %v2737_v36, %v2692_v11 }
 0xd53   :  { %v2771_v40 = vsel %vm2768_vm4, %v2754_v23, 0.0  ;;  %v2694_v20 = vpop.permute.xlu1 %2693 }
 0xd54   :  { %2787 = vst [vmem:[#allocation19 + $0x10] sm:$0xff] %v2771_v40  ;;  %v2755_v32 = vsel %vm2751_vm3, %v2738_v7, %v2694_v20 }
 0xd55   :  { %v2772_v9 = vsel %vm2768_vm4, %v2755_v32, 0.0  ;;  %v2688_v63 = vpop.permute.xlu0 %2687 }
 0xd56   :  { %2788 = vst [vmem:[#allocation19 + $0x18] sm:$0xff] %v2772_v9  ;;  %v2752_v55 = vsel %vm2751_vm3, %v2735_v45, %v2688_v63 }
 0xd57   :  { %v2769_v39 = vsel %vm2768_vm4, %v2752_v55, 0.0  ;;  %v2690_v21 = vpop.permute.xlu1 %2689 }
 0xd58   :  { %2785 = vst [vmem:[#allocation19] sm:$0xff] %v2769_v39  ;;  %v2753_v13 = vsel %vm2751_vm3, %v2736_v31, %v2690_v21 }
 0xd59   :  { %v2770_v33 = vsel %vm2768_vm4, %v2753_v13, 0.0  ;;  %v2700_v51 = vpop.permute.xlu0 %2699 }
 0xd5a   :  { %2786 = vst [vmem:[#allocation19 + $0x8] sm:$0xff] %v2770_v33  ;;  %v2758_v19 = vsel %vm2751_vm3, %v2741_v15, %v2700_v51 }
 0xd5b   :  { %v2775_v29 = vsel %vm2768_vm4, %v2758_v19, 0.0  ;;  %v2702_v43 = vpop.permute.xlu1 %2701 }
 0xd5c   :  { %2791 = vst [vmem:[#allocation19 + $0x30] sm:$0xff] %v2775_v29  ;;  %v2759_v4 = vsel %vm2751_vm3, %v2742_v34, %v2702_v43 }
 0xd5d   :  { %v2776_v42 = vsel %vm2768_vm4, %v2759_v4, 0.0  ;;  %v2696_v38 = vpop.permute.xlu0 %2695 }
 0xd5e   :  { %2792 = vst [vmem:[#allocation19 + $0x38] sm:$0xff] %v2776_v42  ;;  %v2756_v25 = vsel %vm2751_vm3, %v2739_v18, %v2696_v38 }
 0xd5f   :  { %v2773_v46 = vsel %vm2768_vm4, %v2756_v25, 0.0  ;;  %v2698_v52 = vpop.permute.xlu1 %2697 }
 0xd60   :  { %2789 = vst [vmem:[#allocation19 + $0x20] sm:$0xff] %v2773_v46  ;;  %v2757_v16 = vsel %vm2751_vm3, %v2740_v17, %v2698_v52 }
 0xd61   :  { %v2774_v62 = vsel %vm2768_vm4, %v2757_v16, 0.0 }
 0xd62   :  { %2790 = vst [vmem:[#allocation19 + $0x28] sm:$0xff] %v2774_v62 }
 0xd6d   :  { %v2708_v37 = vpop.permute.xlu0 %2707 }
 0xd6e   :  { %v2762_v1 = vsel %vm2751_vm3, %v2745_v58, %v2708_v37 }
 0xd6f   :  { %v2779_v10 = vsel %vm2768_vm4, %v2762_v1, 0.0  ;;  %v2710_v61 = vpop.permute.xlu1 %2709 }
 0xd70   :  { %2795 = vst [vmem:[#allocation19 + $0x50] sm:$0xff] %v2779_v10  ;;  %v2763_v59 = vsel %vm2751_vm3, %v2746_v24, %v2710_v61 }
 0xd71   :  { %v2780_v6 = vsel %vm2768_vm4, %v2763_v59, 0.0  ;;  %v2704_v22 = vpop.permute.xlu0 %2703 }
 0xd72   :  { %2796 = vst [vmem:[#allocation19 + $0x58] sm:$0xff] %v2780_v6  ;;  %v2760_v3 = vsel %vm2751_vm3, %v2743_v26, %v2704_v22 }
 0xd73   :  { %v2777_v27 = vsel %vm2768_vm4, %v2760_v3, 0.0  ;;  %v2706_v5 = vpop.permute.xlu1 %2705 }
 0xd74   :  { %2793 = vst [vmem:[#allocation19 + $0x40] sm:$0xff] %v2777_v27  ;;  %v2761_v30 = vsel %vm2751_vm3, %v2744_v56, %v2706_v5 }
 0xd75   :  { %v2778_v49 = vsel %vm2768_vm4, %v2761_v30, 0.0 }
 0xd76   :  { %2794 = vst [vmem:[#allocation19 + $0x48] sm:$0xff] %v2778_v49  ;;  %v2712_v2 = vpop.permute.xlu0 %2711 }
 0xd77   :  { %v2764_v8 = vsel %vm2751_vm3, %v2747_v53, %v2712_v2 }
 0xd78   :  { %v2781_v50 = vsel %vm2768_vm4, %v2764_v8, 0.0  ;;  %v2714_v48 = vpop.permute.xlu1 %2713 }
 0xd79   :  { %2797 = vst [vmem:[#allocation19 + $0x60] sm:$0xff] %v2781_v50  ;;  %v2765_v28 = vsel %vm2751_vm3, %v2748_v0, %v2714_v48 }
 0xd7a   :  { %v2782_v60 = vsel %vm2768_vm4, %v2765_v28, 0.0  ;;  %v2716_v44 = vpop.permute.xlu0 %2715 }
 0xd7b   :  { %2798 = vst [vmem:[#allocation19 + $0x68] sm:$0xff] %v2782_v60  ;;  %v2766_v36 = vsel %vm2751_vm3, %v2749_v57, %v2716_v44 }
 0xd7c   :  { %v2783_v12 = vsel %vm2768_vm4, %v2766_v36, 0.0  ;;  %v2718_v11 = vpop.permute.xlu1 %2717 }
 0xd7d   :  { %2799 = vst [vmem:[#allocation19 + $0x70] sm:$0xff] %v2783_v12  ;;  %v2767_v23 = vsel %vm2751_vm3, %v2750_v14, %v2718_v11 }
 0xd7e   :  { %v2784_v47 = vsel %vm2768_vm4, %v2767_v23, 0.0 }
 0xd7f   :  { %2800 = vst [vmem:[#allocation19 + $0x78] sm:$0xff] %v2784_v47 }
 0xd80   :  { %3742 = shalt.err (!%p3739_p0)
}
 0xd81   :  { %s3743_s28 = scalar_lea.hbm %s5168_s10, 2048 }
 0xd82   :  { %p3744_p1 = scmp.ne.s32.totalorder %s5168_s10, %s3743_s28  ;;  %p3747_p2 = scmp.lt.u32.totalorder %s3743_s28, %s5168_s10 }
 0xd84   :  { %p3749_p3 = pnand %p3747_p2, %p3744_p1 }
 0xd86   :  { %3752 = shalt.err (!%p3749_p3)
}
 0xd87   :  { %2812 = dma.vmem_to_hbm [thread:$0]  %s2807_s19, 2048, %s5168_s10, [#allocation4], %s3774_s7, %s3774_s7, %s3775_s13  }
 0xd88   :  { %3765 = dma.done.wait [#allocation4], 2048  }
 0xd89   :  { %3766 = vsyncadd [#allocation4], 4294965248 }
 0xd8a   :  { %2816 = vsyncpa [#allocation3], 1 }
 0xd8b   :  { %2817 = vsyncpa [#allocation6], 1 }
 0xd8c   :  { %2818 = vsyncpa [#allocation9], 1 }
 0xd8d   :  { %2819 = vsyncpa [#allocation12], 1 }
 0xd8e   :  { %2820 = vsyncpa [#allocation15], 1 }
 0xd8f   :  { %2821 = vsyncpa [#allocation18], 1 }
 0xd90   :  { %2822 = vsyncpa [#allocation4], 1 }

</bundles_post_ra>
